<compile_context>
chip_gen: v5e
topology: v5e:2x2
jax: 0.10.0
libtpu: 0.0.40
codegen_flags: <defaults>
</compile_context>

<pallas_src>
import functools

import numpy as np
import jax
import jax.numpy as jnp
from jax import lax
from jax.experimental import pallas as pl
from jax.experimental.pallas import tpu as pltpu


GABOR2 = np.array(
    [[8.679555e-17, 2.63136587e-12, 1.24794892e-09, 9.69570624e-09, 1.24794892e-09, 2.63136587e-12, 8.679555e-17],
     [1.91179921e-12, 5.79596904e-08, 2.74879043e-05, 0.000213562142, 2.74879043e-05, 5.79596904e-08, 1.91179921e-12],
     [7.7127485e-10, 2.3382608e-05, 0.0110894121, 0.0861571172, 0.0110894121, 2.3382608e-05, 7.7127485e-10],
     [5.69899314e-09, 0.000172775402, 0.0819402877, 0.636619772, 0.0819402877, 0.000172775402, 5.69899314e-09],
     [7.7127485e-10, 2.3382608e-05, 0.0110894121, 0.0861571172, 0.0110894121, 2.3382608e-05, 7.7127485e-10],
     [1.91179921e-12, 5.79596904e-08, 2.74879043e-05, 0.000213562142, 2.74879043e-05, 5.79596904e-08, 1.91179921e-12],
     [8.679555e-17, 2.63136587e-12, 1.24794892e-09, 9.69570624e-09, 1.24794892e-09, 2.63136587e-12, 8.679555e-17]],
    dtype=np.float64)

# GABOR2 is (to print precision) a rank-1 outer product u (x) v -> separable
# depthwise conv: vertical 7-tap with u, then horizontal 7-tap with v.
_GAB_V = [float(v) for v in GABOR2[3, :]]
_GAB_U = [float(v) for v in (GABOR2[:, 3] / GABOR2[3, 3])]

_EPS = 1e-5        # InstanceNorm2d eps
_BN_EPS = 1e-5     # BatchNorm2d eps (folded, eval mode)

# sub-pixel decomposition of a stride-2, k=3, pad=1, outpad=1 ConvTranspose2d.
# phase order (row_phase, col_phase) = (0,0),(0,1),(1,0),(1,1);
# each tap: (flipped-kernel index t = i*3+j, drow, dcol) into the un-dilated input.
_UP_PHASE_TAPS = (
    ((4, 0, 0),),
    ((3, 0, 0), (5, 0, 1)),
    ((1, 0, 0), (7, 1, 0)),
    ((0, 0, 0), (2, 0, 1), (6, 1, 0), (8, 1, 1)),
)


def _round8(x):
  return ((x + 7) // 8) * 8


# ----------------------------------------------------------------------------
# constant selection matrices / masks (built once in numpy at trace time)
# ----------------------------------------------------------------------------
def _sel_from_pairs(ns, nd, pairs):
  s = np.zeros((ns, nd), np.float32)
  for src, dst in pairs:
    s[src, dst] = 1.0
  return s


def _sel_input(h, w, wp, pad, lbuf):
  """flat (h*w) image -> zero-padded row-major buffer (pad on all sides)."""
  pairs = [(i * w + j, (pad + i) * wp + (pad + j))
           for i in range(h) for j in range(w)]
  return _sel_from_pairs(h * w, lbuf, pairs)


def _sel_dense(h, w, wp_src, dst):
  """stride-1 full-grid lanes (i*wp_src + j) -> interior of `dst` buffer."""
  pairs = [(i * wp_src + j, (1 + i) * dst['wp'] + (1 + j))
           for i in range(h) for j in range(w)]
  return _sel_from_pairs(h * wp_src, dst['lbuf'], pairs)


def _sel_conv(src, dst, stride):
  """full-grid conv output on `src` buffer -> strided interior of `dst`."""
  pairs = [(i * src['wp'] + j,
            (1 + i // stride) * dst['wp'] + (1 + j // stride))
           for i in range(0, src['h'], stride)
           for j in range(0, src['w'], stride)]
  return _sel_from_pairs(src['h'] * src['wp'], dst['lbuf'], pairs)


def _sel_up(src, dst, top):
  """4 stride-phase lane grids -> interleaved 2h x 2w output (padded or flat)."""
  mats = []
  for pr in (0, 1):
    for pc in (0, 1):
      if top:
        nd = (2 * src['h']) * (2 * src['w'])
        pairs = [(r * src['wp'] + c,
                  (2 * r + pr) * (2 * src['w']) + (2 * c + pc))
                 for r in range(src['h']) for c in range(src['w'])]
      else:
        nd = dst['lbuf']
        pairs = [(r * src['wp'] + c,
                  (1 + 2 * r + pr) * dst['wp'] + (1 + 2 * c + pc))
                 for r in range(src['h']) for c in range(src['w'])]
      mats.append(_sel_from_pairs(src['h'] * src['wp'], nd, pairs))
  return np.stack(mats, axis=0)


def _interior_mask(buf):
  m = np.zeros((1, buf['lbuf']), np.float32)
  for i in range(buf['h']):
    for j in range(buf['w']):
      m[0, (1 + i) * buf['wp'] + (1 + j)] = 1.0
  return m


def _te_mask(h, w, wp):
  m = np.zeros((1, h * wp), np.float32)
  for i in range(h):
    for j in range(w):
      m[0, i * wp + j] = 1.0
  return m


def _build_plan_and_consts(cin, cout, channels, h, w):
  c0, c1, c2, c3 = channels
  wp_in = w + 6                              # 7x7 conv, pad=3
  lbuf_in = (h + 7) * wp_in                  # + one slack row of zeros
  l_te = h * wp_in

  def buf(hh, ww):
    return dict(h=hh, w=ww, wp=ww + 2, lbuf=(hh + 3) * (ww + 2))

  b16 = buf(h, w)            # TE output  / down0 input
  b8 = buf(h // 2, w // 2)   # down0 out  / down1 & up0 input
  b4 = buf(h // 4, w // 4)   # down1 out  / down2 & up1 input
  b2 = buf(h // 8, w // 8)   # down2 out  / bottom & up2 input

  def conv_lp(src, co, stride):
    return dict(wp=src['wp'], lfull=src['h'] * src['wp'], cout=co,
                cpad=_round8(co),
                cnt=float((src['h'] // stride) * (src['w'] // stride)))

  def up_lp(src, co):
    return dict(wp=src['wp'], lup=src['h'] * src['wp'], cout=co,
                cpad=_round8(co), cnt=float(4 * src['h'] * src['w']))

  plan = dict(
      cin=cin, wp_in=wp_in, l_te=l_te, te_center=3 * wp_in + 3,
      te_cnt=float(h * w),
      d0=conv_lp(b16, c0, 2),
      d1=conv_lp(b8, c1, 2),
      d2=conv_lp(b4, c2, 2),
      bt=conv_lp(b2, c3, 1),
      u2=up_lp(b2, c1),
      u1=up_lp(b4, c0),
      u0=up_lp(b8, cout),
  )

  consts = dict(
      s_in=jnp.asarray(_sel_input(h, w, wp_in, 3, lbuf_in)),
      te_mask=jnp.asarray(_te_mask(h, w, wp_in)),
      s_te=jnp.asarray(_sel_dense(h, w, wp_in, b16)),
      s_d0=jnp.asarray(_sel_conv(b16, b8, 2)),
      s_d1=jnp.asarray(_sel_conv(b8, b4, 2)),
      s_d2=jnp.asarray(_sel_conv(b4, b2, 2)),
      s_bt=jnp.asarray(_sel_conv(b2, b2, 1)),
      s_u2=jnp.asarray(_sel_up(b2, b4, top=False)),
      s_u1=jnp.asarray(_sel_up(b4, b8, top=False)),
      s_u0=jnp.asarray(_sel_up(b8, None, top=True)),
      m_d0=jnp.asarray(_interior_mask(b8)),
      m_d1=jnp.asarray(_interior_mask(b4)),
      m_d2=jnp.asarray(_interior_mask(b2)),
  )
  return plan, consts


# ----------------------------------------------------------------------------
# the fused kernel
# ----------------------------------------------------------------------------
def _fused_kernel(x_ref, scal_ref,
                  sin_ref, temask_ref, w1t_ref, w2_ref, wa1_ref, wb1_ref,
                  b1_ref, ste_ref,
                  wd0_ref, sd0_ref, md0_ref,
                  wd1_ref, sd1_ref, md1_ref,
                  wd2_ref, sd2_ref, md2_ref,
                  wbt_ref, sbt_ref,
                  wu2a_ref, wu2b_ref, su2_ref,
                  wu1a_ref, wu1b_ref, su1_ref,
                  wu0a_ref, wu0b_ref, su0_ref, bu0_ref,
                  o_ref, *, plan):
  p = plan
  f32 = jnp.float32

  # ---- scatter the input into the 7x7 zero-padded lane buffer -------------
  xflat = x_ref[0]                                               # (Cin, H*W)
  xbuf = jnp.dot(xflat, sin_ref[...], preferred_element_type=f32)

  # ---- TE block: separable depthwise Gabor conv + PReLU -------------------
  wpi, l_te = p['wp_in'], p['l_te']
  lv = l_te + 6
  tmp = _GAB_U[0] * xbuf[:, 0:lv]
  for kh in range(1, 7):
    tmp = tmp + _GAB_U[kh] * xbuf[:, kh * wpi:kh * wpi + lv]
  acc = _GAB_V[0] * tmp[:, 0:l_te]
  for kw in range(1, 7):
    acc = acc + _GAB_V[kw] * tmp[:, kw:kw + l_te]
  a_tex = scal_ref[0, 0]
  xt2 = jnp.where(acc >= 0, acc, a_tex * acc)

  # SEAttention: pool over the h*w valid lanes -> fc1 -> relu -> fc2 -> gate
  tmask = temask_ref[...]                                        # (1, l_te)
  m = jnp.sum(xt2 * tmask, axis=1, keepdims=True) * (1.0 / p['te_cnt'])
  h1 = jnp.maximum(jnp.sum(w1t_ref[...] * m, axis=0, keepdims=True), 0.0)
  gate = jax.nn.sigmoid(jnp.sum(w2_ref[...] * h1, axis=1, keepdims=True))
  xt3 = xt2 * gate

  # concat-free 1x1 conv (eval-mode BN folded) + PReLU
  ctr = p['te_center']
  xg = xbuf[:, ctr:ctr + l_te]                 # original x on the TE lane grid
  y = (jnp.dot(wa1_ref[...], xt3, preferred_element_type=f32)
       + jnp.dot(wb1_ref[...], xg, preferred_element_type=f32)
       + b1_ref[...])
  a_out = scal_ref[0, 1]
  y = jnp.where(y >= 0, y, a_out * y)
  # assemble the down0 padded input buffer (zero padding comes for free)
  b_te = jnp.dot(y, ste_ref[...], preferred_element_type=f32)

  # ---- generic conv / transposed-conv layers -------------------------------
  def conv_layer(buf, w_ref, s_ref, mask, alpha, lp):
    """3x3 conv (stacked-tap matmul) + select/pad + InstanceNorm + PReLU."""
    ybig = jnp.dot(w_ref[...], buf.astype(jnp.bfloat16),
                   preferred_element_type=f32)            # (9*cpad, lbuf_src)
    cpad, co, lf, wp = lp['cpad'], lp['cout'], lp['lfull'], lp['wp']
    acc = None
    for t in range(9):
      off = (t // 3) * wp + (t % 3)
      part = ybig[t * cpad:t * cpad + co, off:off + lf]
      acc = part if acc is None else acc + part
    # conv bias omitted: it cancels exactly under InstanceNorm(affine=False)
    z = jnp.dot(acc, s_ref[...], preferred_element_type=f32)  # (co, lbuf_dst)
    inv_cnt = 1.0 / lp['cnt']
    mean = jnp.sum(z, axis=1, keepdims=True) * inv_cnt
    d = (z - mean) * mask                      # padding lanes stay exactly 0
    var = jnp.sum(d * d, axis=1, keepdims=True) * inv_cnt
    yn = d * lax.rsqrt(var + _EPS)
    return jnp.where(yn >= 0, yn, alpha * yn)

  def up_layer(bufa, bufb, wa_ref, wb_ref, s_ref, lp,
               mask=None, alpha=None, bias=None):
    """stride-2 ConvTranspose on cat([xa, xb]) via 4-phase decomposition."""
    ysum = (jnp.dot(wa_ref[...], bufa.astype(jnp.bfloat16),
                    preferred_element_type=f32)
            + jnp.dot(wb_ref[...], bufb.astype(jnp.bfloat16),
                      preferred_element_type=f32))        # (9*cpad, lbuf_src)
    cpad, co, l, wp = lp['cpad'], lp['cout'], lp['lup'], lp['wp']
    z = None
    for ph, taps in enumerate(_UP_PHASE_TAPS):
      pacc = None
      for (t, dr, dc) in taps:
        off = (1 + dr) * wp + (1 + dc)
        part = ysum[t * cpad:t * cpad + co, off:off + l]
        pacc = part if pacc is None else pacc + part
      zp = jnp.dot(pacc, s_ref[ph], preferred_element_type=f32)
      z = zp if z is None else z + zp
    if bias is not None:                       # top layer: conv_only (+bias)
      return z + bias
    inv_cnt = 1.0 / lp['cnt']
    mean = jnp.sum(z, axis=1, keepdims=True) * inv_cnt
    d = (z - mean) * mask
    var = jnp.sum(d * d, axis=1, keepdims=True) * inv_cnt
    yn = d * lax.rsqrt(var + _EPS)
    return jnp.where(yn >= 0, yn, alpha * yn)

  # ---- encoder --------------------------------------------------------------
  b_d0 = conv_layer(b_te, wd0_ref, sd0_ref, md0_ref[...], scal_ref[0, 2], p['d0'])
  b_d1 = conv_layer(b_d0, wd1_ref, sd1_ref, md1_ref[...], scal_ref[0, 3], p['d1'])
  b_d2 = conv_layer(b_d1, wd2_ref, sd2_ref, md2_ref[...], scal_ref[0, 4], p['d2'])
  b_bt = conv_layer(b_d2, wbt_ref, sbt_ref, md2_ref[...], scal_ref[0, 5], p['bt'])

  # ---- decoder (skip-connection concat folded into the two weight halves) --
  b_u2 = up_layer(b_d2, b_bt, wu2a_ref, wu2b_ref, su2_ref, p['u2'],
                  mask=md1_ref[...], alpha=scal_ref[0, 6])
  b_u1 = up_layer(b_d1, b_u2, wu1a_ref, wu1b_ref, su1_ref, p['u1'],
                  mask=md0_ref[...], alpha=scal_ref[0, 7])
  out = up_layer(b_d0, b_u1, wu0a_ref, wu0b_ref, su0_ref, p['u0'],
                 bias=bu0_ref[...])
  o_ref[0] = out


# ----------------------------------------------------------------------------
# wrapper (layout plumbing is just two reshapes)
# ----------------------------------------------------------------------------
def make_cte_net(cin, cout, channels, h, w):
  plan, consts = _build_plan_and_consts(cin, cout, channels, h, w)
  kern = functools.partial(_fused_kernel, plan=plan)
  hw = h * w

  def _cspec(arr):
    nd = arr.ndim
    return pl.BlockSpec(arr.shape, lambda i, _nd=nd: (0,) * _nd)

  @jax.jit
  def forward(x, params):
    n = x.shape[0]
    x_flat = x.reshape(n, cin, hw).astype(jnp.float32)
    te = params['te']
    alphas = jnp.stack([te['alpha_tex'], te['alpha_out'],
                        params['down0']['alpha'], params['down1']['alpha'],
                        params['down2']['alpha'], params['bottom']['alpha'],
                        params['up2']['alpha'], params['up1']['alpha']]
                       ).astype(jnp.float32).reshape(1, 8)
    operands = [
        x_flat, alphas,
        consts['s_in'], consts['te_mask'],
        te['w1t'], te['w2'], te['wa'], te['wb'], te['b'],
        consts['s_te'],
        params['down0']['w'], consts['s_d0'], consts['m_d0'],
        params['down1']['w'], consts['s_d1'], consts['m_d1'],
        params['down2']['w'], consts['s_d2'], consts['m_d2'],
        params['bottom']['w'], consts['s_bt'],
        params['up2']['wa'], params['up2']['wb'], consts['s_u2'],
        params['up1']['wa'], params['up1']['wb'], consts['s_u1'],
        params['up0']['wa'], params['up0']['wb'], consts['s_u0'],
        params['up0']['b'],
    ]
    in_specs = [pl.BlockSpec((1, cin, hw), lambda i: (i, 0, 0)),
                pl.BlockSpec(memory_space=pltpu.MemorySpace.SMEM)]
    in_specs += [_cspec(op) for op in operands[2:]]
    out = pl.pallas_call(
        kern,
        out_shape=jax.ShapeDtypeStruct((n, cout, hw), jnp.float32),
        grid=(n,),
        in_specs=in_specs,
        out_specs=pl.BlockSpec((1, cout, hw), lambda i: (i, 0, 0)),
        compiler_params=pltpu.CompilerParams(
            dimension_semantics=("parallel",)),
    )(*operands)
    return out.reshape(n, cout, h, w)

  return forward


# ----------------------------------------------------------------------------
# deterministic parameter construction (kernel-ready layouts)
# ----------------------------------------------------------------------------
def _stack_conv_w(w):
  """torch Conv2d weight (Cout, Cin, 3, 3) -> stacked (9*cpad, Cin) bf16."""
  co, ci = w.shape[0], w.shape[1]
  cpad = _round8(co)
  taps = jnp.transpose(w, (2, 3, 0, 1)).reshape(9, co, ci)
  if cpad != co:
    taps = jnp.pad(taps, ((0, 0), (0, cpad - co), (0, 0)))
  return taps.reshape(9 * cpad, ci).astype(jnp.bfloat16)


def _stack_upconv_w(w):
  """torch ConvTranspose2d weight (Cin, Cout, 3, 3) -> flipped (9*cpad, Cin)."""
  ci, co = w.shape[0], w.shape[1]
  cpad = _round8(co)
  wf = jnp.transpose(w[:, :, ::-1, ::-1], (2, 3, 1, 0)).reshape(9, co, ci)
  if cpad != co:
    wf = jnp.pad(wf, ((0, 0), (0, cpad - co), (0, 0)))
  return wf.reshape(9 * cpad, ci).astype(jnp.bfloat16)


def init_params(key, cin, cout, chs):
  c0, c1, c2, c3 = chs
  ks = jax.random.split(key, 12)

  def nrm(k, shape, std=0.1):
    return std * jax.random.normal(k, shape, jnp.float32)

  def alpha():
    return jnp.float32(0.25)            # nn.PReLU() single shared parameter

  red = 8 if cin > 1 else 1
  cr = max(cin // red, 1)
  bn_scale = jnp.float32(1.0 / np.sqrt(1.0 + _BN_EPS))  # eval-mode BN folded
  w11 = nrm(ks[2], (cin, 2 * cin))                      # 1x1 conv weight
  b11 = nrm(ks[10], (cin, 1), 0.05)                     # 1x1 conv bias
  te = dict(
      w1t=nrm(ks[0], (cin, cr), 0.05),                  # SE fc1.weight.T
      w2=nrm(ks[1], (cin, cr), 0.05),                   # SE fc2.weight
      wa=w11[:, :cin] * bn_scale,                       # SE-branch half
      wb=w11[:, cin:] * bn_scale,                       # identity-branch half
      b=b11 * bn_scale,
      alpha_tex=alpha(), alpha_out=alpha(),
  )
  params = dict(
      te=te,
      down0=dict(w=_stack_conv_w(nrm(ks[3], (c0, cin, 3, 3))), alpha=alpha()),
      down1=dict(w=_stack_conv_w(nrm(ks[4], (c1, c0, 3, 3))), alpha=alpha()),
      down2=dict(w=_stack_conv_w(nrm(ks[5], (c2, c1, 3, 3))), alpha=alpha()),
      bottom=dict(w=_stack_conv_w(nrm(ks[6], (c3, c2, 3, 3))), alpha=alpha()),
  )
  # decoder transposed convs (torch layout (Cin, Cout, 3, 3)); weights split at
  # the concat boundary.  up0 is the top "conv_only" layer (bias, no IN/PReLU).
  w_up2 = nrm(ks[7], (c2 + c3, c1, 3, 3))
  w_up1 = nrm(ks[8], (c1 + c1, c0, 3, 3))
  w_up0 = nrm(ks[9], (c0 + c0, cout, 3, 3))
  params['up2'] = dict(wa=_stack_upconv_w(w_up2[:c2]),
                       wb=_stack_upconv_w(w_up2[c2:]), alpha=alpha())
  params['up1'] = dict(wa=_stack_upconv_w(w_up1[:c1]),
                       wb=_stack_upconv_w(w_up1[c1:]), alpha=alpha())
  params['up0'] = dict(wa=_stack_upconv_w(w_up0[:c0]),
                       wb=_stack_upconv_w(w_up0[c0:]),
                       b=nrm(ks[11], (cout, 1), 0.05))
  return params


if __name__ == "__main__":
  N, CIN, COUT, H, W = 2, 8, 4, 16, 16
  CHANNELS = (8, 16, 16, 16)   # len > 3 => TE block present, strides=(2,2,2)

  key = jax.random.PRNGKey(0)
  kx, kp = jax.random.split(key)
  x = jax.random.normal(kx, (N, CIN, H, W), jnp.float32)
  params = init_params(kp, CIN, COUT, CHANNELS)

  fwd = make_cte_net(CIN, COUT, CHANNELS, H, W)
  y = jax.block_until_ready(fwd(x, params))

  assert y.shape == (N, COUT, H, W), y.shape
  assert bool(jnp.all(jnp.isfinite(y)))
  print("KERNEL_OK")
</pallas_src>

<mosaic_0001>
module attributes {stable_mosaic.version = 11 : i64} {
  func.func @_fused_kernel(%arg0: i32, %arg1: memref<1x8x256xf32, #tpu.memory_space<vmem>>, %arg2: memref<1x8xf32, #tpu.memory_space<smem>>, %arg3: memref<256x506xf32, #tpu.memory_space<vmem>>, %arg4: memref<1x352xf32, #tpu.memory_space<vmem>>, %arg5: memref<8x1xf32, #tpu.memory_space<vmem>>, %arg6: memref<8x1xf32, #tpu.memory_space<vmem>>, %arg7: memref<8x8xf32, #tpu.memory_space<vmem>>, %arg8: memref<8x8xf32, #tpu.memory_space<vmem>>, %arg9: memref<8x1xf32, #tpu.memory_space<vmem>>, %arg10: memref<352x342xf32, #tpu.memory_space<vmem>>, %arg11: memref<72x8xbf16, #tpu.memory_space<vmem>>, %arg12: memref<288x110xf32, #tpu.memory_space<vmem>>, %arg13: memref<1x110xf32, #tpu.memory_space<vmem>>, %arg14: memref<144x8xbf16, #tpu.memory_space<vmem>>, %arg15: memref<80x42xf32, #tpu.memory_space<vmem>>, %arg16: memref<1x42xf32, #tpu.memory_space<vmem>>, %arg17: memref<144x16xbf16, #tpu.memory_space<vmem>>, %arg18: memref<24x20xf32, #tpu.memory_space<vmem>>, %arg19: memref<1x20xf32, #tpu.memory_space<vmem>>, %arg20: memref<144x16xbf16, #tpu.memory_space<vmem>>, %arg21: memref<8x20xf32, #tpu.memory_space<vmem>>, %arg22: memref<144x16xbf16, #tpu.memory_space<vmem>>, %arg23: memref<144x16xbf16, #tpu.memory_space<vmem>>, %arg24: memref<4x8x42xf32, #tpu.memory_space<vmem>>, %arg25: memref<72x16xbf16, #tpu.memory_space<vmem>>, %arg26: memref<72x16xbf16, #tpu.memory_space<vmem>>, %arg27: memref<4x24x110xf32, #tpu.memory_space<vmem>>, %arg28: memref<72x8xbf16, #tpu.memory_space<vmem>>, %arg29: memref<72x8xbf16, #tpu.memory_space<vmem>>, %arg30: memref<4x80x256xf32, #tpu.memory_space<vmem>>, %arg31: memref<4x1xf32, #tpu.memory_space<vmem>>, %arg32: memref<1x4x256xf32, #tpu.memory_space<vmem>>) attributes {dimension_semantics = [#tpu.dimension_semantics<parallel>], iteration_bounds = array<i64: 2>, scalar_prefetch = 0 : i64, scratch_operands = 0 : i64, tpu.core_type = #tpu.core_type<tc>, window_params = [{transform_indices = @transform_0, window_bounds = array<i64: 1, 8, 256>}, {transform_indices = @transform_1, window_bounds = array<i64: 1, 8>}, {pipeline_mode = #tpu.pipeline_mode<synchronous>, transform_indices = @transform_2, window_bounds = array<i64: 256, 506>}, {pipeline_mode = #tpu.pipeline_mode<synchronous>, transform_indices = @transform_3, window_bounds = array<i64: 1, 352>}, {pipeline_mode = #tpu.pipeline_mode<synchronous>, transform_indices = @transform_4, window_bounds = array<i64: 8, 1>}, {pipeline_mode = #tpu.pipeline_mode<synchronous>, transform_indices = @transform_5, window_bounds = array<i64: 8, 1>}, {pipeline_mode = #tpu.pipeline_mode<synchronous>, transform_indices = @transform_6, window_bounds = array<i64: 8, 8>}, {pipeline_mode = #tpu.pipeline_mode<synchronous>, transform_indices = @transform_7, window_bounds = array<i64: 8, 8>}, {pipeline_mode = #tpu.pipeline_mode<synchronous>, transform_indices = @transform_8, window_bounds = array<i64: 8, 1>}, {pipeline_mode = #tpu.pipeline_mode<synchronous>, transform_indices = @transform_9, window_bounds = array<i64: 352, 342>}, {pipeline_mode = #tpu.pipeline_mode<synchronous>, transform_indices = @transform_10, window_bounds = array<i64: 72, 8>}, {pipeline_mode = #tpu.pipeline_mode<synchronous>, transform_indices = @transform_11, window_bounds = array<i64: 288, 110>}, {pipeline_mode = #tpu.pipeline_mode<synchronous>, transform_indices = @transform_12, window_bounds = array<i64: 1, 110>}, {pipeline_mode = #tpu.pipeline_mode<synchronous>, transform_indices = @transform_13, window_bounds = array<i64: 144, 8>}, {pipeline_mode = #tpu.pipeline_mode<synchronous>, transform_indices = @transform_14, window_bounds = array<i64: 80, 42>}, {pipeline_mode = #tpu.pipeline_mode<synchronous>, transform_indices = @transform_15, window_bounds = array<i64: 1, 42>}, {pipeline_mode = #tpu.pipeline_mode<synchronous>, transform_indices = @transform_16, window_bounds = array<i64: 144, 16>}, {pipeline_mode = #tpu.pipeline_mode<synchronous>, transform_indices = @transform_17, window_bounds = array<i64: 24, 20>}, {pipeline_mode = #tpu.pipeline_mode<synchronous>, transform_indices = @transform_18, window_bounds = array<i64: 1, 20>}, {pipeline_mode = #tpu.pipeline_mode<synchronous>, transform_indices = @transform_19, window_bounds = array<i64: 144, 16>}, {pipeline_mode = #tpu.pipeline_mode<synchronous>, transform_indices = @transform_20, window_bounds = array<i64: 8, 20>}, {pipeline_mode = #tpu.pipeline_mode<synchronous>, transform_indices = @transform_21, window_bounds = array<i64: 144, 16>}, {pipeline_mode = #tpu.pipeline_mode<synchronous>, transform_indices = @transform_22, window_bounds = array<i64: 144, 16>}, {pipeline_mode = #tpu.pipeline_mode<synchronous>, transform_indices = @transform_23, window_bounds = array<i64: 4, 8, 42>}, {pipeline_mode = #tpu.pipeline_mode<synchronous>, transform_indices = @transform_24, window_bounds = array<i64: 72, 16>}, {pipeline_mode = #tpu.pipeline_mode<synchronous>, transform_indices = @transform_25, window_bounds = array<i64: 72, 16>}, {pipeline_mode = #tpu.pipeline_mode<synchronous>, transform_indices = @transform_26, window_bounds = array<i64: 4, 24, 110>}, {pipeline_mode = #tpu.pipeline_mode<synchronous>, transform_indices = @transform_27, window_bounds = array<i64: 72, 8>}, {pipeline_mode = #tpu.pipeline_mode<synchronous>, transform_indices = @transform_28, window_bounds = array<i64: 72, 8>}, {pipeline_mode = #tpu.pipeline_mode<synchronous>, transform_indices = @transform_29, window_bounds = array<i64: 4, 80, 256>}, {pipeline_mode = #tpu.pipeline_mode<synchronous>, transform_indices = @transform_30, window_bounds = array<i64: 4, 1>}, {transform_indices = @transform_31, window_bounds = array<i64: 1, 4, 256>}]} {
    %c0 = arith.constant 0 : index
    %c0_0 = arith.constant 0 : index
    %c0_1 = arith.constant 0 : index
    %0 = vector.load %arg1[%c0, %c0_0, %c0_1] : memref<1x8x256xf32, #tpu.memory_space<vmem>>, vector<1x8x256xf32>
    %1 = vector.shape_cast %0 : vector<1x8x256xf32> to vector<8x256xf32>
    %c0_2 = arith.constant 0 : index
    %c0_3 = arith.constant 0 : index
    %2 = vector.load %arg3[%c0_2, %c0_3] : memref<256x506xf32, #tpu.memory_space<vmem>>, vector<256x506xf32>
    %cst = arith.constant dense<0.000000e+00> : vector<8x506xf32>
    %3 = tpu.matmul %1, %2, %cst {dimension_numbers = #tpu.dot_dimension_numbers<[1], [0], [0], [1], [0, 0, 1, 1], [], []>} : vector<8x256xf32>, vector<256x506xf32>, vector<8x506xf32> -> vector<8x506xf32>
    %4 = vector.extract_strided_slice %3 {offsets = [0, 0], sizes = [8, 358], strides = [1, 1]} : vector<8x506xf32> to vector<8x358xf32>
    %cst_4 = arith.constant 1.52299791E-8 : f32
    %5 = vector.broadcast %cst_4 : f32 to vector<8x358xf32>
    %6 = arith.mulf %5, %4 : vector<8x358xf32>
    %7 = vector.extract_strided_slice %3 {offsets = [0, 22], sizes = [8, 358], strides = [1, 1]} : vector<8x506xf32> to vector<8x358xf32>
    %cst_5 = arith.constant 3.35462624E-4 : f32
    %8 = vector.broadcast %cst_5 : f32 to vector<8x358xf32>
    %9 = arith.mulf %8, %7 : vector<8x358xf32>
    %10 = arith.addf %6, %9 : vector<8x358xf32>
    %11 = vector.extract_strided_slice %3 {offsets = [0, 44], sizes = [8, 358], strides = [1, 1]} : vector<8x506xf32> to vector<8x358xf32>
    %cst_6 = arith.constant 0.135335281 : f32
    %12 = vector.broadcast %cst_6 : f32 to vector<8x358xf32>
    %13 = arith.mulf %12, %11 : vector<8x358xf32>
    %14 = arith.addf %10, %13 : vector<8x358xf32>
    %15 = vector.extract_strided_slice %3 {offsets = [0, 66], sizes = [8, 358], strides = [1, 1]} : vector<8x506xf32> to vector<8x358xf32>
    %cst_7 = arith.constant 1.000000e+00 : f32
    %16 = vector.broadcast %cst_7 : f32 to vector<8x358xf32>
    %17 = arith.mulf %16, %15 : vector<8x358xf32>
    %18 = arith.addf %14, %17 : vector<8x358xf32>
    %19 = vector.extract_strided_slice %3 {offsets = [0, 88], sizes = [8, 358], strides = [1, 1]} : vector<8x506xf32> to vector<8x358xf32>
    %cst_8 = arith.constant 0.135335281 : f32
    %20 = vector.broadcast %cst_8 : f32 to vector<8x358xf32>
    %21 = arith.mulf %20, %19 : vector<8x358xf32>
    %22 = arith.addf %18, %21 : vector<8x358xf32>
    %23 = vector.extract_strided_slice %3 {offsets = [0, 110], sizes = [8, 358], strides = [1, 1]} : vector<8x506xf32> to vector<8x358xf32>
    %cst_9 = arith.constant 3.35462624E-4 : f32
    %24 = vector.broadcast %cst_9 : f32 to vector<8x358xf32>
    %25 = arith.mulf %24, %23 : vector<8x358xf32>
    %26 = arith.addf %22, %25 : vector<8x358xf32>
    %27 = vector.extract_strided_slice %3 {offsets = [0, 132], sizes = [8, 358], strides = [1, 1]} : vector<8x506xf32> to vector<8x358xf32>
    %cst_10 = arith.constant 1.52299791E-8 : f32
    %28 = vector.broadcast %cst_10 : f32 to vector<8x358xf32>
    %29 = arith.mulf %28, %27 : vector<8x358xf32>
    %30 = arith.addf %26, %29 : vector<8x358xf32>
    %31 = vector.extract_strided_slice %30 {offsets = [0, 0], sizes = [8, 352], strides = [1, 1]} : vector<8x358xf32> to vector<8x352xf32>
    %cst_11 = arith.constant 5.69899328E-9 : f32
    %32 = vector.broadcast %cst_11 : f32 to vector<8x352xf32>
    %33 = arith.mulf %32, %31 : vector<8x352xf32>
    %34 = vector.extract_strided_slice %30 {offsets = [0, 1], sizes = [8, 352], strides = [1, 1]} : vector<8x358xf32> to vector<8x352xf32>
    %cst_12 = arith.constant 1.72775399E-4 : f32
    %35 = vector.broadcast %cst_12 : f32 to vector<8x352xf32>
    %36 = arith.mulf %35, %34 : vector<8x352xf32>
    %37 = arith.addf %33, %36 : vector<8x352xf32>
    %38 = vector.extract_strided_slice %30 {offsets = [0, 2], sizes = [8, 352], strides = [1, 1]} : vector<8x358xf32> to vector<8x352xf32>
    %cst_13 = arith.constant 0.0819402858 : f32
    %39 = vector.broadcast %cst_13 : f32 to vector<8x352xf32>
    %40 = arith.mulf %39, %38 : vector<8x352xf32>
    %41 = arith.addf %37, %40 : vector<8x352xf32>
    %42 = vector.extract_strided_slice %30 {offsets = [0, 3], sizes = [8, 352], strides = [1, 1]} : vector<8x358xf32> to vector<8x352xf32>
    %cst_14 = arith.constant 0.636619746 : f32
    %43 = vector.broadcast %cst_14 : f32 to vector<8x352xf32>
    %44 = arith.mulf %43, %42 : vector<8x352xf32>
    %45 = arith.addf %41, %44 : vector<8x352xf32>
    %46 = vector.extract_strided_slice %30 {offsets = [0, 4], sizes = [8, 352], strides = [1, 1]} : vector<8x358xf32> to vector<8x352xf32>
    %cst_15 = arith.constant 0.0819402858 : f32
    %47 = vector.broadcast %cst_15 : f32 to vector<8x352xf32>
    %48 = arith.mulf %47, %46 : vector<8x352xf32>
    %49 = arith.addf %45, %48 : vector<8x352xf32>
    %50 = vector.extract_strided_slice %30 {offsets = [0, 5], sizes = [8, 352], strides = [1, 1]} : vector<8x358xf32> to vector<8x352xf32>
    %cst_16 = arith.constant 1.72775399E-4 : f32
    %51 = vector.broadcast %cst_16 : f32 to vector<8x352xf32>
    %52 = arith.mulf %51, %50 : vector<8x352xf32>
    %53 = arith.addf %49, %52 : vector<8x352xf32>
    %54 = vector.extract_strided_slice %30 {offsets = [0, 6], sizes = [8, 352], strides = [1, 1]} : vector<8x358xf32> to vector<8x352xf32>
    %cst_17 = arith.constant 5.69899328E-9 : f32
    %55 = vector.broadcast %cst_17 : f32 to vector<8x352xf32>
    %56 = arith.mulf %55, %54 : vector<8x352xf32>
    %57 = arith.addf %53, %56 : vector<8x352xf32>
    %c0_18 = arith.constant 0 : index
    %c0_19 = arith.constant 0 : index
    %58 = memref.load %arg2[%c0_18, %c0_19] : memref<1x8xf32, #tpu.memory_space<smem>>
    %cst_20 = arith.constant 0.000000e+00 : f32
    %59 = vector.broadcast %cst_20 : f32 to vector<8x352xf32>
    %60 = arith.cmpf oge, %57, %59 : vector<8x352xf32>
    %61 = vector.broadcast %58 : f32 to vector<8x352xf32>
    %62 = arith.mulf %61, %57 : vector<8x352xf32>
    %63 = arith.select %60, %57, %62 : vector<8x352xi1>, vector<8x352xf32>
    %c0_21 = arith.constant 0 : index
    %c0_22 = arith.constant 0 : index
    %64 = vector.load %arg4[%c0_21, %c0_22] : memref<1x352xf32, #tpu.memory_space<vmem>>, vector<1x352xf32>
    %65 = vector.broadcast %64 : vector<1x352xf32> to vector<8x352xf32>
    %66 = arith.mulf %63, %65 : vector<8x352xf32>
    %cst_23 = arith.constant dense<0.000000e+00> : vector<8xf32>
    %67 = vector.multi_reduction <add>, %66, %cst_23 [1] : vector<8x352xf32> to vector<8xf32>
    %68 = vector.shape_cast %67 : vector<8xf32> to vector<8x1xf32>
    %cst_24 = arith.constant 3.906250e-03 : f32
    %69 = vector.broadcast %cst_24 : f32 to vector<8x1xf32>
    %70 = arith.mulf %68, %69 : vector<8x1xf32>
    %c0_25 = arith.constant 0 : index
    %c0_26 = arith.constant 0 : index
    %71 = vector.load %arg5[%c0_25, %c0_26] : memref<8x1xf32, #tpu.memory_space<vmem>>, vector<8x1xf32>
    %72 = arith.mulf %71, %70 : vector<8x1xf32>
    %cst_27 = arith.constant dense<0.000000e+00> : vector<1xf32>
    %73 = vector.multi_reduction <add>, %72, %cst_27 [0] : vector<8x1xf32> to vector<1xf32>
    %74 = vector.shape_cast %73 : vector<1xf32> to vector<1x1xf32>
    %cst_28 = arith.constant 0.000000e+00 : f32
    %75 = vector.broadcast %cst_28 : f32 to vector<1x1xf32>
    %76 = arith.maximumf %74, %75 : vector<1x1xf32>
    %c0_29 = arith.constant 0 : index
    %c0_30 = arith.constant 0 : index
    %77 = vector.load %arg6[%c0_29, %c0_30] : memref<8x1xf32, #tpu.memory_space<vmem>>, vector<8x1xf32>
    %78 = vector.broadcast %76 : vector<1x1xf32> to vector<8x1xf32>
    %79 = arith.mulf %77, %78 : vector<8x1xf32>
    %cst_31 = arith.constant dense<0.000000e+00> : vector<8xf32>
    %80 = vector.multi_reduction <add>, %79, %cst_31 [1] : vector<8x1xf32> to vector<8xf32>
    %81 = vector.shape_cast %80 : vector<8xf32> to vector<8x1xf32>
    %82 = arith.negf %81 : vector<8x1xf32>
    %83 = math.exp %82 : vector<8x1xf32>
    %cst_32 = arith.constant 1.000000e+00 : f32
    %84 = vector.broadcast %cst_32 : f32 to vector<8x1xf32>
    %85 = arith.addf %84, %83 : vector<8x1xf32>
    %86 = arith.divf %84, %85 : vector<8x1xf32>
    %87 = vector.broadcast %86 : vector<8x1xf32> to vector<8x352xf32>
    %88 = arith.mulf %63, %87 : vector<8x352xf32>
    %89 = vector.extract_strided_slice %3 {offsets = [0, 69], sizes = [8, 352], strides = [1, 1]} : vector<8x506xf32> to vector<8x352xf32>
    %c0_33 = arith.constant 0 : index
    %c0_34 = arith.constant 0 : index
    %90 = vector.load %arg7[%c0_33, %c0_34] : memref<8x8xf32, #tpu.memory_space<vmem>>, vector<8x8xf32>
    %cst_35 = arith.constant dense<0.000000e+00> : vector<8x352xf32>
    %91 = tpu.matmul %90, %88, %cst_35 {dimension_numbers = #tpu.dot_dimension_numbers<[1], [0], [0], [1], [0, 0, 1, 1], [], []>} : vector<8x8xf32>, vector<8x352xf32>, vector<8x352xf32> -> vector<8x352xf32>
    %c0_36 = arith.constant 0 : index
    %c0_37 = arith.constant 0 : index
    %92 = vector.load %arg8[%c0_36, %c0_37] : memref<8x8xf32, #tpu.memory_space<vmem>>, vector<8x8xf32>
    %cst_38 = arith.constant dense<0.000000e+00> : vector<8x352xf32>
    %93 = tpu.matmul %92, %89, %cst_38 {dimension_numbers = #tpu.dot_dimension_numbers<[1], [0], [0], [1], [0, 0, 1, 1], [], []>} : vector<8x8xf32>, vector<8x352xf32>, vector<8x352xf32> -> vector<8x352xf32>
    %94 = arith.addf %91, %93 : vector<8x352xf32>
    %c0_39 = arith.constant 0 : index
    %c0_40 = arith.constant 0 : index
    %95 = vector.load %arg9[%c0_39, %c0_40] : memref<8x1xf32, #tpu.memory_space<vmem>>, vector<8x1xf32>
    %96 = vector.broadcast %95 : vector<8x1xf32> to vector<8x352xf32>
    %97 = arith.addf %94, %96 : vector<8x352xf32>
    %c0_41 = arith.constant 0 : index
    %c1 = arith.constant 1 : index
    %98 = memref.load %arg2[%c0_41, %c1] : memref<1x8xf32, #tpu.memory_space<smem>>
    %cst_42 = arith.constant 0.000000e+00 : f32
    %99 = vector.broadcast %cst_42 : f32 to vector<8x352xf32>
    %100 = arith.cmpf oge, %97, %99 : vector<8x352xf32>
    %101 = vector.broadcast %98 : f32 to vector<8x352xf32>
    %102 = arith.mulf %101, %97 : vector<8x352xf32>
    %103 = arith.select %100, %97, %102 : vector<8x352xi1>, vector<8x352xf32>
    %c0_43 = arith.constant 0 : index
    %c0_44 = arith.constant 0 : index
    %104 = vector.load %arg10[%c0_43, %c0_44] : memref<352x342xf32, #tpu.memory_space<vmem>>, vector<352x342xf32>
    %cst_45 = arith.constant dense<0.000000e+00> : vector<8x342xf32>
    %105 = tpu.matmul %103, %104, %cst_45 {dimension_numbers = #tpu.dot_dimension_numbers<[1], [0], [0], [1], [0, 0, 1, 1], [], []>} : vector<8x352xf32>, vector<352x342xf32>, vector<8x342xf32> -> vector<8x342xf32>
    %c0_46 = arith.constant 0 : index
    %c0_47 = arith.constant 0 : index
    %106 = vector.load %arg13[%c0_46, %c0_47] : memref<1x110xf32, #tpu.memory_space<vmem>>, vector<1x110xf32>
    %c0_48 = arith.constant 0 : index
    %c2 = arith.constant 2 : index
    %107 = memref.load %arg2[%c0_48, %c2] : memref<1x8xf32, #tpu.memory_space<smem>>
    %c0_49 = arith.constant 0 : index
    %c0_50 = arith.constant 0 : index
    %108 = vector.load %arg11[%c0_49, %c0_50] : memref<72x8xbf16, #tpu.memory_space<vmem>>, vector<72x8xbf16>
    %109 = arith.truncf %105 : vector<8x342xf32> to vector<8x342xbf16>
    %cst_51 = arith.constant dense<0.000000e+00> : vector<72x342xf32>
    %110 = tpu.matmul %108, %109, %cst_51 {dimension_numbers = #tpu.dot_dimension_numbers<[1], [0], [0], [1], [0, 0, 1, 1], [], []>} : vector<72x8xbf16>, vector<8x342xbf16>, vector<72x342xf32> -> vector<72x342xf32>
    %111 = vector.extract_strided_slice %110 {offsets = [0, 0], sizes = [8, 288], strides = [1, 1]} : vector<72x342xf32> to vector<8x288xf32>
    %112 = vector.extract_strided_slice %110 {offsets = [8, 1], sizes = [8, 288], strides = [1, 1]} : vector<72x342xf32> to vector<8x288xf32>
    %113 = arith.addf %111, %112 : vector<8x288xf32>
    %114 = vector.extract_strided_slice %110 {offsets = [16, 2], sizes = [8, 288], strides = [1, 1]} : vector<72x342xf32> to vector<8x288xf32>
    %115 = arith.addf %113, %114 : vector<8x288xf32>
    %116 = vector.extract_strided_slice %110 {offsets = [24, 18], sizes = [8, 288], strides = [1, 1]} : vector<72x342xf32> to vector<8x288xf32>
    %117 = arith.addf %115, %116 : vector<8x288xf32>
    %118 = vector.extract_strided_slice %110 {offsets = [32, 19], sizes = [8, 288], strides = [1, 1]} : vector<72x342xf32> to vector<8x288xf32>
    %119 = arith.addf %117, %118 : vector<8x288xf32>
    %120 = vector.extract_strided_slice %110 {offsets = [40, 20], sizes = [8, 288], strides = [1, 1]} : vector<72x342xf32> to vector<8x288xf32>
    %121 = arith.addf %119, %120 : vector<8x288xf32>
    %122 = vector.extract_strided_slice %110 {offsets = [48, 36], sizes = [8, 288], strides = [1, 1]} : vector<72x342xf32> to vector<8x288xf32>
    %123 = arith.addf %121, %122 : vector<8x288xf32>
    %124 = vector.extract_strided_slice %110 {offsets = [56, 37], sizes = [8, 288], strides = [1, 1]} : vector<72x342xf32> to vector<8x288xf32>
    %125 = arith.addf %123, %124 : vector<8x288xf32>
    %126 = vector.extract_strided_slice %110 {offsets = [64, 38], sizes = [8, 288], strides = [1, 1]} : vector<72x342xf32> to vector<8x288xf32>
    %127 = arith.addf %125, %126 : vector<8x288xf32>
    %c0_52 = arith.constant 0 : index
    %c0_53 = arith.constant 0 : index
    %128 = vector.load %arg12[%c0_52, %c0_53] : memref<288x110xf32, #tpu.memory_space<vmem>>, vector<288x110xf32>
    %cst_54 = arith.constant dense<0.000000e+00> : vector<8x110xf32>
    %129 = tpu.matmul %127, %128, %cst_54 {dimension_numbers = #tpu.dot_dimension_numbers<[1], [0], [0], [1], [0, 0, 1, 1], [], []>} : vector<8x288xf32>, vector<288x110xf32>, vector<8x110xf32> -> vector<8x110xf32>
    %cst_55 = arith.constant dense<0.000000e+00> : vector<8xf32>
    %130 = vector.multi_reduction <add>, %129, %cst_55 [1] : vector<8x110xf32> to vector<8xf32>
    %131 = vector.shape_cast %130 : vector<8xf32> to vector<8x1xf32>
    %cst_56 = arith.constant 1.562500e-02 : f32
    %132 = vector.broadcast %cst_56 : f32 to vector<8x1xf32>
    %133 = arith.mulf %131, %132 : vector<8x1xf32>
    %134 = vector.broadcast %133 : vector<8x1xf32> to vector<8x110xf32>
    %135 = arith.subf %129, %134 : vector<8x110xf32>
    %136 = vector.broadcast %106 : vector<1x110xf32> to vector<8x110xf32>
    %137 = arith.mulf %135, %136 : vector<8x110xf32>
    %138 = arith.mulf %137, %137 : vector<8x110xf32>
    %cst_57 = arith.constant dense<0.000000e+00> : vector<8xf32>
    %139 = vector.multi_reduction <add>, %138, %cst_57 [1] : vector<8x110xf32> to vector<8xf32>
    %140 = vector.shape_cast %139 : vector<8xf32> to vector<8x1xf32>
    %cst_58 = arith.constant 1.562500e-02 : f32
    %141 = vector.broadcast %cst_58 : f32 to vector<8x1xf32>
    %142 = arith.mulf %140, %141 : vector<8x1xf32>
    %cst_59 = arith.constant 9.99999974E-6 : f32
    %143 = vector.broadcast %cst_59 : f32 to vector<8x1xf32>
    %144 = arith.addf %142, %143 : vector<8x1xf32>
    %145 = math.rsqrt %144 : vector<8x1xf32>
    %146 = vector.broadcast %145 : vector<8x1xf32> to vector<8x110xf32>
    %147 = arith.mulf %137, %146 : vector<8x110xf32>
    %cst_60 = arith.constant 0.000000e+00 : f32
    %148 = vector.broadcast %cst_60 : f32 to vector<8x110xf32>
    %149 = arith.cmpf oge, %147, %148 : vector<8x110xf32>
    %150 = vector.broadcast %107 : f32 to vector<8x110xf32>
    %151 = arith.mulf %150, %147 : vector<8x110xf32>
    %152 = arith.select %149, %147, %151 : vector<8x110xi1>, vector<8x110xf32>
    %c0_61 = arith.constant 0 : index
    %c0_62 = arith.constant 0 : index
    %153 = vector.load %arg16[%c0_61, %c0_62] : memref<1x42xf32, #tpu.memory_space<vmem>>, vector<1x42xf32>
    %c0_63 = arith.constant 0 : index
    %c3 = arith.constant 3 : index
    %154 = memref.load %arg2[%c0_63, %c3] : memref<1x8xf32, #tpu.memory_space<smem>>
    %c0_64 = arith.constant 0 : index
    %c0_65 = arith.constant 0 : index
    %155 = vector.load %arg14[%c0_64, %c0_65] : memref<144x8xbf16, #tpu.memory_space<vmem>>, vector<144x8xbf16>
    %156 = arith.truncf %152 : vector<8x110xf32> to vector<8x110xbf16>
    %cst_66 = arith.constant dense<0.000000e+00> : vector<144x110xf32>
    %157 = tpu.matmul %155, %156, %cst_66 {dimension_numbers = #tpu.dot_dimension_numbers<[1], [0], [0], [1], [0, 0, 1, 1], [], []>} : vector<144x8xbf16>, vector<8x110xbf16>, vector<144x110xf32> -> vector<144x110xf32>
    %158 = vector.extract_strided_slice %157 {offsets = [0, 0], sizes = [16, 80], strides = [1, 1]} : vector<144x110xf32> to vector<16x80xf32>
    %159 = vector.extract_strided_slice %157 {offsets = [16, 1], sizes = [16, 80], strides = [1, 1]} : vector<144x110xf32> to vector<16x80xf32>
    %160 = arith.addf %158, %159 : vector<16x80xf32>
    %161 = vector.extract_strided_slice %157 {offsets = [32, 2], sizes = [16, 80], strides = [1, 1]} : vector<144x110xf32> to vector<16x80xf32>
    %162 = arith.addf %160, %161 : vector<16x80xf32>
    %163 = vector.extract_strided_slice %157 {offsets = [48, 10], sizes = [16, 80], strides = [1, 1]} : vector<144x110xf32> to vector<16x80xf32>
    %164 = arith.addf %162, %163 : vector<16x80xf32>
    %165 = vector.extract_strided_slice %157 {offsets = [64, 11], sizes = [16, 80], strides = [1, 1]} : vector<144x110xf32> to vector<16x80xf32>
    %166 = arith.addf %164, %165 : vector<16x80xf32>
    %167 = vector.extract_strided_slice %157 {offsets = [80, 12], sizes = [16, 80], strides = [1, 1]} : vector<144x110xf32> to vector<16x80xf32>
    %168 = arith.addf %166, %167 : vector<16x80xf32>
    %169 = vector.extract_strided_slice %157 {offsets = [96, 20], sizes = [16, 80], strides = [1, 1]} : vector<144x110xf32> to vector<16x80xf32>
    %170 = arith.addf %168, %169 : vector<16x80xf32>
    %171 = vector.extract_strided_slice %157 {offsets = [112, 21], sizes = [16, 80], strides = [1, 1]} : vector<144x110xf32> to vector<16x80xf32>
    %172 = arith.addf %170, %171 : vector<16x80xf32>
    %173 = vector.extract_strided_slice %157 {offsets = [128, 22], sizes = [16, 80], strides = [1, 1]} : vector<144x110xf32> to vector<16x80xf32>
    %174 = arith.addf %172, %173 : vector<16x80xf32>
    %c0_67 = arith.constant 0 : index
    %c0_68 = arith.constant 0 : index
    %175 = vector.load %arg15[%c0_67, %c0_68] : memref<80x42xf32, #tpu.memory_space<vmem>>, vector<80x42xf32>
    %cst_69 = arith.constant dense<0.000000e+00> : vector<16x42xf32>
    %176 = tpu.matmul %174, %175, %cst_69 {dimension_numbers = #tpu.dot_dimension_numbers<[1], [0], [0], [1], [0, 0, 1, 1], [], []>} : vector<16x80xf32>, vector<80x42xf32>, vector<16x42xf32> -> vector<16x42xf32>
    %cst_70 = arith.constant dense<0.000000e+00> : vector<16xf32>
    %177 = vector.multi_reduction <add>, %176, %cst_70 [1] : vector<16x42xf32> to vector<16xf32>
    %178 = vector.shape_cast %177 : vector<16xf32> to vector<16x1xf32>
    %cst_71 = arith.constant 6.250000e-02 : f32
    %179 = vector.broadcast %cst_71 : f32 to vector<16x1xf32>
    %180 = arith.mulf %178, %179 : vector<16x1xf32>
    %181 = vector.broadcast %180 : vector<16x1xf32> to vector<16x42xf32>
    %182 = arith.subf %176, %181 : vector<16x42xf32>
    %183 = vector.broadcast %153 : vector<1x42xf32> to vector<16x42xf32>
    %184 = arith.mulf %182, %183 : vector<16x42xf32>
    %185 = arith.mulf %184, %184 : vector<16x42xf32>
    %cst_72 = arith.constant dense<0.000000e+00> : vector<16xf32>
    %186 = vector.multi_reduction <add>, %185, %cst_72 [1] : vector<16x42xf32> to vector<16xf32>
    %187 = vector.shape_cast %186 : vector<16xf32> to vector<16x1xf32>
    %cst_73 = arith.constant 6.250000e-02 : f32
    %188 = vector.broadcast %cst_73 : f32 to vector<16x1xf32>
    %189 = arith.mulf %187, %188 : vector<16x1xf32>
    %cst_74 = arith.constant 9.99999974E-6 : f32
    %190 = vector.broadcast %cst_74 : f32 to vector<16x1xf32>
    %191 = arith.addf %189, %190 : vector<16x1xf32>
    %192 = math.rsqrt %191 : vector<16x1xf32>
    %193 = vector.broadcast %192 : vector<16x1xf32> to vector<16x42xf32>
    %194 = arith.mulf %184, %193 : vector<16x42xf32>
    %cst_75 = arith.constant 0.000000e+00 : f32
    %195 = vector.broadcast %cst_75 : f32 to vector<16x42xf32>
    %196 = arith.cmpf oge, %194, %195 : vector<16x42xf32>
    %197 = vector.broadcast %154 : f32 to vector<16x42xf32>
    %198 = arith.mulf %197, %194 : vector<16x42xf32>
    %199 = arith.select %196, %194, %198 : vector<16x42xi1>, vector<16x42xf32>
    %c0_76 = arith.constant 0 : index
    %c0_77 = arith.constant 0 : index
    %200 = vector.load %arg19[%c0_76, %c0_77] : memref<1x20xf32, #tpu.memory_space<vmem>>, vector<1x20xf32>
    %c0_78 = arith.constant 0 : index
    %c4 = arith.constant 4 : index
    %201 = memref.load %arg2[%c0_78, %c4] : memref<1x8xf32, #tpu.memory_space<smem>>
    %c0_79 = arith.constant 0 : index
    %c0_80 = arith.constant 0 : index
    %202 = vector.load %arg17[%c0_79, %c0_80] : memref<144x16xbf16, #tpu.memory_space<vmem>>, vector<144x16xbf16>
    %203 = arith.truncf %199 : vector<16x42xf32> to vector<16x42xbf16>
    %cst_81 = arith.constant dense<0.000000e+00> : vector<144x42xf32>
    %204 = tpu.matmul %202, %203, %cst_81 {dimension_numbers = #tpu.dot_dimension_numbers<[1], [0], [0], [1], [0, 0, 1, 1], [], []>} : vector<144x16xbf16>, vector<16x42xbf16>, vector<144x42xf32> -> vector<144x42xf32>
    %205 = vector.extract_strided_slice %204 {offsets = [0, 0], sizes = [16, 24], strides = [1, 1]} : vector<144x42xf32> to vector<16x24xf32>
    %206 = vector.extract_strided_slice %204 {offsets = [16, 1], sizes = [16, 24], strides = [1, 1]} : vector<144x42xf32> to vector<16x24xf32>
    %207 = arith.addf %205, %206 : vector<16x24xf32>
    %208 = vector.extract_strided_slice %204 {offsets = [32, 2], sizes = [16, 24], strides = [1, 1]} : vector<144x42xf32> to vector<16x24xf32>
    %209 = arith.addf %207, %208 : vector<16x24xf32>
    %210 = vector.extract_strided_slice %204 {offsets = [48, 6], sizes = [16, 24], strides = [1, 1]} : vector<144x42xf32> to vector<16x24xf32>
    %211 = arith.addf %209, %210 : vector<16x24xf32>
    %212 = vector.extract_strided_slice %204 {offsets = [64, 7], sizes = [16, 24], strides = [1, 1]} : vector<144x42xf32> to vector<16x24xf32>
    %213 = arith.addf %211, %212 : vector<16x24xf32>
    %214 = vector.extract_strided_slice %204 {offsets = [80, 8], sizes = [16, 24], strides = [1, 1]} : vector<144x42xf32> to vector<16x24xf32>
    %215 = arith.addf %213, %214 : vector<16x24xf32>
    %216 = vector.extract_strided_slice %204 {offsets = [96, 12], sizes = [16, 24], strides = [1, 1]} : vector<144x42xf32> to vector<16x24xf32>
    %217 = arith.addf %215, %216 : vector<16x24xf32>
    %218 = vector.extract_strided_slice %204 {offsets = [112, 13], sizes = [16, 24], strides = [1, 1]} : vector<144x42xf32> to vector<16x24xf32>
    %219 = arith.addf %217, %218 : vector<16x24xf32>
    %220 = vector.extract_strided_slice %204 {offsets = [128, 14], sizes = [16, 24], strides = [1, 1]} : vector<144x42xf32> to vector<16x24xf32>
    %221 = arith.addf %219, %220 : vector<16x24xf32>
    %c0_82 = arith.constant 0 : index
    %c0_83 = arith.constant 0 : index
    %222 = vector.load %arg18[%c0_82, %c0_83] : memref<24x20xf32, #tpu.memory_space<vmem>>, vector<24x20xf32>
    %cst_84 = arith.constant dense<0.000000e+00> : vector<16x20xf32>
    %223 = tpu.matmul %221, %222, %cst_84 {dimension_numbers = #tpu.dot_dimension_numbers<[1], [0], [0], [1], [0, 0, 1, 1], [], []>} : vector<16x24xf32>, vector<24x20xf32>, vector<16x20xf32> -> vector<16x20xf32>
    %cst_85 = arith.constant dense<0.000000e+00> : vector<16xf32>
    %224 = vector.multi_reduction <add>, %223, %cst_85 [1] : vector<16x20xf32> to vector<16xf32>
    %225 = vector.shape_cast %224 : vector<16xf32> to vector<16x1xf32>
    %cst_86 = arith.constant 2.500000e-01 : f32
    %226 = vector.broadcast %cst_86 : f32 to vector<16x1xf32>
    %227 = arith.mulf %225, %226 : vector<16x1xf32>
    %228 = vector.broadcast %227 : vector<16x1xf32> to vector<16x20xf32>
    %229 = arith.subf %223, %228 : vector<16x20xf32>
    %230 = vector.broadcast %200 : vector<1x20xf32> to vector<16x20xf32>
    %231 = arith.mulf %229, %230 : vector<16x20xf32>
    %232 = arith.mulf %231, %231 : vector<16x20xf32>
    %cst_87 = arith.constant dense<0.000000e+00> : vector<16xf32>
    %233 = vector.multi_reduction <add>, %232, %cst_87 [1] : vector<16x20xf32> to vector<16xf32>
    %234 = vector.shape_cast %233 : vector<16xf32> to vector<16x1xf32>
    %cst_88 = arith.constant 2.500000e-01 : f32
    %235 = vector.broadcast %cst_88 : f32 to vector<16x1xf32>
    %236 = arith.mulf %234, %235 : vector<16x1xf32>
    %cst_89 = arith.constant 9.99999974E-6 : f32
    %237 = vector.broadcast %cst_89 : f32 to vector<16x1xf32>
    %238 = arith.addf %236, %237 : vector<16x1xf32>
    %239 = math.rsqrt %238 : vector<16x1xf32>
    %240 = vector.broadcast %239 : vector<16x1xf32> to vector<16x20xf32>
    %241 = arith.mulf %231, %240 : vector<16x20xf32>
    %cst_90 = arith.constant 0.000000e+00 : f32
    %242 = vector.broadcast %cst_90 : f32 to vector<16x20xf32>
    %243 = arith.cmpf oge, %241, %242 : vector<16x20xf32>
    %244 = vector.broadcast %201 : f32 to vector<16x20xf32>
    %245 = arith.mulf %244, %241 : vector<16x20xf32>
    %246 = arith.select %243, %241, %245 : vector<16x20xi1>, vector<16x20xf32>
    %c0_91 = arith.constant 0 : index
    %c0_92 = arith.constant 0 : index
    %247 = vector.load %arg19[%c0_91, %c0_92] : memref<1x20xf32, #tpu.memory_space<vmem>>, vector<1x20xf32>
    %c0_93 = arith.constant 0 : index
    %c5 = arith.constant 5 : index
    %248 = memref.load %arg2[%c0_93, %c5] : memref<1x8xf32, #tpu.memory_space<smem>>
    %c0_94 = arith.constant 0 : index
    %c0_95 = arith.constant 0 : index
    %249 = vector.load %arg20[%c0_94, %c0_95] : memref<144x16xbf16, #tpu.memory_space<vmem>>, vector<144x16xbf16>
    %250 = arith.truncf %246 : vector<16x20xf32> to vector<16x20xbf16>
    %cst_96 = arith.constant dense<0.000000e+00> : vector<144x20xf32>
    %251 = tpu.matmul %249, %250, %cst_96 {dimension_numbers = #tpu.dot_dimension_numbers<[1], [0], [0], [1], [0, 0, 1, 1], [], []>} : vector<144x16xbf16>, vector<16x20xbf16>, vector<144x20xf32> -> vector<144x20xf32>
    %252 = vector.extract_strided_slice %251 {offsets = [0, 0], sizes = [16, 8], strides = [1, 1]} : vector<144x20xf32> to vector<16x8xf32>
    %253 = vector.extract_strided_slice %251 {offsets = [16, 1], sizes = [16, 8], strides = [1, 1]} : vector<144x20xf32> to vector<16x8xf32>
    %254 = arith.addf %252, %253 : vector<16x8xf32>
    %255 = vector.extract_strided_slice %251 {offsets = [32, 2], sizes = [16, 8], strides = [1, 1]} : vector<144x20xf32> to vector<16x8xf32>
    %256 = arith.addf %254, %255 : vector<16x8xf32>
    %257 = vector.extract_strided_slice %251 {offsets = [48, 4], sizes = [16, 8], strides = [1, 1]} : vector<144x20xf32> to vector<16x8xf32>
    %258 = arith.addf %256, %257 : vector<16x8xf32>
    %259 = vector.extract_strided_slice %251 {offsets = [64, 5], sizes = [16, 8], strides = [1, 1]} : vector<144x20xf32> to vector<16x8xf32>
    %260 = arith.addf %258, %259 : vector<16x8xf32>
    %261 = vector.extract_strided_slice %251 {offsets = [80, 6], sizes = [16, 8], strides = [1, 1]} : vector<144x20xf32> to vector<16x8xf32>
    %262 = arith.addf %260, %261 : vector<16x8xf32>
    %263 = vector.extract_strided_slice %251 {offsets = [96, 8], sizes = [16, 8], strides = [1, 1]} : vector<144x20xf32> to vector<16x8xf32>
    %264 = arith.addf %262, %263 : vector<16x8xf32>
    %265 = vector.extract_strided_slice %251 {offsets = [112, 9], sizes = [16, 8], strides = [1, 1]} : vector<144x20xf32> to vector<16x8xf32>
    %266 = arith.addf %264, %265 : vector<16x8xf32>
    %267 = vector.extract_strided_slice %251 {offsets = [128, 10], sizes = [16, 8], strides = [1, 1]} : vector<144x20xf32> to vector<16x8xf32>
    %268 = arith.addf %266, %267 : vector<16x8xf32>
    %c0_97 = arith.constant 0 : index
    %c0_98 = arith.constant 0 : index
    %269 = vector.load %arg21[%c0_97, %c0_98] : memref<8x20xf32, #tpu.memory_space<vmem>>, vector<8x20xf32>
    %cst_99 = arith.constant dense<0.000000e+00> : vector<16x20xf32>
    %270 = tpu.matmul %268, %269, %cst_99 {dimension_numbers = #tpu.dot_dimension_numbers<[1], [0], [0], [1], [0, 0, 1, 1], [], []>} : vector<16x8xf32>, vector<8x20xf32>, vector<16x20xf32> -> vector<16x20xf32>
    %cst_100 = arith.constant dense<0.000000e+00> : vector<16xf32>
    %271 = vector.multi_reduction <add>, %270, %cst_100 [1] : vector<16x20xf32> to vector<16xf32>
    %272 = vector.shape_cast %271 : vector<16xf32> to vector<16x1xf32>
    %cst_101 = arith.constant 2.500000e-01 : f32
    %273 = vector.broadcast %cst_101 : f32 to vector<16x1xf32>
    %274 = arith.mulf %272, %273 : vector<16x1xf32>
    %275 = vector.broadcast %274 : vector<16x1xf32> to vector<16x20xf32>
    %276 = arith.subf %270, %275 : vector<16x20xf32>
    %277 = vector.broadcast %247 : vector<1x20xf32> to vector<16x20xf32>
    %278 = arith.mulf %276, %277 : vector<16x20xf32>
    %279 = arith.mulf %278, %278 : vector<16x20xf32>
    %cst_102 = arith.constant dense<0.000000e+00> : vector<16xf32>
    %280 = vector.multi_reduction <add>, %279, %cst_102 [1] : vector<16x20xf32> to vector<16xf32>
    %281 = vector.shape_cast %280 : vector<16xf32> to vector<16x1xf32>
    %cst_103 = arith.constant 2.500000e-01 : f32
    %282 = vector.broadcast %cst_103 : f32 to vector<16x1xf32>
    %283 = arith.mulf %281, %282 : vector<16x1xf32>
    %cst_104 = arith.constant 9.99999974E-6 : f32
    %284 = vector.broadcast %cst_104 : f32 to vector<16x1xf32>
    %285 = arith.addf %283, %284 : vector<16x1xf32>
    %286 = math.rsqrt %285 : vector<16x1xf32>
    %287 = vector.broadcast %286 : vector<16x1xf32> to vector<16x20xf32>
    %288 = arith.mulf %278, %287 : vector<16x20xf32>
    %cst_105 = arith.constant 0.000000e+00 : f32
    %289 = vector.broadcast %cst_105 : f32 to vector<16x20xf32>
    %290 = arith.cmpf oge, %288, %289 : vector<16x20xf32>
    %291 = vector.broadcast %248 : f32 to vector<16x20xf32>
    %292 = arith.mulf %291, %288 : vector<16x20xf32>
    %293 = arith.select %290, %288, %292 : vector<16x20xi1>, vector<16x20xf32>
    %c0_106 = arith.constant 0 : index
    %c0_107 = arith.constant 0 : index
    %294 = vector.load %arg16[%c0_106, %c0_107] : memref<1x42xf32, #tpu.memory_space<vmem>>, vector<1x42xf32>
    %c0_108 = arith.constant 0 : index
    %c6 = arith.constant 6 : index
    %295 = memref.load %arg2[%c0_108, %c6] : memref<1x8xf32, #tpu.memory_space<smem>>
    %c0_109 = arith.constant 0 : index
    %c0_110 = arith.constant 0 : index
    %296 = vector.load %arg22[%c0_109, %c0_110] : memref<144x16xbf16, #tpu.memory_space<vmem>>, vector<144x16xbf16>
    %297 = arith.truncf %246 : vector<16x20xf32> to vector<16x20xbf16>
    %cst_111 = arith.constant dense<0.000000e+00> : vector<144x20xf32>
    %298 = tpu.matmul %296, %297, %cst_111 {dimension_numbers = #tpu.dot_dimension_numbers<[1], [0], [0], [1], [0, 0, 1, 1], [], []>} : vector<144x16xbf16>, vector<16x20xbf16>, vector<144x20xf32> -> vector<144x20xf32>
    %c0_112 = arith.constant 0 : index
    %c0_113 = arith.constant 0 : index
    %299 = vector.load %arg23[%c0_112, %c0_113] : memref<144x16xbf16, #tpu.memory_space<vmem>>, vector<144x16xbf16>
    %300 = arith.truncf %293 : vector<16x20xf32> to vector<16x20xbf16>
    %cst_114 = arith.constant dense<0.000000e+00> : vector<144x20xf32>
    %301 = tpu.matmul %299, %300, %cst_114 {dimension_numbers = #tpu.dot_dimension_numbers<[1], [0], [0], [1], [0, 0, 1, 1], [], []>} : vector<144x16xbf16>, vector<16x20xbf16>, vector<144x20xf32> -> vector<144x20xf32>
    %302 = arith.addf %298, %301 : vector<144x20xf32>
    %303 = vector.extract_strided_slice %302 {offsets = [64, 5], sizes = [16, 8], strides = [1, 1]} : vector<144x20xf32> to vector<16x8xf32>
    %c0_115 = arith.constant 0 : index
    %c0_116 = arith.constant 0 : index
    %c0_117 = arith.constant 0 : index
    %304 = vector.load %arg24[%c0_115, %c0_116, %c0_117] : memref<4x8x42xf32, #tpu.memory_space<vmem>>, vector<1x8x42xf32>
    %305 = vector.shape_cast %304 : vector<1x8x42xf32> to vector<8x42xf32>
    %cst_118 = arith.constant dense<0.000000e+00> : vector<16x42xf32>
    %306 = tpu.matmul %303, %305, %cst_118 {dimension_numbers = #tpu.dot_dimension_numbers<[1], [0], [0], [1], [0, 0, 1, 1], [], []>} : vector<16x8xf32>, vector<8x42xf32>, vector<16x42xf32> -> vector<16x42xf32>
    %307 = vector.extract_strided_slice %302 {offsets = [48, 5], sizes = [16, 8], strides = [1, 1]} : vector<144x20xf32> to vector<16x8xf32>
    %308 = vector.extract_strided_slice %302 {offsets = [80, 6], sizes = [16, 8], strides = [1, 1]} : vector<144x20xf32> to vector<16x8xf32>
    %309 = arith.addf %307, %308 : vector<16x8xf32>
    %c1_119 = arith.constant 1 : index
    %c0_120 = arith.constant 0 : index
    %c0_121 = arith.constant 0 : index
    %310 = vector.load %arg24[%c1_119, %c0_120, %c0_121] : memref<4x8x42xf32, #tpu.memory_space<vmem>>, vector<1x8x42xf32>
    %311 = vector.shape_cast %310 : vector<1x8x42xf32> to vector<8x42xf32>
    %cst_122 = arith.constant dense<0.000000e+00> : vector<16x42xf32>
    %312 = tpu.matmul %309, %311, %cst_122 {dimension_numbers = #tpu.dot_dimension_numbers<[1], [0], [0], [1], [0, 0, 1, 1], [], []>} : vector<16x8xf32>, vector<8x42xf32>, vector<16x42xf32> -> vector<16x42xf32>
    %313 = arith.addf %306, %312 : vector<16x42xf32>
    %314 = vector.extract_strided_slice %302 {offsets = [16, 5], sizes = [16, 8], strides = [1, 1]} : vector<144x20xf32> to vector<16x8xf32>
    %315 = vector.extract_strided_slice %302 {offsets = [112, 9], sizes = [16, 8], strides = [1, 1]} : vector<144x20xf32> to vector<16x8xf32>
    %316 = arith.addf %314, %315 : vector<16x8xf32>
    %c2_123 = arith.constant 2 : index
    %c0_124 = arith.constant 0 : index
    %c0_125 = arith.constant 0 : index
    %317 = vector.load %arg24[%c2_123, %c0_124, %c0_125] : memref<4x8x42xf32, #tpu.memory_space<vmem>>, vector<1x8x42xf32>
    %318 = vector.shape_cast %317 : vector<1x8x42xf32> to vector<8x42xf32>
    %cst_126 = arith.constant dense<0.000000e+00> : vector<16x42xf32>
    %319 = tpu.matmul %316, %318, %cst_126 {dimension_numbers = #tpu.dot_dimension_numbers<[1], [0], [0], [1], [0, 0, 1, 1], [], []>} : vector<16x8xf32>, vector<8x42xf32>, vector<16x42xf32> -> vector<16x42xf32>
    %320 = arith.addf %313, %319 : vector<16x42xf32>
    %321 = vector.extract_strided_slice %302 {offsets = [0, 5], sizes = [16, 8], strides = [1, 1]} : vector<144x20xf32> to vector<16x8xf32>
    %322 = vector.extract_strided_slice %302 {offsets = [32, 6], sizes = [16, 8], strides = [1, 1]} : vector<144x20xf32> to vector<16x8xf32>
    %323 = arith.addf %321, %322 : vector<16x8xf32>
    %324 = vector.extract_strided_slice %302 {offsets = [96, 9], sizes = [16, 8], strides = [1, 1]} : vector<144x20xf32> to vector<16x8xf32>
    %325 = arith.addf %323, %324 : vector<16x8xf32>
    %326 = vector.extract_strided_slice %302 {offsets = [128, 10], sizes = [16, 8], strides = [1, 1]} : vector<144x20xf32> to vector<16x8xf32>
    %327 = arith.addf %325, %326 : vector<16x8xf32>
    %c3_127 = arith.constant 3 : index
    %c0_128 = arith.constant 0 : index
    %c0_129 = arith.constant 0 : index
    %328 = vector.load %arg24[%c3_127, %c0_128, %c0_129] : memref<4x8x42xf32, #tpu.memory_space<vmem>>, vector<1x8x42xf32>
    %329 = vector.shape_cast %328 : vector<1x8x42xf32> to vector<8x42xf32>
    %cst_130 = arith.constant dense<0.000000e+00> : vector<16x42xf32>
    %330 = tpu.matmul %327, %329, %cst_130 {dimension_numbers = #tpu.dot_dimension_numbers<[1], [0], [0], [1], [0, 0, 1, 1], [], []>} : vector<16x8xf32>, vector<8x42xf32>, vector<16x42xf32> -> vector<16x42xf32>
    %331 = arith.addf %320, %330 : vector<16x42xf32>
    %cst_131 = arith.constant dense<0.000000e+00> : vector<16xf32>
    %332 = vector.multi_reduction <add>, %331, %cst_131 [1] : vector<16x42xf32> to vector<16xf32>
    %333 = vector.shape_cast %332 : vector<16xf32> to vector<16x1xf32>
    %cst_132 = arith.constant 6.250000e-02 : f32
    %334 = vector.broadcast %cst_132 : f32 to vector<16x1xf32>
    %335 = arith.mulf %333, %334 : vector<16x1xf32>
    %336 = vector.broadcast %335 : vector<16x1xf32> to vector<16x42xf32>
    %337 = arith.subf %331, %336 : vector<16x42xf32>
    %338 = vector.broadcast %294 : vector<1x42xf32> to vector<16x42xf32>
    %339 = arith.mulf %337, %338 : vector<16x42xf32>
    %340 = arith.mulf %339, %339 : vector<16x42xf32>
    %cst_133 = arith.constant dense<0.000000e+00> : vector<16xf32>
    %341 = vector.multi_reduction <add>, %340, %cst_133 [1] : vector<16x42xf32> to vector<16xf32>
    %342 = vector.shape_cast %341 : vector<16xf32> to vector<16x1xf32>
    %cst_134 = arith.constant 6.250000e-02 : f32
    %343 = vector.broadcast %cst_134 : f32 to vector<16x1xf32>
    %344 = arith.mulf %342, %343 : vector<16x1xf32>
    %cst_135 = arith.constant 9.99999974E-6 : f32
    %345 = vector.broadcast %cst_135 : f32 to vector<16x1xf32>
    %346 = arith.addf %344, %345 : vector<16x1xf32>
    %347 = math.rsqrt %346 : vector<16x1xf32>
    %348 = vector.broadcast %347 : vector<16x1xf32> to vector<16x42xf32>
    %349 = arith.mulf %339, %348 : vector<16x42xf32>
    %cst_136 = arith.constant 0.000000e+00 : f32
    %350 = vector.broadcast %cst_136 : f32 to vector<16x42xf32>
    %351 = arith.cmpf oge, %349, %350 : vector<16x42xf32>
    %352 = vector.broadcast %295 : f32 to vector<16x42xf32>
    %353 = arith.mulf %352, %349 : vector<16x42xf32>
    %354 = arith.select %351, %349, %353 : vector<16x42xi1>, vector<16x42xf32>
    %c0_137 = arith.constant 0 : index
    %c0_138 = arith.constant 0 : index
    %355 = vector.load %arg13[%c0_137, %c0_138] : memref<1x110xf32, #tpu.memory_space<vmem>>, vector<1x110xf32>
    %c0_139 = arith.constant 0 : index
    %c7 = arith.constant 7 : index
    %356 = memref.load %arg2[%c0_139, %c7] : memref<1x8xf32, #tpu.memory_space<smem>>
    %c0_140 = arith.constant 0 : index
    %c0_141 = arith.constant 0 : index
    %357 = vector.load %arg25[%c0_140, %c0_141] : memref<72x16xbf16, #tpu.memory_space<vmem>>, vector<72x16xbf16>
    %358 = arith.truncf %199 : vector<16x42xf32> to vector<16x42xbf16>
    %cst_142 = arith.constant dense<0.000000e+00> : vector<72x42xf32>
    %359 = tpu.matmul %357, %358, %cst_142 {dimension_numbers = #tpu.dot_dimension_numbers<[1], [0], [0], [1], [0, 0, 1, 1], [], []>} : vector<72x16xbf16>, vector<16x42xbf16>, vector<72x42xf32> -> vector<72x42xf32>
    %c0_143 = arith.constant 0 : index
    %c0_144 = arith.constant 0 : index
    %360 = vector.load %arg26[%c0_143, %c0_144] : memref<72x16xbf16, #tpu.memory_space<vmem>>, vector<72x16xbf16>
    %361 = arith.truncf %354 : vector<16x42xf32> to vector<16x42xbf16>
    %cst_145 = arith.constant dense<0.000000e+00> : vector<72x42xf32>
    %362 = tpu.matmul %360, %361, %cst_145 {dimension_numbers = #tpu.dot_dimension_numbers<[1], [0], [0], [1], [0, 0, 1, 1], [], []>} : vector<72x16xbf16>, vector<16x42xbf16>, vector<72x42xf32> -> vector<72x42xf32>
    %363 = arith.addf %359, %362 : vector<72x42xf32>
    %364 = vector.extract_strided_slice %363 {offsets = [32, 7], sizes = [8, 24], strides = [1, 1]} : vector<72x42xf32> to vector<8x24xf32>
    %c0_146 = arith.constant 0 : index
    %c0_147 = arith.constant 0 : index
    %c0_148 = arith.constant 0 : index
    %365 = vector.load %arg27[%c0_146, %c0_147, %c0_148] : memref<4x24x110xf32, #tpu.memory_space<vmem>>, vector<1x24x110xf32>
    %366 = vector.shape_cast %365 : vector<1x24x110xf32> to vector<24x110xf32>
    %cst_149 = arith.constant dense<0.000000e+00> : vector<8x110xf32>
    %367 = tpu.matmul %364, %366, %cst_149 {dimension_numbers = #tpu.dot_dimension_numbers<[1], [0], [0], [1], [0, 0, 1, 1], [], []>} : vector<8x24xf32>, vector<24x110xf32>, vector<8x110xf32> -> vector<8x110xf32>
    %368 = vector.extract_strided_slice %363 {offsets = [24, 7], sizes = [8, 24], strides = [1, 1]} : vector<72x42xf32> to vector<8x24xf32>
    %369 = vector.extract_strided_slice %363 {offsets = [40, 8], sizes = [8, 24], strides = [1, 1]} : vector<72x42xf32> to vector<8x24xf32>
    %370 = arith.addf %368, %369 : vector<8x24xf32>
    %c1_150 = arith.constant 1 : index
    %c0_151 = arith.constant 0 : index
    %c0_152 = arith.constant 0 : index
    %371 = vector.load %arg27[%c1_150, %c0_151, %c0_152] : memref<4x24x110xf32, #tpu.memory_space<vmem>>, vector<1x24x110xf32>
    %372 = vector.shape_cast %371 : vector<1x24x110xf32> to vector<24x110xf32>
    %cst_153 = arith.constant dense<0.000000e+00> : vector<8x110xf32>
    %373 = tpu.matmul %370, %372, %cst_153 {dimension_numbers = #tpu.dot_dimension_numbers<[1], [0], [0], [1], [0, 0, 1, 1], [], []>} : vector<8x24xf32>, vector<24x110xf32>, vector<8x110xf32> -> vector<8x110xf32>
    %374 = arith.addf %367, %373 : vector<8x110xf32>
    %375 = vector.extract_strided_slice %363 {offsets = [8, 7], sizes = [8, 24], strides = [1, 1]} : vector<72x42xf32> to vector<8x24xf32>
    %376 = vector.extract_strided_slice %363 {offsets = [56, 13], sizes = [8, 24], strides = [1, 1]} : vector<72x42xf32> to vector<8x24xf32>
    %377 = arith.addf %375, %376 : vector<8x24xf32>
    %c2_154 = arith.constant 2 : index
    %c0_155 = arith.constant 0 : index
    %c0_156 = arith.constant 0 : index
    %378 = vector.load %arg27[%c2_154, %c0_155, %c0_156] : memref<4x24x110xf32, #tpu.memory_space<vmem>>, vector<1x24x110xf32>
    %379 = vector.shape_cast %378 : vector<1x24x110xf32> to vector<24x110xf32>
    %cst_157 = arith.constant dense<0.000000e+00> : vector<8x110xf32>
    %380 = tpu.matmul %377, %379, %cst_157 {dimension_numbers = #tpu.dot_dimension_numbers<[1], [0], [0], [1], [0, 0, 1, 1], [], []>} : vector<8x24xf32>, vector<24x110xf32>, vector<8x110xf32> -> vector<8x110xf32>
    %381 = arith.addf %374, %380 : vector<8x110xf32>
    %382 = vector.extract_strided_slice %363 {offsets = [0, 7], sizes = [8, 24], strides = [1, 1]} : vector<72x42xf32> to vector<8x24xf32>
    %383 = vector.extract_strided_slice %363 {offsets = [16, 8], sizes = [8, 24], strides = [1, 1]} : vector<72x42xf32> to vector<8x24xf32>
    %384 = arith.addf %382, %383 : vector<8x24xf32>
    %385 = vector.extract_strided_slice %363 {offsets = [48, 13], sizes = [8, 24], strides = [1, 1]} : vector<72x42xf32> to vector<8x24xf32>
    %386 = arith.addf %384, %385 : vector<8x24xf32>
    %387 = vector.extract_strided_slice %363 {offsets = [64, 14], sizes = [8, 24], strides = [1, 1]} : vector<72x42xf32> to vector<8x24xf32>
    %388 = arith.addf %386, %387 : vector<8x24xf32>
    %c3_158 = arith.constant 3 : index
    %c0_159 = arith.constant 0 : index
    %c0_160 = arith.constant 0 : index
    %389 = vector.load %arg27[%c3_158, %c0_159, %c0_160] : memref<4x24x110xf32, #tpu.memory_space<vmem>>, vector<1x24x110xf32>
    %390 = vector.shape_cast %389 : vector<1x24x110xf32> to vector<24x110xf32>
    %cst_161 = arith.constant dense<0.000000e+00> : vector<8x110xf32>
    %391 = tpu.matmul %388, %390, %cst_161 {dimension_numbers = #tpu.dot_dimension_numbers<[1], [0], [0], [1], [0, 0, 1, 1], [], []>} : vector<8x24xf32>, vector<24x110xf32>, vector<8x110xf32> -> vector<8x110xf32>
    %392 = arith.addf %381, %391 : vector<8x110xf32>
    %cst_162 = arith.constant dense<0.000000e+00> : vector<8xf32>
    %393 = vector.multi_reduction <add>, %392, %cst_162 [1] : vector<8x110xf32> to vector<8xf32>
    %394 = vector.shape_cast %393 : vector<8xf32> to vector<8x1xf32>
    %cst_163 = arith.constant 1.562500e-02 : f32
    %395 = vector.broadcast %cst_163 : f32 to vector<8x1xf32>
    %396 = arith.mulf %394, %395 : vector<8x1xf32>
    %397 = vector.broadcast %396 : vector<8x1xf32> to vector<8x110xf32>
    %398 = arith.subf %392, %397 : vector<8x110xf32>
    %399 = vector.broadcast %355 : vector<1x110xf32> to vector<8x110xf32>
    %400 = arith.mulf %398, %399 : vector<8x110xf32>
    %401 = arith.mulf %400, %400 : vector<8x110xf32>
    %cst_164 = arith.constant dense<0.000000e+00> : vector<8xf32>
    %402 = vector.multi_reduction <add>, %401, %cst_164 [1] : vector<8x110xf32> to vector<8xf32>
    %403 = vector.shape_cast %402 : vector<8xf32> to vector<8x1xf32>
    %cst_165 = arith.constant 1.562500e-02 : f32
    %404 = vector.broadcast %cst_165 : f32 to vector<8x1xf32>
    %405 = arith.mulf %403, %404 : vector<8x1xf32>
    %cst_166 = arith.constant 9.99999974E-6 : f32
    %406 = vector.broadcast %cst_166 : f32 to vector<8x1xf32>
    %407 = arith.addf %405, %406 : vector<8x1xf32>
    %408 = math.rsqrt %407 : vector<8x1xf32>
    %409 = vector.broadcast %408 : vector<8x1xf32> to vector<8x110xf32>
    %410 = arith.mulf %400, %409 : vector<8x110xf32>
    %cst_167 = arith.constant 0.000000e+00 : f32
    %411 = vector.broadcast %cst_167 : f32 to vector<8x110xf32>
    %412 = arith.cmpf oge, %410, %411 : vector<8x110xf32>
    %413 = vector.broadcast %356 : f32 to vector<8x110xf32>
    %414 = arith.mulf %413, %410 : vector<8x110xf32>
    %415 = arith.select %412, %410, %414 : vector<8x110xi1>, vector<8x110xf32>
    %c0_168 = arith.constant 0 : index
    %c0_169 = arith.constant 0 : index
    %416 = vector.load %arg31[%c0_168, %c0_169] : memref<4x1xf32, #tpu.memory_space<vmem>>, vector<4x1xf32>
    %c0_170 = arith.constant 0 : index
    %c0_171 = arith.constant 0 : index
    %417 = vector.load %arg28[%c0_170, %c0_171] : memref<72x8xbf16, #tpu.memory_space<vmem>>, vector<72x8xbf16>
    %418 = arith.truncf %152 : vector<8x110xf32> to vector<8x110xbf16>
    %cst_172 = arith.constant dense<0.000000e+00> : vector<72x110xf32>
    %419 = tpu.matmul %417, %418, %cst_172 {dimension_numbers = #tpu.dot_dimension_numbers<[1], [0], [0], [1], [0, 0, 1, 1], [], []>} : vector<72x8xbf16>, vector<8x110xbf16>, vector<72x110xf32> -> vector<72x110xf32>
    %c0_173 = arith.constant 0 : index
    %c0_174 = arith.constant 0 : index
    %420 = vector.load %arg29[%c0_173, %c0_174] : memref<72x8xbf16, #tpu.memory_space<vmem>>, vector<72x8xbf16>
    %421 = arith.truncf %415 : vector<8x110xf32> to vector<8x110xbf16>
    %cst_175 = arith.constant dense<0.000000e+00> : vector<72x110xf32>
    %422 = tpu.matmul %420, %421, %cst_175 {dimension_numbers = #tpu.dot_dimension_numbers<[1], [0], [0], [1], [0, 0, 1, 1], [], []>} : vector<72x8xbf16>, vector<8x110xbf16>, vector<72x110xf32> -> vector<72x110xf32>
    %423 = arith.addf %419, %422 : vector<72x110xf32>
    %424 = vector.extract_strided_slice %423 {offsets = [32, 11], sizes = [4, 80], strides = [1, 1]} : vector<72x110xf32> to vector<4x80xf32>
    %c0_176 = arith.constant 0 : index
    %c0_177 = arith.constant 0 : index
    %c0_178 = arith.constant 0 : index
    %425 = vector.load %arg30[%c0_176, %c0_177, %c0_178] : memref<4x80x256xf32, #tpu.memory_space<vmem>>, vector<1x80x256xf32>
    %426 = vector.shape_cast %425 : vector<1x80x256xf32> to vector<80x256xf32>
    %cst_179 = arith.constant dense<0.000000e+00> : vector<4x256xf32>
    %427 = tpu.matmul %424, %426, %cst_179 {dimension_numbers = #tpu.dot_dimension_numbers<[1], [0], [0], [1], [0, 0, 1, 1], [], []>} : vector<4x80xf32>, vector<80x256xf32>, vector<4x256xf32> -> vector<4x256xf32>
    %428 = vector.extract_strided_slice %423 {offsets = [24, 11], sizes = [4, 80], strides = [1, 1]} : vector<72x110xf32> to vector<4x80xf32>
    %429 = vector.extract_strided_slice %423 {offsets = [40, 12], sizes = [4, 80], strides = [1, 1]} : vector<72x110xf32> to vector<4x80xf32>
    %430 = arith.addf %428, %429 : vector<4x80xf32>
    %c1_180 = arith.constant 1 : index
    %c0_181 = arith.constant 0 : index
    %c0_182 = arith.constant 0 : index
    %431 = vector.load %arg30[%c1_180, %c0_181, %c0_182] : memref<4x80x256xf32, #tpu.memory_space<vmem>>, vector<1x80x256xf32>
    %432 = vector.shape_cast %431 : vector<1x80x256xf32> to vector<80x256xf32>
    %cst_183 = arith.constant dense<0.000000e+00> : vector<4x256xf32>
    %433 = tpu.matmul %430, %432, %cst_183 {dimension_numbers = #tpu.dot_dimension_numbers<[1], [0], [0], [1], [0, 0, 1, 1], [], []>} : vector<4x80xf32>, vector<80x256xf32>, vector<4x256xf32> -> vector<4x256xf32>
    %434 = arith.addf %427, %433 : vector<4x256xf32>
    %435 = vector.extract_strided_slice %423 {offsets = [8, 11], sizes = [4, 80], strides = [1, 1]} : vector<72x110xf32> to vector<4x80xf32>
    %436 = vector.extract_strided_slice %423 {offsets = [56, 21], sizes = [4, 80], strides = [1, 1]} : vector<72x110xf32> to vector<4x80xf32>
    %437 = arith.addf %435, %436 : vector<4x80xf32>
    %c2_184 = arith.constant 2 : index
    %c0_185 = arith.constant 0 : index
    %c0_186 = arith.constant 0 : index
    %438 = vector.load %arg30[%c2_184, %c0_185, %c0_186] : memref<4x80x256xf32, #tpu.memory_space<vmem>>, vector<1x80x256xf32>
    %439 = vector.shape_cast %438 : vector<1x80x256xf32> to vector<80x256xf32>
    %cst_187 = arith.constant dense<0.000000e+00> : vector<4x256xf32>
    %440 = tpu.matmul %437, %439, %cst_187 {dimension_numbers = #tpu.dot_dimension_numbers<[1], [0], [0], [1], [0, 0, 1, 1], [], []>} : vector<4x80xf32>, vector<80x256xf32>, vector<4x256xf32> -> vector<4x256xf32>
    %441 = arith.addf %434, %440 : vector<4x256xf32>
    %442 = vector.extract_strided_slice %423 {offsets = [0, 11], sizes = [4, 80], strides = [1, 1]} : vector<72x110xf32> to vector<4x80xf32>
    %443 = vector.extract_strided_slice %423 {offsets = [16, 12], sizes = [4, 80], strides = [1, 1]} : vector<72x110xf32> to vector<4x80xf32>
    %444 = arith.addf %442, %443 : vector<4x80xf32>
    %445 = vector.extract_strided_slice %423 {offsets = [48, 21], sizes = [4, 80], strides = [1, 1]} : vector<72x110xf32> to vector<4x80xf32>
    %446 = arith.addf %444, %445 : vector<4x80xf32>
    %447 = vector.extract_strided_slice %423 {offsets = [64, 22], sizes = [4, 80], strides = [1, 1]} : vector<72x110xf32> to vector<4x80xf32>
    %448 = arith.addf %446, %447 : vector<4x80xf32>
    %c3_188 = arith.constant 3 : index
    %c0_189 = arith.constant 0 : index
    %c0_190 = arith.constant 0 : index
    %449 = vector.load %arg30[%c3_188, %c0_189, %c0_190] : memref<4x80x256xf32, #tpu.memory_space<vmem>>, vector<1x80x256xf32>
    %450 = vector.shape_cast %449 : vector<1x80x256xf32> to vector<80x256xf32>
    %cst_191 = arith.constant dense<0.000000e+00> : vector<4x256xf32>
    %451 = tpu.matmul %448, %450, %cst_191 {dimension_numbers = #tpu.dot_dimension_numbers<[1], [0], [0], [1], [0, 0, 1, 1], [], []>} : vector<4x80xf32>, vector<80x256xf32>, vector<4x256xf32> -> vector<4x256xf32>
    %452 = arith.addf %441, %451 : vector<4x256xf32>
    %453 = vector.broadcast %416 : vector<4x1xf32> to vector<4x256xf32>
    %454 = arith.addf %452, %453 : vector<4x256xf32>
    %c0_192 = arith.constant 0 : index
    %c0_193 = arith.constant 0 : index
    %c0_194 = arith.constant 0 : index
    %455 = vector.load %arg32[%c0_192, %c0_193, %c0_194] : memref<1x4x256xf32, #tpu.memory_space<vmem>>, vector<1x4x256xf32>
    %456 = vector.shape_cast %455 : vector<1x4x256xf32> to vector<4x256xf32>
    %457 = vector.shape_cast %454 : vector<4x256xf32> to vector<1x4x256xf32>
    tpu.vector_store %arg32[%c0_192, %c0_193, %c0_194], %457 {strides = array<i32>} : memref<1x4x256xf32, #tpu.memory_space<vmem>>, vector<1x4x256xf32>,
    return
  }
  func.func @transform_0(%arg0: i32) -> (i32, i32, i32) {
    %c0_i32 = arith.constant 0 : i32
    %c0_i32_0 = arith.constant 0 : i32
    %c0_i32_1 = arith.constant 0 : i32
    return %arg0, %c0_i32, %c0_i32_0 : i32, i32, i32
  }
  func.func @transform_1(%arg0: i32) -> (i32, i32) {
    %c0_i32 = arith.constant 0 : i32
    %c0_i32_0 = arith.constant 0 : i32
    %c0_i32_1 = arith.constant 0 : i32
    return %c0_i32, %c0_i32_0 : i32, i32
  }
  func.func @transform_2(%arg0: i32) -> (i32, i32) {
    %c0_i32 = arith.constant 0 : i32
    %c0_i32_0 = arith.constant 0 : i32
    %c0_i32_1 = arith.constant 0 : i32
    return %c0_i32, %c0_i32_0 : i32, i32
  }
  func.func @transform_3(%arg0: i32) -> (i32, i32) {
    %c0_i32 = arith.constant 0 : i32
    %c0_i32_0 = arith.constant 0 : i32
    %c0_i32_1 = arith.constant 0 : i32
    return %c0_i32, %c0_i32_0 : i32, i32
  }
  func.func @transform_4(%arg0: i32) -> (i32, i32) {
    %c0_i32 = arith.constant 0 : i32
    %c0_i32_0 = arith.constant 0 : i32
    %c0_i32_1 = arith.constant 0 : i32
    return %c0_i32, %c0_i32_0 : i32, i32
  }
  func.func @transform_5(%arg0: i32) -> (i32, i32) {
    %c0_i32 = arith.constant 0 : i32
    %c0_i32_0 = arith.constant 0 : i32
    %c0_i32_1 = arith.constant 0 : i32
    return %c0_i32, %c0_i32_0 : i32, i32
  }
  func.func @transform_6(%arg0: i32) -> (i32, i32) {
    %c0_i32 = arith.constant 0 : i32
    %c0_i32_0 = arith.constant 0 : i32
    %c0_i32_1 = arith.constant 0 : i32
    return %c0_i32, %c0_i32_0 : i32, i32
  }
  func.func @transform_7(%arg0: i32) -> (i32, i32) {
    %c0_i32 = arith.constant 0 : i32
    %c0_i32_0 = arith.constant 0 : i32
    %c0_i32_1 = arith.constant 0 : i32
    return %c0_i32, %c0_i32_0 : i32, i32
  }
  func.func @transform_8(%arg0: i32) -> (i32, i32) {
    %c0_i32 = arith.constant 0 : i32
    %c0_i32_0 = arith.constant 0 : i32
    %c0_i32_1 = arith.constant 0 : i32
    return %c0_i32, %c0_i32_0 : i32, i32
  }
  func.func @transform_9(%arg0: i32) -> (i32, i32) {
    %c0_i32 = arith.constant 0 : i32
    %c0_i32_0 = arith.constant 0 : i32
    %c0_i32_1 = arith.constant 0 : i32
    return %c0_i32, %c0_i32_0 : i32, i32
  }
  func.func @transform_10(%arg0: i32) -> (i32, i32) {
    %c0_i32 = arith.constant 0 : i32
    %c0_i32_0 = arith.constant 0 : i32
    %c0_i32_1 = arith.constant 0 : i32
    return %c0_i32, %c0_i32_0 : i32, i32
  }
  func.func @transform_11(%arg0: i32) -> (i32, i32) {
    %c0_i32 = arith.constant 0 : i32
    %c0_i32_0 = arith.constant 0 : i32
    %c0_i32_1 = arith.constant 0 : i32
    return %c0_i32, %c0_i32_0 : i32, i32
  }
  func.func @transform_12(%arg0: i32) -> (i32, i32) {
    %c0_i32 = arith.constant 0 : i32
    %c0_i32_0 = arith.constant 0 : i32
    %c0_i32_1 = arith.constant 0 : i32
    return %c0_i32, %c0_i32_0 : i32, i32
  }
  func.func @transform_13(%arg0: i32) -> (i32, i32) {
    %c0_i32 = arith.constant 0 : i32
    %c0_i32_0 = arith.constant 0 : i32
    %c0_i32_1 = arith.constant 0 : i32
    return %c0_i32, %c0_i32_0 : i32, i32
  }
  func.func @transform_14(%arg0: i32) -> (i32, i32) {
    %c0_i32 = arith.constant 0 : i32
    %c0_i32_0 = arith.constant 0 : i32
    %c0_i32_1 = arith.constant 0 : i32
    return %c0_i32, %c0_i32_0 : i32, i32
  }
  func.func @transform_15(%arg0: i32) -> (i32, i32) {
    %c0_i32 = arith.constant 0 : i32
    %c0_i32_0 = arith.constant 0 : i32
    %c0_i32_1 = arith.constant 0 : i32
    return %c0_i32, %c0_i32_0 : i32, i32
  }
  func.func @transform_16(%arg0: i32) -> (i32, i32) {
    %c0_i32 = arith.constant 0 : i32
    %c0_i32_0 = arith.constant 0 : i32
    %c0_i32_1 = arith.constant 0 : i32
    return %c0_i32, %c0_i32_0 : i32, i32
  }
  func.func @transform_17(%arg0: i32) -> (i32, i32) {
    %c0_i32 = arith.constant 0 : i32
    %c0_i32_0 = arith.constant 0 : i32
    %c0_i32_1 = arith.constant 0 : i32
    return %c0_i32, %c0_i32_0 : i32, i32
  }
  func.func @transform_18(%arg0: i32) -> (i32, i32) {
    %c0_i32 = arith.constant 0 : i32
    %c0_i32_0 = arith.constant 0 : i32
    %c0_i32_1 = arith.constant 0 : i32
    return %c0_i32, %c0_i32_0 : i32, i32
  }
  func.func @transform_19(%arg0: i32) -> (i32, i32) {
    %c0_i32 = arith.constant 0 : i32
    %c0_i32_0 = arith.constant 0 : i32
    %c0_i32_1 = arith.constant 0 : i32
    return %c0_i32, %c0_i32_0 : i32, i32
  }
  func.func @transform_20(%arg0: i32) -> (i32, i32) {
    %c0_i32 = arith.constant 0 : i32
    %c0_i32_0 = arith.constant 0 : i32
    %c0_i32_1 = arith.constant 0 : i32
    return %c0_i32, %c0_i32_0 : i32, i32
  }
  func.func @transform_21(%arg0: i32) -> (i32, i32) {
    %c0_i32 = arith.constant 0 : i32
    %c0_i32_0 = arith.constant 0 : i32
    %c0_i32_1 = arith.constant 0 : i32
    return %c0_i32, %c0_i32_0 : i32, i32
  }
  func.func @transform_22(%arg0: i32) -> (i32, i32) {
    %c0_i32 = arith.constant 0 : i32
    %c0_i32_0 = arith.constant 0 : i32
    %c0_i32_1 = arith.constant 0 : i32
    return %c0_i32, %c0_i32_0 : i32, i32
  }
  func.func @transform_23(%arg0: i32) -> (i32, i32, i32) {
    %c0_i32 = arith.constant 0 : i32
    %c0_i32_0 = arith.constant 0 : i32
    %c0_i32_1 = arith.constant 0 : i32
    %c0_i32_2 = arith.constant 0 : i32
    return %c0_i32, %c0_i32_0, %c0_i32_1 : i32, i32, i32
  }
  func.func @transform_24(%arg0: i32) -> (i32, i32) {
    %c0_i32 = arith.constant 0 : i32
    %c0_i32_0 = arith.constant 0 : i32
    %c0_i32_1 = arith.constant 0 : i32
    return %c0_i32, %c0_i32_0 : i32, i32
  }
  func.func @transform_25(%arg0: i32) -> (i32, i32) {
    %c0_i32 = arith.constant 0 : i32
    %c0_i32_0 = arith.constant 0 : i32
    %c0_i32_1 = arith.constant 0 : i32
    return %c0_i32, %c0_i32_0 : i32, i32
  }
  func.func @transform_26(%arg0: i32) -> (i32, i32, i32) {
    %c0_i32 = arith.constant 0 : i32
    %c0_i32_0 = arith.constant 0 : i32
    %c0_i32_1 = arith.constant 0 : i32
    %c0_i32_2 = arith.constant 0 : i32
    return %c0_i32, %c0_i32_0, %c0_i32_1 : i32, i32, i32
  }
  func.func @transform_27(%arg0: i32) -> (i32, i32) {
    %c0_i32 = arith.constant 0 : i32
    %c0_i32_0 = arith.constant 0 : i32
    %c0_i32_1 = arith.constant 0 : i32
    return %c0_i32, %c0_i32_0 : i32, i32
  }
  func.func @transform_28(%arg0: i32) -> (i32, i32) {
    %c0_i32 = arith.constant 0 : i32
    %c0_i32_0 = arith.constant 0 : i32
    %c0_i32_1 = arith.constant 0 : i32
    return %c0_i32, %c0_i32_0 : i32, i32
  }
  func.func @transform_29(%arg0: i32) -> (i32, i32, i32) {
    %c0_i32 = arith.constant 0 : i32
    %c0_i32_0 = arith.constant 0 : i32
    %c0_i32_1 = arith.constant 0 : i32
    %c0_i32_2 = arith.constant 0 : i32
    return %c0_i32, %c0_i32_0, %c0_i32_1 : i32, i32, i32
  }
  func.func @transform_30(%arg0: i32) -> (i32, i32) {
    %c0_i32 = arith.constant 0 : i32
    %c0_i32_0 = arith.constant 0 : i32
    %c0_i32_1 = arith.constant 0 : i32
    return %c0_i32, %c0_i32_0 : i32, i32
  }
  func.func @transform_31(%arg0: i32) -> (i32, i32, i32) {
    %c0_i32 = arith.constant 0 : i32
    %c0_i32_0 = arith.constant 0 : i32
    %c0_i32_1 = arith.constant 0 : i32
    return %arg0, %c0_i32, %c0_i32_0 : i32, i32, i32
  }
}

</mosaic_0001>

<bundles_post_ra>
// kernel: forward.1
= control target key start
LH: loop header
LB: loop body
LE: loop exit
PB: predicated region body
PF: predicated region fallthrough
CT: control target
= control target key end

     0   :  { %s5721_s6 = smov 1   ;;  %s5722_s10 = smov 2   ;;  %s6637_s0 = inlined_call_operand.smem [shape: u32[32], index: -1, kind: input, shape index: {}] }
   0x1   :  { %s5798_s5 = sld [smem:[%s6637_s0]]   ;;  %s5723_s14 = smov 3  }
   0x2   :  { %s5803_s9 = sld [smem:[%s6637_s0 + %s5721_s6]]   ;;  %s5724_s18 = smov 4  }
   0x3   :  { %s5808_s13 = sld [smem:[%s6637_s0 + %s5722_s10]]   ;;  %s5725_s22 = smov 5  }
   0x4   :  { %s5813_s17 = sld [smem:[%s6637_s0 + %s5723_s14]]   ;;  %s5726_s26 = smov 6  }
   0x5   :  { %s5818_s21 = sld [smem:[%s6637_s0 + %s5724_s18]]   ;;  %s5727_s30 = smov 7  }
   0x6   :  { %s5823_s25 = sld [smem:[%s6637_s0 + %s5725_s22]]   ;;  %s5728_s4 = smov 8  }
   0x7   :  { %s5828_s29 = sld [smem:[%s6637_s0 + %s5726_s26]]   ;;  %s5729_s10 = smov 9  }
   0x8   :  { %s5833_s3 = sld [smem:[%s6637_s0 + %s5727_s30]]   ;;  %s5730_s15 = smov 10  }
   0x9   :  { %s5838_s8 = sld [smem:[%s6637_s0 + %s5728_s4]]   ;;  %s5731_s20 = smov 11  }
   0xa   :  { %s5843_s14 = sld [smem:[%s6637_s0 + %s5729_s10]]   ;;  %s5732_s26 = smov 12  }
   0xb   :  { %s5848_s19 = sld [smem:[%s6637_s0 + %s5730_s15]]   ;;  %s5733_s1 = smov 13  }
   0xc   :  { %s5853_s24 = sld [smem:[%s6637_s0 + %s5731_s20]]   ;;  %s5734_s7 = smov 14  }
   0xd   :  { %s5858_s30 = sld [smem:[%s6637_s0 + %s5732_s26]]   ;;  %s5735_s15 = smov 15  }
   0xe   :  { %s5863_s6 = sld [smem:[%s6637_s0 + %s5733_s1]]   ;;  %s5736_s22 = smov 16  }
   0xf   :  { %s5868_s12 = sld [smem:[%s6637_s0 + %s5734_s7]]   ;;  %s5737_s28 = smov 17  }
  0x10   :  { %s5873_s20 = sld [smem:[%s6637_s0 + %s5735_s15]]   ;;  %s5738_s7 = smov 18  }
  0x11   :  { %s5878_s27 = sld [smem:[%s6637_s0 + %s5736_s22]]   ;;  %s5739_s15 = smov 19  }
  0x12   :  { %s5883_s4 = sld [smem:[%s6637_s0 + %s5737_s28]]   ;;  %s5740_s22 = smov 20  }
  0x13   :  { %s5741_s28 = smov 21  }
  0x15   :  { %6662 = sst [smem:[#allocation12_spill]] %s5868_s12 }
  0x16   :  { %6663 = sst [smem:[#allocation13_spill]] %s5873_s20 }
  0x17   :  { %6664 = sst [smem:[#allocation14_spill]] %s5878_s27 }
  0x18   :  { %6665 = sst [smem:[#allocation15_spill]] %s5883_s4 }
  0x19   :  { %s5888_s12 = sld [smem:[%s6637_s0 + %s5738_s7]]   ;;  %s5742_s7 = smov 22  }
  0x1a   :  { %s5893_s20 = sld [smem:[%s6637_s0 + %s5739_s15]]   ;;  %s5743_s15 = smov 23  }
  0x1b   :  { %s5898_s27 = sld [smem:[%s6637_s0 + %s5740_s22]]   ;;  %s5744_s22 = smov 24  }
  0x1c   :  { %s5903_s4 = sld [smem:[%s6637_s0 + %s5741_s28]]   ;;  %s5745_s28 = smov 25  }
  0x1f   :  { %6666 = sst [smem:[#allocation16_spill]] %s5888_s12 }
  0x20   :  { %6667 = sst [smem:[#allocation17_spill]] %s5893_s20 }
  0x21   :  { %6668 = sst [smem:[#allocation18_spill]] %s5898_s27 }
  0x22   :  { %6669 = sst [smem:[#allocation19_spill]] %s5903_s4 }
  0x23   :  { %s5908_s12 = sld [smem:[%s6637_s0 + %s5742_s7]]   ;;  %s5746_s7 = smov 26  }
  0x24   :  { %s5913_s20 = sld [smem:[%s6637_s0 + %s5743_s15]]   ;;  %s5747_s15 = smov 27  }
  0x25   :  { %s5918_s27 = sld [smem:[%s6637_s0 + %s5744_s22]]   ;;  %s5748_s22 = smov 28  }
  0x26   :  { %s5923_s4 = sld [smem:[%s6637_s0 + %s5745_s28]]   ;;  %s5749_s28 = smov 29  }
  0x29   :  { %6670 = sst [smem:[#allocation20_spill]] %s5908_s12 }
  0x2a   :  { %6671 = sst [smem:[#allocation21_spill]] %s5913_s20 }
  0x2b   :  { %6672 = sst [smem:[#allocation22_spill]] %s5918_s27 }
  0x2c   :  { %6673 = sst [smem:[#allocation23_spill]] %s5923_s4 }
  0x2d   :  { %s5928_s12 = sld [smem:[%s6637_s0 + %s5746_s7]]   ;;  %s5750_s7 = smov 30  }
  0x2e   :  { %s5933_s20 = sld [smem:[%s6637_s0 + %s5747_s15]]   ;;  %s5751_s15 = smov 31  }
  0x2f   :  { %s5938_s27 = sld [smem:[%s6637_s0 + %s5748_s22]]  }
  0x30   :  { %s5943_s4 = sld [smem:[%s6637_s0 + %s5749_s28]]  }
  0x33   :  { %6674 = sst [smem:[#allocation24_spill]] %s5928_s12 }
  0x34   :  { %6675 = sst [smem:[#allocation25_spill]] %s5933_s20 }
  0x35   :  { %s5948_s12 = sld [smem:[%s6637_s0 + %s5750_s7]]  }
  0x36   :  { %s5953_s20 = sld [smem:[%s6637_s0 + %s5751_s15]]  }
  0x3c   :  { %6676 = sst [smem:[#allocation26_spill]] %s5953_s20 }
  0x3d   :  { %68 = vsyncpa [#allocation4], 0 }
  0x3e   :  { %69 = vsyncpa [#allocation3], 0 }
  0x3f   :  { %70 = vsyncpa [#allocation7], 0  ;;  %s5955_s22 = smov 0  }
  0x40 LB: > { %6677 = sst [smem:[#allocation27_spill]] %s5719_s22  ;;  %s816_s23 = sshll.u32 %s5843_s14, 4  ;;  %s5719_s22 = sphi %s5955_s22, %s76_s22   ;;  %s5961_s23 = int_to_ptr.hbm [resolvable:$true] %s816_s23 }
  0x41   : > { %s5964_s0 = sadd.s32 4294967295, %s5719_s22   ;;  %p4960_p0 = scmp.ge.s32.totalorder %s5719_s22, 1 }
  0x42   : > { %p763_p1 = scmp.lt.s32.totalorder %s5719_s22, 3  ;;  %p5469_p2 = scmp.eq.s32.totalorder %s5964_s0, 0 }
  0x43   : > { %s5752_s28 = smov [#allocation6]   ;;  %s775_s2 = sshll.u32 %s5803_s9, 4  ;;  %s5982_s2 = int_to_ptr.vmem [resolvable:$true] %s775_s2 }
  0x44   : > { %p5969_p3 = pnand %p4960_p0, %p763_p1  ;;  %s818_s1 = sshll.u32 %s5752_s28, 4  ;;  %s819_s1 = int_to_ptr.vmem [resolvable:$true] %s818_s1 }
  0x45   : > { %s784_s10 = sshll.u32 %s5808_s13, 4  ;;  %s5596_s11 = sshra.s32 %s5961_s23, 4  ;;  %s5985_s10 = int_to_ptr.hbm [resolvable:$true] %s784_s10  ;;  %s5597_s11 = int_to_ptr.hbm [resolvable:$true] %s5596_s11 }
  0x46   : > { %p5456_p4 = pneg %p5969_p3  ;;  %s5598_s15 = scalar_lea.hbm %s5597_s11, 1056 }
  0x47   : > { %p5599_p6 = scmp.ne.s32.totalorder %s5597_s11, %s5598_s15  ;;  %s5603_s16 = scalar_lea.hbm %s5843_s14, 1056 }
  0x48   : > { %p5978_p5 = pnand %p5469_p2, %p5456_p4  ;;  %p5604_p10 = scmp.lt.s32.totalorder %s5597_s11, %s5843_s14 }
  0x49   : > { %p5605_p11 = scmp.lt.s32.totalorder %s5603_s16, %s5598_s15 }
  0x4a   : > { %p5600_p7 = pneg %p5978_p5 }
  0x4b   : > { %p5606_p12 = por %p5605_p11, %p5604_p10 }
  0x4c   : > { %p5601_p8 = pnand %p5600_p7, %p5599_p6 }
  0x4e   : > { %p5602_p9 = pneg %p5601_p8 }
  0x50   : > { %p5607_p13 = pnand %p5606_p12, %p5602_p9 }
  0x52   : > { %5610 = shalt.err (!%p5607_p13)
}
  0x53   : > { %s5753_s18 = smov 384   ;;  %s5754_s28 = smov 24  }
  0x54   : > { %5465 = dma.hbm_to_vmem [thread:$0]  (!%p5978_p5), %s5961_s23, 16896, %s819_s1, [#allocation7], %s5753_s18, %s5753_s18, %s5754_s28  }
  0x55   : > { %s5626_s22 = sshra.s32 %s5982_s2, 4  ;;  %s5633_s11 = scalar_lea.vmem %s5803_s9, 1  ;;  %s5627_s22 = int_to_ptr.vmem [resolvable:$true] %s5626_s22 }
  0x56   : > { %s5628_s20 = scalar_lea.vmem %s5627_s22, 1  ;;  %p5634_p6 = scmp.lt.s32.totalorder %s5627_s22, %s5803_s9 }
  0x57   : > { %p5629_p0 = scmp.ne.s32.totalorder %s5627_s22, %s5628_s20  ;;  %p5635_p8 = scmp.lt.s32.totalorder %s5633_s11, %s5628_s20 }
  0x59   : > { %p5631_p1 = pnand %p5629_p0, %p5600_p7  ;;  %p5636_p9 = por %p5635_p8, %p5634_p6 }
  0x5b   : > { %p5632_p4 = pneg %p5631_p1 }
  0x5d   : > { %p5637_p10 = pnand %p5636_p9, %p5632_p4 }
  0x5f   : > { %5640 = shalt.err (!%p5637_p10)
}
  0x60   : > { %s5755_s15 = smov [#allocation2]   ;;  %s5756_s23 = smov [#allocation5]  }
  0x61   : > { %5459 = dma.vmem_to_smem (!%p5978_p5), %s5982_s2, 16, %s5755_s15, [#allocation4]  }
  0x62   : > { %s786_s1 = sshll.u32 %s5756_s23, 4  ;;  %s5641_s16 = sshra.s32 %s5985_s10, 4  ;;  %s787_s1 = int_to_ptr.vmem [resolvable:$true] %s786_s1  ;;  %s5642_s16 = int_to_ptr.hbm [resolvable:$true] %s5641_s16 }
  0x63   : > { %s5643_s18 = scalar_lea.hbm %s5642_s16, 1024  ;;  %s5648_s20 = scalar_lea.hbm %s5808_s13, 1024 }
  0x64   : > { %p5644_p11 = scmp.ne.s32.totalorder %s5642_s16, %s5643_s18  ;;  %p5649_p0 = scmp.lt.s32.totalorder %s5642_s16, %s5808_s13 }
  0x65   : > { %p5650_p1 = scmp.lt.s32.totalorder %s5648_s20, %s5643_s18 }
  0x66   : > { %p5646_p12 = pnand %p5644_p11, %p5600_p7 }
  0x67   : > { %p5651_p4 = por %p5650_p1, %p5649_p0 }
  0x68   : > { %p5647_p13 = pneg %p5646_p12 }
  0x6a   : > { %p5652_p6 = pnand %p5651_p4, %p5647_p13 }
  0x6c   : > { %5655 = shalt.err (!%p5652_p6)
}
  0x6d   : > { %s5757_s22 = smov 512   ;;  %s5758_s2 = smov 32  }
  0x6e   : > { %5462 = dma.hbm_to_vmem [thread:$0]  (!%p5978_p5), %s5985_s10, 16384, %s787_s1, [#allocation3], %s5757_s22, %s5757_s22, %s5758_s2  }
  0x6f   : > { %s887_s28 = sshll.u32 %s5943_s4, 4  ;;  %s5759_s11 = smov [#allocation8]   ;;  %s888_s28 = int_to_ptr.hbm [resolvable:$true] %s887_s28 }
  0x70   : > { %s889_s15 = sshll.u32 %s5759_s11, 4  ;;  %s5671_s23 = sshra.s32 %s888_s28, 4  ;;  %s890_s15 = int_to_ptr.vmem [resolvable:$true] %s889_s15  ;;  %s5672_s23 = int_to_ptr.hbm [resolvable:$true] %s5671_s23 }
  0x71   : > { %s5673_s16 = scalar_lea.hbm %s5672_s23, 640  ;;  %s5678_s18 = scalar_lea.hbm %s5943_s4, 640 }
  0x72   : > { %p5674_p8 = scmp.ne.s32.totalorder %s5672_s23, %s5673_s16  ;;  %p5679_p11 = scmp.lt.s32.totalorder %s5672_s23, %s5943_s4 }
  0x73   : > { %p5680_p12 = scmp.lt.s32.totalorder %s5678_s18, %s5673_s16 }
  0x74   : > { %p5676_p9 = pnand %p5674_p8, %p5600_p7 }
  0x75   : > { %p5681_p13 = por %p5680_p12, %p5679_p11 }
  0x76   : > { %p5677_p10 = pneg %p5676_p9 }
  0x78   : > { %p5682_p0 = pnand %p5681_p13, %p5677_p10 }
  0x7a   : > { %5685 = shalt.err (!%p5682_p0)
}
  0x7b   : > { %s5760_s10 = smov 256   ;;  %s5761_s1 = smov 16  }
  0x7c   : > { %5468 = dma.hbm_to_vmem [thread:$0]  (!%p5978_p5), %s888_s28, 10240, %s890_s15, [#allocation7], %s5760_s10, %s5760_s10, %s5761_s1  }
  0x7d   : > { %916 = sbr.rel (%p5969_p3) target bundleno = 6599 (0x19c7), region = 144 }
  0x82   : > { %5706 = dma.done.wait (%p5469_p2), [#allocation4], 16  }
  0x83   : > { %5708 = vsyncadd (%p5469_p2), [#allocation4], 4294967280 }
  0x84   : > { %5710 = dma.done.wait (%p5469_p2), [#allocation3], 16384  }
  0x85   : > { %5712 = vsyncadd (%p5469_p2), [#allocation3], 4294950912 }
  0x86   : > { %5714 = dma.done.wait (%p5469_p2), [#allocation7], 27136  }
  0x87   : > { %5716 = vsyncadd (%p5469_p2), [#allocation7], 4294940160 }
  0x88   : > { %938 = sfence }
  0x89   : > { %v1086_v0 = vld [vmem:[#allocation5 + $0x1e0] sm:$0xff]  ;;  %v1087_v2 = vld [vmem:[#allocation5 + $0x1e8] sm:$0xff]  ;;  %p1013_p2 = scmp.lt.s32.totalorder %s5964_s0, 1  ;;  %s5762_s20 = smov 62   ;;  %vm1329_vm0 = vcmask 867328   ;;  %vm1354_vm1 = vcmask 687104  }
  0x8a   : > { %v1150_v1 = vld [vmem:[#allocation5 + $0x3e0] sm:$0xff]  ;;  %1154 = vmatpush.msra.mxu0 %v1086_v0  ;;  %v1151_v3 = vld [vmem:[#allocation5 + $0x3e8] sm:$0xff]  ;;  %1194 = vmatpush.msra.mxu2 %v1087_v2  ;;  %v1088_v2 = vld [vmem:[#allocation5 + $0x1f0] sm:$0xff]  ;;  %s5763_s22 = smov 106   ;;  %s5764_s2 = smov 40   ;;  %vm1376_vm2 = vcmask 506880  }
  0x8b   : > { %1174 = vmatpush.msra.mxu1 %v1150_v1  ;;  %v1082_v4 = vld [vmem:[#allocation5 + $0x1c0] sm:$0xff]  ;;  %1214 = vmatpush.msra.mxu3 %v1151_v3  ;;  %v1083_v6 = vld [vmem:[#allocation5 + $0x1c8] sm:$0xff]  ;;  %s6703_s0 = smov (!%p1013_p2, %s5964_s0), 1  ;;  %v1152_v3 = vld [vmem:[#allocation5 + $0x3f0] sm:$0xff]  ;;  %s5765_s28 = smov 84   ;;  %vm1394_vm3 = vcmask 326656  }
  0x8c   : > { %v1146_v5 = vld [vmem:[#allocation5 + $0x3c0] sm:$0xff]  ;;  %v1147_v7 = vld [vmem:[#allocation5 + $0x3c8] sm:$0xff]  ;;  %1155 = vmatpush.msra.mxu0 %v1082_v4  ;;  %1195 = vmatpush.msra.mxu2 %v1083_v6  ;;  %s5373_s26 = sshll.u32 %s6703_s0, 4  ;;  %v1089_v4 = vld [vmem:[#allocation5 + $0x1f8] sm:$0xff]  ;;  %s5766_s11 = smov 18   ;;  %vm1414_vm4 = vcmask 146432  }
  0x8d   : > { %v1078_v8 = vld [vmem:[#allocation5 + $0x1a0] sm:$0xff]  ;;  %1175 = vmatpush.msra.mxu1 %v1146_v5  ;;  %v1079_v10 = vld [vmem:[#allocation5 + $0x1a8] sm:$0xff]  ;;  %1215 = vmatpush.msra.mxu3 %v1147_v7  ;;  %s1017_s7 = scalar_lea.vmem %s5798_s5, %s5373_s26  ;;  %v1153_v5 = vld [vmem:[#allocation5 + $0x3f8] sm:$0xff]  ;;  %s5767_s15 = smov 124   ;;  %vm1434_vm5 = vcmask 1014784   ;;  %vm1458_vm6 = vcmask 1039360  }
  0x8e   : > { %v1142_v9 = vld [vmem:[#allocation5 + $0x3a0] sm:$0xff]  ;;  %v1143_v11 = vld [vmem:[#allocation5 + $0x3a8] sm:$0xff]  ;;  %1156 = vmatpush.msra.mxu0 %v1078_v8  ;;  %1196 = vmatpush.msra.mxu2 %v1079_v10  ;;  %v1084_v6 = vld [vmem:[#allocation5 + $0x1d0] sm:$0xff]  ;;  %s5768_s23 = smov 127   ;;  %s5769_s16 = smov 126   ;;  %vm1479_vm7 = vcmask 1031168  }
  0x8f   : > { %v1074_v12 = vld [vmem:[#allocation5 + $0x180] sm:$0xff]  ;;  %1176 = vmatpush.msra.mxu1 %v1142_v9  ;;  %v1075_v14 = vld [vmem:[#allocation5 + $0x188] sm:$0xff]  ;;  %1216 = vmatpush.msra.mxu3 %v1143_v11  ;;  %v1148_v7 = vld [vmem:[#allocation5 + $0x3d0] sm:$0xff]  ;;  %s5770_s18 = smov 125   ;;  %s5771_s10 = smov 123   ;;  %vm1500_vm8 = vcmask 1022976  }
  0x90   : > { %v1138_v13 = vld [vmem:[#allocation5 + $0x380] sm:$0xff]  ;;  %v1139_v15 = vld [vmem:[#allocation5 + $0x388] sm:$0xff]  ;;  %1157 = vmatpush.msra.mxu0 %v1074_v12  ;;  %1197 = vmatpush.msra.mxu2 %v1075_v14  ;;  %v1085_v8 = vld [vmem:[#allocation5 + $0x1d8] sm:$0xff]  ;;  %s6657_s1 = smov 122   ;;  %s5773_s26 = smov 59   ;;  %vm1636_vm9 = vcmask 482304  }
  0x91   : > { %v1070_v16 = vld [vmem:[#allocation5 + $0x160] sm:$0xff]  ;;  %1177 = vmatpush.msra.mxu1 %v1138_v13  ;;  %v1071_v18 = vld [vmem:[#allocation5 + $0x168] sm:$0xff]  ;;  %1217 = vmatpush.msra.mxu3 %v1139_v15  ;;  %v1149_v9 = vld [vmem:[#allocation5 + $0x3d8] sm:$0xff]  ;;  %vm1529_vm10 = vcmask 1006592   ;;  %vm1547_vm11 = vcmask 998400   ;;  %vm1579_vm15 = vcmask 785408  }
  0x92   : > { %v1134_v17 = vld [vmem:[#allocation5 + $0x360] sm:$0xff]  ;;  %v1135_v19 = vld [vmem:[#allocation5 + $0x368] sm:$0xff]  ;;  %1158 = vmatpush.msra.mxu0 %v1070_v16  ;;  %1198 = vmatpush.msra.mxu2 %v1071_v18  ;;  %v1080_v10 = vld [vmem:[#allocation5 + $0x1b0] sm:$0xff] }
  0x93   : > { %v1066_v20 = vld [vmem:[#allocation5 + $0x140] sm:$0xff]  ;;  %1178 = vmatpush.msra.mxu1 %v1134_v17  ;;  %v1067_v22 = vld [vmem:[#allocation5 + $0x148] sm:$0xff]  ;;  %1218 = vmatpush.msra.mxu3 %v1135_v19  ;;  %v1144_v11 = vld [vmem:[#allocation5 + $0x3b0] sm:$0xff] }
  0x94   : > { %v1130_v21 = vld [vmem:[#allocation5 + $0x340] sm:$0xff]  ;;  %v1131_v23 = vld [vmem:[#allocation5 + $0x348] sm:$0xff]  ;;  %1159 = vmatpush.msra.mxu0 %v1066_v20  ;;  %1199 = vmatpush.msra.mxu2 %v1067_v22  ;;  %v1081_v12 = vld [vmem:[#allocation5 + $0x1b8] sm:$0xff] }
  0x95   : > { %v1062_v24 = vld [vmem:[#allocation5 + $0x120] sm:$0xff]  ;;  %1179 = vmatpush.msra.mxu1 %v1130_v21  ;;  %v1063_v26 = vld [vmem:[#allocation5 + $0x128] sm:$0xff]  ;;  %1219 = vmatpush.msra.mxu3 %v1131_v23  ;;  %v1145_v13 = vld [vmem:[#allocation5 + $0x3b8] sm:$0xff] }
  0x96   : > { %v1126_v25 = vld [vmem:[#allocation5 + $0x320] sm:$0xff]  ;;  %v1127_v27 = vld [vmem:[#allocation5 + $0x328] sm:$0xff]  ;;  %1160 = vmatpush.msra.mxu0 %v1062_v24  ;;  %1200 = vmatpush.msra.mxu2 %v1063_v26  ;;  %v1076_v14 = vld [vmem:[#allocation5 + $0x190] sm:$0xff] }
  0x97   : > { %v1058_v28 = vld [vmem:[#allocation5 + $0x100] sm:$0xff]  ;;  %1180 = vmatpush.msra.mxu1 %v1126_v25  ;;  %v1059_v30 = vld [vmem:[#allocation5 + $0x108] sm:$0xff]  ;;  %1220 = vmatpush.msra.mxu3 %v1127_v27  ;;  %v1140_v15 = vld [vmem:[#allocation5 + $0x390] sm:$0xff] }
  0x98   : > { %v1122_v29 = vld [vmem:[#allocation5 + $0x300] sm:$0xff]  ;;  %v1123_v31 = vld [vmem:[#allocation5 + $0x308] sm:$0xff]  ;;  %1161 = vmatpush.msra.mxu0 %v1058_v28  ;;  %1201 = vmatpush.msra.mxu2 %v1059_v30  ;;  %v1077_v16 = vld [vmem:[#allocation5 + $0x198] sm:$0xff] }
  0x99   : > { %v1054_v32 = vld [vmem:[#allocation5 + $0xe0] sm:$0xff]  ;;  %1181 = vmatpush.msra.mxu1 %v1122_v29  ;;  %v1055_v34 = vld [vmem:[#allocation5 + $0xe8] sm:$0xff]  ;;  %1221 = vmatpush.msra.mxu3 %v1123_v31  ;;  %v1141_v17 = vld [vmem:[#allocation5 + $0x398] sm:$0xff] }
  0x9a   : > { %v1118_v33 = vld [vmem:[#allocation5 + $0x2e0] sm:$0xff]  ;;  %v1119_v35 = vld [vmem:[#allocation5 + $0x2e8] sm:$0xff]  ;;  %1162 = vmatpush.msra.mxu0 %v1054_v32  ;;  %1202 = vmatpush.msra.mxu2 %v1055_v34  ;;  %v1072_v18 = vld [vmem:[#allocation5 + $0x170] sm:$0xff] }
  0x9b   : > { %v1050_v36 = vld [vmem:[#allocation5 + $0xc0] sm:$0xff]  ;;  %1182 = vmatpush.msra.mxu1 %v1118_v33  ;;  %v1051_v38 = vld [vmem:[#allocation5 + $0xc8] sm:$0xff]  ;;  %1222 = vmatpush.msra.mxu3 %v1119_v35  ;;  %v1136_v19 = vld [vmem:[#allocation5 + $0x370] sm:$0xff] }
  0x9c   : > { %v1114_v37 = vld [vmem:[#allocation5 + $0x2c0] sm:$0xff]  ;;  %v1115_v39 = vld [vmem:[#allocation5 + $0x2c8] sm:$0xff]  ;;  %1163 = vmatpush.msra.mxu0 %v1050_v36  ;;  %1203 = vmatpush.msra.mxu2 %v1051_v38  ;;  %v1073_v20 = vld [vmem:[#allocation5 + $0x178] sm:$0xff] }
  0x9d   : > { %v1046_v40 = vld [vmem:[#allocation5 + $0xa0] sm:$0xff]  ;;  %1183 = vmatpush.msra.mxu1 %v1114_v37  ;;  %v1047_v42 = vld [vmem:[#allocation5 + $0xa8] sm:$0xff]  ;;  %1223 = vmatpush.msra.mxu3 %v1115_v39  ;;  %v1137_v21 = vld [vmem:[#allocation5 + $0x378] sm:$0xff] }
  0x9e   : > { %v1110_v41 = vld [vmem:[#allocation5 + $0x2a0] sm:$0xff]  ;;  %v1111_v43 = vld [vmem:[#allocation5 + $0x2a8] sm:$0xff]  ;;  %1164 = vmatpush.msra.mxu0 %v1046_v40  ;;  %1204 = vmatpush.msra.mxu2 %v1047_v42  ;;  %v1068_v22 = vld [vmem:[#allocation5 + $0x150] sm:$0xff] }
  0x9f   : > { %v1042_v44 = vld [vmem:[#allocation5 + $0x80] sm:$0xff]  ;;  %1184 = vmatpush.msra.mxu1 %v1110_v41  ;;  %v1043_v46 = vld [vmem:[#allocation5 + $0x88] sm:$0xff]  ;;  %1224 = vmatpush.msra.mxu3 %v1111_v43  ;;  %v1132_v23 = vld [vmem:[#allocation5 + $0x350] sm:$0xff] }
  0xa0   : > { %v1106_v45 = vld [vmem:[#allocation5 + $0x280] sm:$0xff]  ;;  %v1107_v47 = vld [vmem:[#allocation5 + $0x288] sm:$0xff]  ;;  %1165 = vmatpush.msra.mxu0 %v1042_v44  ;;  %1205 = vmatpush.msra.mxu2 %v1043_v46  ;;  %v1069_v24 = vld [vmem:[#allocation5 + $0x158] sm:$0xff] }
  0xa1   : > { %v1038_v48 = vld [vmem:[#allocation5 + $0x60] sm:$0xff]  ;;  %1185 = vmatpush.msra.mxu1 %v1106_v45  ;;  %v1039_v50 = vld [vmem:[#allocation5 + $0x68] sm:$0xff]  ;;  %1225 = vmatpush.msra.mxu3 %v1107_v47  ;;  %v1133_v25 = vld [vmem:[#allocation5 + $0x358] sm:$0xff] }
  0xa2   : > { %v1102_v49 = vld [vmem:[#allocation5 + $0x260] sm:$0xff]  ;;  %v1103_v51 = vld [vmem:[#allocation5 + $0x268] sm:$0xff]  ;;  %1166 = vmatpush.msra.mxu0 %v1038_v48  ;;  %1206 = vmatpush.msra.mxu2 %v1039_v50  ;;  %v1064_v26 = vld [vmem:[#allocation5 + $0x130] sm:$0xff] }
  0xa3   : > { %v1034_v52 = vld [vmem:[#allocation5 + $0x40] sm:$0xff]  ;;  %1186 = vmatpush.msra.mxu1 %v1102_v49  ;;  %v1035_v54 = vld [vmem:[#allocation5 + $0x48] sm:$0xff]  ;;  %1226 = vmatpush.msra.mxu3 %v1103_v51  ;;  %v1128_v27 = vld [vmem:[#allocation5 + $0x330] sm:$0xff] }
  0xa4   : > { %v1098_v53 = vld [vmem:[#allocation5 + $0x240] sm:$0xff]  ;;  %v1099_v55 = vld [vmem:[#allocation5 + $0x248] sm:$0xff]  ;;  %1167 = vmatpush.msra.mxu0 %v1034_v52  ;;  %1207 = vmatpush.msra.mxu2 %v1035_v54  ;;  %v1065_v28 = vld [vmem:[#allocation5 + $0x138] sm:$0xff] }
  0xa5   : > { %v1030_v56 = vld [vmem:[#allocation5 + $0x20] sm:$0xff]  ;;  %1187 = vmatpush.msra.mxu1 %v1098_v53  ;;  %v1031_v58 = vld [vmem:[#allocation5 + $0x28] sm:$0xff]  ;;  %1227 = vmatpush.msra.mxu3 %v1099_v55  ;;  %v1129_v29 = vld [vmem:[#allocation5 + $0x338] sm:$0xff] }
  0xa6   : > { %v1094_v57 = vld [vmem:[#allocation5 + $0x220] sm:$0xff]  ;;  %v1095_v59 = vld [vmem:[#allocation5 + $0x228] sm:$0xff]  ;;  %1168 = vmatpush.msra.mxu0 %v1030_v56  ;;  %1208 = vmatpush.msra.mxu2 %v1031_v58  ;;  %v1060_v30 = vld [vmem:[#allocation5 + $0x110] sm:$0xff] }
  0xa7   : > { %v1026_v60 = vld [vmem:[#allocation5] sm:$0xff]  ;;  %1188 = vmatpush.msra.mxu1 %v1094_v57  ;;  %v1027_v62 = vld [vmem:[#allocation5 + $0x8] sm:$0xff]  ;;  %1228 = vmatpush.msra.mxu3 %v1095_v59  ;;  %v1124_v31 = vld [vmem:[#allocation5 + $0x310] sm:$0xff] }
  0xa8   : > { %v1090_v61 = vld [vmem:[#allocation5 + $0x200] sm:$0xff]  ;;  %v1091_v63 = vld [vmem:[#allocation5 + $0x208] sm:$0xff]  ;;  %1169 = vmatpush.msra.mxu0 %v1026_v60  ;;  %1209 = vmatpush.msra.mxu2 %v1027_v62  ;;  %v1061_v32 = vld [vmem:[#allocation5 + $0x118] sm:$0xff] }
  0xa9   : > { %v6046_v0 = vld [vmem:[%s1017_s7] sm:$0xff]  ;;  %v6048_v1 = vld [vmem:[%s1017_s7 + $0x8] sm:$0xff]  ;;  %1189 = vmatpush.msra.mxu1 %v1090_v61  ;;  %1229 = vmatpush.msra.mxu3 %v1091_v63  ;;  %v1125_v33 = vld [vmem:[#allocation5 + $0x318] sm:$0xff]  ;;  %s1556_s7 = sld [smem:[#allocation2]] }
  0xaa   : > { %1170 = vmatmul.f32.vlgmr.msra.gmra.mxu0 %v6046_v0  ;;  %1190 = vmatmul.f32.vlgmr.msra.gmra.mxu1 %v6048_v1  ;;  %v1056_v34 = vld [vmem:[#allocation5 + $0xf0] sm:$0xff]  ;;  %v1057_v36 = vld [vmem:[#allocation5 + $0xf8] sm:$0xff] }
  0xab   : > { %1210 = vmatmul.f32.vlgmr.msra.gmra.mxu2 %v6046_v0  ;;  %1230 = vmatmul.f32.vlgmr.msra.gmra.mxu3 %v6048_v1  ;;  %v1120_v35 = vld [vmem:[#allocation5 + $0x2f0] sm:$0xff]  ;;  %v1121_v37 = vld [vmem:[#allocation5 + $0x2f8] sm:$0xff] }
  0xac   : > { %1234 = vmatpush.msrb.mxu0 %v1088_v2  ;;  %1254 = vmatpush.msrb.mxu1 %v1152_v3  ;;  %v1052_v38 = vld [vmem:[#allocation5 + $0xd0] sm:$0xff]  ;;  %v1053_v40 = vld [vmem:[#allocation5 + $0xd8] sm:$0xff] }
  0xad   : > { %1274 = vmatpush.msrb.mxu2 %v1089_v4  ;;  %1294 = vmatpush.msrb.mxu3 %v1153_v5  ;;  %v1116_v39 = vld [vmem:[#allocation5 + $0x2d0] sm:$0xff]  ;;  %v1117_v41 = vld [vmem:[#allocation5 + $0x2d8] sm:$0xff] }
  0xae   : > { %1235 = vmatpush.msrb.mxu0 %v1084_v6  ;;  %1255 = vmatpush.msrb.mxu1 %v1148_v7  ;;  %v1048_v42 = vld [vmem:[#allocation5 + $0xb0] sm:$0xff]  ;;  %v1049_v44 = vld [vmem:[#allocation5 + $0xb8] sm:$0xff] }
  0xaf   : > { %1275 = vmatpush.msrb.mxu2 %v1085_v8  ;;  %1295 = vmatpush.msrb.mxu3 %v1149_v9  ;;  %v1112_v43 = vld [vmem:[#allocation5 + $0x2b0] sm:$0xff]  ;;  %v1113_v45 = vld [vmem:[#allocation5 + $0x2b8] sm:$0xff] }
  0xb0   : > { %1236 = vmatpush.msrb.mxu0 %v1080_v10  ;;  %1256 = vmatpush.msrb.mxu1 %v1144_v11  ;;  %v1044_v46 = vld [vmem:[#allocation5 + $0x90] sm:$0xff]  ;;  %v1045_v48 = vld [vmem:[#allocation5 + $0x98] sm:$0xff] }
  0xb1   : > { %1276 = vmatpush.msrb.mxu2 %v1081_v12  ;;  %1296 = vmatpush.msrb.mxu3 %v1145_v13  ;;  %v1108_v47 = vld [vmem:[#allocation5 + $0x290] sm:$0xff]  ;;  %v1109_v49 = vld [vmem:[#allocation5 + $0x298] sm:$0xff] }
  0xb2   : > { %1237 = vmatpush.msrb.mxu0 %v1076_v14  ;;  %1257 = vmatpush.msrb.mxu1 %v1140_v15  ;;  %v1040_v50 = vld [vmem:[#allocation5 + $0x70] sm:$0xff]  ;;  %v1041_v52 = vld [vmem:[#allocation5 + $0x78] sm:$0xff] }
  0xb3   : > { %1277 = vmatpush.msrb.mxu2 %v1077_v16  ;;  %1297 = vmatpush.msrb.mxu3 %v1141_v17  ;;  %v1104_v51 = vld [vmem:[#allocation5 + $0x270] sm:$0xff]  ;;  %v1105_v53 = vld [vmem:[#allocation5 + $0x278] sm:$0xff] }
  0xb4   : > { %1238 = vmatpush.msrb.mxu0 %v1072_v18  ;;  %1258 = vmatpush.msrb.mxu1 %v1136_v19  ;;  %v1036_v54 = vld [vmem:[#allocation5 + $0x50] sm:$0xff]  ;;  %v1037_v56 = vld [vmem:[#allocation5 + $0x58] sm:$0xff] }
  0xb5   : > { %1278 = vmatpush.msrb.mxu2 %v1073_v20  ;;  %1298 = vmatpush.msrb.mxu3 %v1137_v21  ;;  %v1100_v55 = vld [vmem:[#allocation5 + $0x250] sm:$0xff]  ;;  %v1101_v57 = vld [vmem:[#allocation5 + $0x258] sm:$0xff] }
  0xb6   : > { %1239 = vmatpush.msrb.mxu0 %v1068_v22  ;;  %1259 = vmatpush.msrb.mxu1 %v1132_v23  ;;  %v1032_v58 = vld [vmem:[#allocation5 + $0x30] sm:$0xff]  ;;  %v1033_v60 = vld [vmem:[#allocation5 + $0x38] sm:$0xff] }
  0xb7   : > { %1279 = vmatpush.msrb.mxu2 %v1069_v24  ;;  %1299 = vmatpush.msrb.mxu3 %v1133_v25  ;;  %v1096_v59 = vld [vmem:[#allocation5 + $0x230] sm:$0xff]  ;;  %v1097_v61 = vld [vmem:[#allocation5 + $0x238] sm:$0xff] }
  0xb8   : > { %1240 = vmatpush.msrb.mxu0 %v1064_v26  ;;  %1260 = vmatpush.msrb.mxu1 %v1128_v27  ;;  %v1028_v62 = vld [vmem:[#allocation5 + $0x10] sm:$0xff]  ;;  %v1029_v2 = vld [vmem:[#allocation5 + $0x18] sm:$0xff] }
  0xb9   : > { %1280 = vmatpush.msrb.mxu2 %v1065_v28  ;;  %1300 = vmatpush.msrb.mxu3 %v1129_v29  ;;  %v1092_v63 = vld [vmem:[#allocation5 + $0x210] sm:$0xff]  ;;  %v1093_v3 = vld [vmem:[#allocation5 + $0x218] sm:$0xff] }
  0xba   : > { %1241 = vmatpush.msrb.mxu0 %v1060_v30  ;;  %1261 = vmatpush.msrb.mxu1 %v1124_v31 }
  0xbb   : > { %1281 = vmatpush.msrb.mxu2 %v1061_v32  ;;  %1301 = vmatpush.msrb.mxu3 %v1125_v33 }
  0xbc   : > { %1242 = vmatpush.msrb.mxu0 %v1056_v34  ;;  %1262 = vmatpush.msrb.mxu1 %v1120_v35 }
  0xbd   : > { %1282 = vmatpush.msrb.mxu2 %v1057_v36  ;;  %1302 = vmatpush.msrb.mxu3 %v1121_v37 }
  0xbe   : > { %1243 = vmatpush.msrb.mxu0 %v1052_v38  ;;  %1263 = vmatpush.msrb.mxu1 %v1116_v39 }
  0xbf   : > { %1283 = vmatpush.msrb.mxu2 %v1053_v40  ;;  %1303 = vmatpush.msrb.mxu3 %v1117_v41 }
  0xc0   : > { %1244 = vmatpush.msrb.mxu0 %v1048_v42  ;;  %1264 = vmatpush.msrb.mxu1 %v1112_v43 }
  0xc1   : > { %1284 = vmatpush.msrb.mxu2 %v1049_v44  ;;  %1304 = vmatpush.msrb.mxu3 %v1113_v45 }
  0xc2   : > { %1245 = vmatpush.msrb.mxu0 %v1044_v46  ;;  %1265 = vmatpush.msrb.mxu1 %v1108_v47 }
  0xc3   : > { %1285 = vmatpush.msrb.mxu2 %v1045_v48  ;;  %1305 = vmatpush.msrb.mxu3 %v1109_v49 }
  0xc4   : > { %1246 = vmatpush.msrb.mxu0 %v1040_v50  ;;  %1266 = vmatpush.msrb.mxu1 %v1104_v51 }
  0xc5   : > { %1286 = vmatpush.msrb.mxu2 %v1041_v52  ;;  %1306 = vmatpush.msrb.mxu3 %v1105_v53 }
  0xc6   : > { %1247 = vmatpush.msrb.mxu0 %v1036_v54  ;;  %1267 = vmatpush.msrb.mxu1 %v1100_v55 }
  0xc7   : > { %1287 = vmatpush.msrb.mxu2 %v1037_v56  ;;  %1307 = vmatpush.msrb.mxu3 %v1101_v57 }
  0xc8   : > { %1248 = vmatpush.msrb.mxu0 %v1032_v58  ;;  %1268 = vmatpush.msrb.mxu1 %v1096_v59 }
  0xc9   : > { %1288 = vmatpush.msrb.mxu2 %v1033_v60  ;;  %1308 = vmatpush.msrb.mxu3 %v1097_v61 }
  0xca   : > { %1249 = vmatpush.msrb.mxu0 %v1028_v62  ;;  %1269 = vmatpush.msrb.mxu1 %v1092_v63 }
  0xcb   : > { %1289 = vmatpush.msrb.mxu2 %v1029_v2  ;;  %1309 = vmatpush.msrb.mxu3 %v1093_v3 }
  0xcc   : > { %1250 = vmatmul.f32.vlgmr.msrb.gmra.mxu0 %v6046_v0  ;;  %1270 = vmatmul.f32.vlgmr.msrb.gmra.mxu1 %v6048_v1 }
  0xcd   : > { %1290 = vmatmul.f32.vlgmr.msrb.gmra.mxu2 %v6046_v0  ;;  %1310 = vmatmul.f32.vlgmr.msrb.gmra.mxu3 %v6048_v1 }
 0x127   : > { %v1171_v4 = vpop.f32.mrf.mxu0  ;;  %v1191_v5 = vpop.f32.mrf.mxu1 }
 0x128   : > { %v6058_v6 = vadd.f32 %v1191_v5, %v1171_v4 }
 0x12a   : > { %1368 = vrot.lane.b32.xlu1 %v6058_v6, %s5762_s20  ;;  %v1317_v7 = vmul.f32 0.00033546262, %v6058_v6  ;;  %v1338_v8 = vmul.f32 0.13533528, %v6058_v6  ;;  %v1314_v42 = vmul.f32 1.5229979e-08, %v6058_v6 }
 0x12c   : > { %1323 = vrot.lane.b32.xlu0 %v1317_v7, %s5763_s22  ;;  %1386 = vrot.lane.b32.xlu2 %v1338_v8, %s5764_s2 }
 0x12e   : > { %v1211_v0 = vpop.f32.mrf.mxu2  ;;  %v1231_v1 = vpop.f32.mrf.mxu3 }
 0x12f   : > { %v6066_v9 = vadd.f32 %v1231_v1, %v1211_v0 }
 0x131   : > { %v5554_v10 = vpack.i.bf16 %v6066_v9, %v6058_v6  ;;  %v1318_v11 = vmul.f32 0.00033546262, %v6066_v9  ;;  %v1339_v12 = vmul.f32 0.13533528, %v6066_v9  ;;  %v1315_v25 = vmul.f32 1.5229979e-08, %v6066_v9 }
 0x132   : > { %1346 = vrot.lane.b32.xlu1 %v1338_v8, %s5765_s28 }
 0x134   : > { %1406 = vrot.lane.b32.xlu0 %v1317_v7, %s5766_s11  ;;  %1370 = vrot.lane.b32.xlu2 %v6066_v9, %s5762_s20 }
 0x13a   : > { %1408 = vrot.lane.b32.xlu1 %v1318_v11, %s5766_s11 }
 0x13c   : > { %1325 = vrot.lane.b32.xlu0 %v1318_v11, %s5763_s22  ;;  %1348 = vrot.lane.b32.xlu2 %v1339_v12, %s5765_s28 }
 0x149   : > { %v1251_v13 = vpop.f32.mrf.mxu0  ;;  %v1271_v14 = vpop.f32.mrf.mxu1 }
 0x14a   : > { %v6075_v15 = vadd.f32 %v1271_v14, %v1251_v13 }
 0x14c   : > { %1372 = vrot.lane.b32.xlu0 %v6075_v15, %s5762_s20  ;;  %v1340_v16 = vmul.f32 0.13533528, %v6075_v15  ;;  %v1319_v17 = vmul.f32 0.00033546262, %v6075_v15  ;;  %v1316_v24 = vmul.f32 1.5229979e-08, %v6075_v15 }
 0x14e   : > { %1350 = vrot.lane.b32.xlu2 %v1340_v16, %s5765_s28  ;;  %1327 = vrot.lane.b32.xlu1 %v1319_v17, %s5763_s22 }
 0x150   : > { %v1291_v18 = vpop.f32.mrf.mxu2  ;;  %v1311_v19 = vpop.f32.mrf.mxu3 }
 0x151   : > { %v6082_v20 = vadd.f32 %v1311_v19, %v1291_v18 }
 0x153   : > { %v5560_v21 = vpack.i.bf16 %v6082_v20, %v6075_v15  ;;  %v1341_v22 = vmul.f32 0.13533528, %v6082_v20  ;;  %v1404_v23 = vmul.f32 0.00033546262, %v6082_v20  ;;  %v1424_v26 = vmul.f32 1.5229979e-08, %v6082_v20 }
 0x154   : > { %1388 = vrot.lane.b32.xlu0 %v1339_v12, %s5764_s2 }
 0x156   : > { %1410 = vrot.lane.b32.xlu2 %v1319_v17, %s5766_s11  ;;  %1390 = vrot.lane.b32.xlu1 %v1340_v16, %s5764_s2 }
 0x15c   : > { %1352 = vrot.lane.b32.xlu0 %v1341_v22, %s5765_s28  ;;  %s5776_s28 = smov 109  }
 0x15e   : > { %1392 = vrot.lane.b32.xlu2 %v1341_v22, %s5764_s2  ;;  %1374 = vrot.lane.b32.xlu1 %v6082_v20, %s5762_s20  ;;  %s4982_s20 = sld [smem:[#allocation2 + $0x1]]  ;;  %s5775_s2 = smov 110  }
 0x164   : > { %1412 = vrot.lane.b32.xlu0 %v1404_v23, %s5766_s11  ;;  %s5777_s11 = smov 108  }
 0x166   : > { %1430 = vrot.lane.b32.xlu2 %v1316_v24, %s5767_s15  ;;  %1428 = vrot.lane.b32.xlu1 %v1315_v25, %s5767_s15 }
 0x16c   : > { %1432 = vrot.lane.b32.xlu0 %v1424_v26, %s5767_s15 }
 0x186   : > { %v1387_v27 = vpop.permute.xlu2 %1386 }
 0x18e   : > { %v1371_v30 = vpop.permute.xlu2 %1370 }
 0x196   : > { %v1349_v33 = vpop.permute.xlu2 %1348 }
 0x19c   : > { %v1369_v29 = vpop.permute.xlu1 %1368 }
 0x19d   : > { %v1377_v53 = vsel %vm1376_vm2, %v1369_v29, %v1371_v30 }
 0x19e   : > { %v1324_v28 = vpop.permute.xlu0 %1323 }
 0x1a4   : > { %v1347_v32 = vpop.permute.xlu1 %1346 }
 0x1a5   : > { %v1355_v45 = vsel %vm1354_vm1, %v1347_v32, %v1349_v33 }
 0x1a6   : > { %v1407_v31 = vpop.permute.xlu0 %1406 }
 0x1a8   : > { %v1351_v36 = vpop.permute.xlu2 %1350 }
 0x1a9   : > { %v1356_v57 = vsel %vm1354_vm1, %v1349_v33, %v1351_v36 }
 0x1ac   : > { %v1409_v35 = vpop.permute.xlu1 %1408 }
 0x1ad   : > { %v1415_v63 = vsel %vm1414_vm4, %v1407_v31, %v1409_v35 }
 0x1ae   : > { %v1326_v34 = vpop.permute.xlu0 %1325 }
 0x1af   : > { %v1330_v41 = vsel %vm1329_vm0, %v1324_v28, %v1326_v34 }
 0x1b0   : > { %v1411_v39 = vpop.permute.xlu2 %1410  ;;  %v1335_v44 = vadd.f32 %v1330_v41, %v1314_v42 }
 0x1b1   : > { %v1416_v18 = vsel %vm1414_vm4, %v1409_v35, %v1411_v39 }
 0x1b2   : > { %v1361_v47 = vadd.f32 %v1355_v45, %v1335_v44 }
 0x1b4   : > { %v1383_v56 = vadd.f32 %v1377_v53, %v1361_v47 }
 0x1b8   : > { %v1393_v48 = vpop.permute.xlu2 %1392 }
 0x1be   : > { %v1373_v37 = vpop.permute.xlu0 %1372 }
 0x1bf   : > { %v1378_v2 = vsel %vm1376_vm2, %v1371_v30, %v1373_v37 }
 0x1c0   : > { %v1328_v38 = vpop.permute.xlu1 %1327  ;;  %v1431_v5 = vpop.permute.xlu2 %1430 }
 0x1c1   : > { %v1331_v46 = vsel %vm1329_vm0, %v1326_v34, %v1328_v38  ;;  %v1337_v54 = vadd.f32 %v1328_v38, %v1316_v24  ;;  %vm1587_vm0 = vcmask 7168  }
 0x1c2   : > { %v1336_v50 = vadd.f32 %v1331_v46, %v1315_v25 }
 0x1c4   : > { %v1362_v59 = vadd.f32 %v1356_v57, %v1336_v50 }
 0x1c6   : > { %v1389_v40 = vpop.permute.xlu0 %1388  ;;  %v1384_v7 = vadd.f32 %v1378_v2, %v1362_v59 }
 0x1c7   : > { %v1395_v55 = vsel %vm1394_vm3, %v1387_v27, %v1389_v40 }
 0x1c8   : > { %v1391_v43 = vpop.permute.xlu1 %1390  ;;  %v1401_v60 = vadd.f32 %v1395_v55, %v1383_v56 }
 0x1c9   : > { %v1396_v3 = vsel %vm1394_vm3, %v1389_v40, %v1391_v43  ;;  %v1397_v11 = vsel %vm1394_vm3, %v1391_v43, %v1393_v48 }
 0x1ca   : > { %v1421_v0 = vadd.f32 %v1415_v63, %v1401_v60  ;;  %v1402_v12 = vadd.f32 %v1396_v3, %v1384_v7 }
 0x1cc   : > { %v1422_v22 = vadd.f32 %v1416_v18, %v1402_v12 }
 0x1ce   : > { %v1353_v49 = vpop.permute.xlu0 %1352 }
 0x1cf   : > { %v1357_v51 = vsel %vm1354_vm1, %v1351_v36, %v1353_v49  ;;  %vm1643_vm1 = vcmask 64512  }
 0x1d0   : > { %v1375_v52 = vpop.permute.xlu1 %1374  ;;  %v1363_v58 = vadd.f32 %v1357_v51, %v1337_v54 }
 0x1d1   : > { %v1379_v61 = vsel %vm1376_vm2, %v1373_v37, %v1375_v52 }
 0x1d2   : > { %v1385_v4 = vadd.f32 %v1379_v61, %v1363_v58 }
 0x1d4   : > { %v1403_v16 = vadd.f32 %v1397_v11, %v1385_v4 }
 0x1d6   : > { %v1413_v62 = vpop.permute.xlu0 %1412 }
 0x1d7   : > { %v1417_v13 = vsel %vm1414_vm4, %v1411_v39, %v1413_v62 }
 0x1d8   : > { %v1429_v8 = vpop.permute.xlu1 %1428  ;;  %v1423_v19 = vadd.f32 %v1417_v13, %v1403_v16 }
 0x1d9   : > { %v1435_v1 = vsel %vm1434_vm5, %v1429_v8, %v1431_v5 }
 0x1da   : > { %v1440_v14 = vadd.f32 %v1435_v1, %v1421_v0 }
 0x1dc   : > { %v1446_v17 = vmul.f32 0.0001727754, %v1440_v14  ;;  %v1467_v29 = vmul.f32 0.081940286, %v1440_v14  ;;  %v1488_v32 = vmul.f32 0.63661975, %v1440_v14 }
 0x1dd   : > { %v1443_v35 = vmul.f32 5.6989933e-09, %v1440_v14 }
 0x1de   : > { %v1433_v23 = vpop.permute.xlu0 %1432  ;;  %1452 = vrot.lane.b32.xlu1 %v1446_v17, %s5768_s23 }
 0x1df   : > { %v1436_v24 = vsel %vm1434_vm5, %v1431_v5, %v1433_v23  ;;  %v1442_v25 = vadd.f32 %v1433_v23, %v1423_v19  ;;  %v1560_v23 = vstv %s1556_s7  ;;  %s5780_s7 = smov 90  }
 0x1e0   : > { %v1441_v26 = vadd.f32 %v1436_v24, %v1422_v22 }
 0x1e1   : > { %v1448_v27 = vmul.f32 0.0001727754, %v1442_v25  ;;  %v1469_v30 = vmul.f32 0.081940286, %v1442_v25  ;;  %v1490_v33 = vmul.f32 0.63661975, %v1442_v25 }
 0x1e2   : > { %v1447_v28 = vmul.f32 0.0001727754, %v1441_v26  ;;  %v1468_v31 = vmul.f32 0.081940286, %v1441_v26  ;;  %v1489_v34 = vmul.f32 0.63661975, %v1441_v26 }
 0x1e3   : > { %1456 = vrot.lane.b32.xlu0 %v1448_v27, %s5768_s23  ;;  %v1445_v36 = vmul.f32 5.6989933e-09, %v1442_v25  ;;  %v1444_v37 = vmul.f32 5.6989933e-09, %v1441_v26 }
 0x1e4   : > { %1454 = vrot.lane.b32.xlu2 %v1447_v28, %s5768_s23 }
 0x1e6   : > { %1473 = vrot.lane.b32.xlu1 %v1467_v29, %s5769_s16 }
 0x1eb   : > { %1477 = vrot.lane.b32.xlu0 %v1469_v30, %s5769_s16 }
 0x1ec   : > { %1475 = vrot.lane.b32.xlu2 %v1468_v31, %s5769_s16 }
 0x1ee   : > { %1494 = vrot.lane.b32.xlu1 %v1488_v32, %s5770_s18 }
 0x1f3   : > { %1498 = vrot.lane.b32.xlu0 %v1490_v33, %s5770_s18 }
 0x1f4   : > { %1496 = vrot.lane.b32.xlu2 %v1489_v34, %s5770_s18  ;;  %s5778_s18 = smov 92  }
 0x1f6   : > { %1509 = vrot.lane.b32.xlu1 %v1467_v29, %s5767_s15 }
 0x1fb   : > { %1513 = vrot.lane.b32.xlu0 %v1469_v30, %s5767_s15  ;;  %v1567_v30 = vld [vmem:[%s5813_s17] sm:$0x7] }
 0x1fc   : > { %1511 = vrot.lane.b32.xlu2 %v1468_v31, %s5767_s15  ;;  %v1571_v34 = vperm.slane %v1567_v30, 2 }
 0x1fe   : > { %1523 = vrot.lane.b32.xlu1 %v1446_v17, %s5771_s10 }
 0x203   : > { %1527 = vrot.lane.b32.xlu0 %v1448_v27, %s5771_s10 }
 0x204   : > { %1525 = vrot.lane.b32.xlu2 %v1447_v28, %s5771_s10 }
 0x206   : > { %1541 = vrot.lane.b32.xlu1 %v1443_v35, %s6657_s1 }
 0x20b   : > { %1545 = vrot.lane.b32.xlu0 %v1445_v36, %s6657_s1 }
 0x20c   : > { %1543 = vrot.lane.b32.xlu2 %v1444_v37, %s6657_s1 }
 0x214   : > { %5555 = vrot.lane.b32.xlu2 %v5554_v10, %s5773_s26 }
 0x21c   : > { %5561 = vrot.lane.b32.xlu2 %v5560_v21, %s5773_s26  ;;  %s5779_s26 = smov 91  }
 0x23e   : > { %v1455_v38 = vpop.permute.xlu2 %1454 }
 0x246   : > { %v1476_v39 = vpop.permute.xlu2 %1475 }
 0x24e   : > { %v1497_v40 = vpop.permute.xlu2 %1496 }
 0x250   : > { %v1453_v41 = vpop.permute.xlu1 %1452 }
 0x251   : > { %v1459_v6 = vsel %vm1458_vm6, %v1453_v41, %v1455_v38 }
 0x252   : > { %v1464_v51 = vadd.f32 %v1459_v6, %v1443_v35  ;;  %v5774_v6 = vmov 0  }
 0x253   : > { %5559 = vset.pattern.permute.xlu0 %v5774_v6  ;;  %5565 = vset.pattern.permute.xlu2 %v5774_v6 }
 0x254   : > { %5566 = vset.pattern.permute.xlu1 %v5774_v6  ;;  %v1824_v6 = vld [vmem:[#allocation6 + $0x110] sm:$0xff] }
 0x255   : > { %v1457_v42 = vpop.permute.xlu0 %1456 }
 0x256   : > { %v1512_v43 = vpop.permute.xlu2 %1511  ;;  %v1460_v55 = vsel %vm1458_vm6, %v1455_v38, %v1457_v42  ;;  %v1466_v58 = vadd.f32 %v1457_v42, %v1445_v36  ;;  %v1569_v36 = vperm.slane %v1567_v30, 0 }
 0x257   : > { %v1465_v61 = vadd.f32 %v1460_v55, %v1444_v37  ;;  %v1570_v37 = vperm.slane %v1567_v30, 1 }
 0x258   : > { %v1474_v44 = vpop.permute.xlu1 %1473 }
 0x259   : > { %v1480_v15 = vsel %vm1479_vm7, %v1474_v44, %v1476_v39 }
 0x25a   : > { %v1485_v56 = vadd.f32 %v1480_v15, %v1464_v51 }
 0x25d   : > { %v1478_v45 = vpop.permute.xlu0 %1477 }
 0x25e   : > { %v1526_v46 = vpop.permute.xlu2 %1525  ;;  %v1481_v59 = vsel %vm1479_vm7, %v1476_v39, %v1478_v45  ;;  %v1487_v2 = vadd.f32 %v1478_v45, %v1466_v58 }
 0x25f   : > { %v1486_v7 = vadd.f32 %v1481_v59, %v1465_v61 }
 0x260   : > { %v1495_v47 = vpop.permute.xlu1 %1494 }
 0x261   : > { %v1501_v53 = vsel %vm1500_vm8, %v1495_v47, %v1497_v40 }
 0x262   : > { %v1506_v60 = vadd.f32 %v1501_v53, %v1485_v56  ;;  %v1627_v56 = vld [vmem:[%s5833_s3] sm:$0xff] }
 0x265   : > { %v1499_v48 = vpop.permute.xlu0 %1498 }
 0x266   : > { %v1544_v49 = vpop.permute.xlu2 %1543  ;;  %v1502_v3 = vsel %vm1500_vm8, %v1497_v40, %v1499_v48  ;;  %v1508_v1 = vadd.f32 %v1499_v48, %v1487_v2  ;;  %v1585_v48 = vld [vmem:[%s5818_s21] sm:$0xff] }
 0x267   : > { %v1507_v14 = vadd.f32 %v1502_v3, %v1486_v7 }
 0x268   : > { %v1510_v50 = vpop.permute.xlu1 %1509 }
 0x269   : > { %v1515_v57 = vsel %vm1434_vm5, %v1510_v50, %v1512_v43 }
 0x26a   : > { %v1520_v4 = vadd.f32 %v1515_v57, %v1506_v60 }
 0x26d   : > { %v1514_v9 = vpop.permute.xlu0 %1513 }
 0x26e   : > { %v5556_v10 = vpop.permute.xlu2 %5555  ;;  %v1516_v11 = vsel %vm1434_vm5, %v1512_v43, %v1514_v9  ;;  %v1522_v19 = vadd.f32 %v1514_v9, %v1508_v1  ;;  %v1770_v1 = vld [vmem:[%s5838_s8] sm:$0xff] }
 0x26f   : > { %v5558_v20 = vunpack.i.h.bf16 %v5556_v10  ;;  %v5557_v21 = vunpack.i.l.bf16 %v5556_v10  ;;  %v1521_v25 = vadd.f32 %v1516_v11, %v1507_v14  ;;  %1773 = vperm.xlu2 %5565, %v1770_v1   ;;  %v1919_v11 = vld [vmem:[#allocation6 + $0x408] sm:$0xff]  ;;  %v1910_v14 = vld [vmem:[#allocation6 + $0x3c0] sm:$0xff]  ;;  %v1800_v1 = vld [vmem:[#allocation6 + $0x50] sm:$0xff] }
 0x270   : > { %v1524_v52 = vpop.permute.xlu1 %1523  ;;  %1969 = vmatpush.msra.mxu0 %v1919_v11  ;;  %v1796_v11 = vld [vmem:[#allocation6 + $0x30] sm:$0xff] }
 0x271   : > { %v1637_v54 = vsel %vm1636_vm9, %v5557_v21, %v5558_v20  ;;  %v1530_v62 = vsel %vm1529_vm10, %v1524_v52, %v1526_v46 }
 0x272   : > { %1662 = vmatpush.msra.mxu2 %v1637_v54  ;;  %v1535_v12 = vadd.f32 %v1530_v62, %v1520_v4  ;;  %v1596_v54 = vld [vmem:[%s5823_s25] sm:$0xff] }
 0x273   : > { %4976 = vmatmul.msk.f32.vlgmr.msra.gmra.mxu2 %vm1643_vm1, %v1627_v56 }
 0x275   : > { %v1528_v63 = vpop.permute.xlu0 %1527 }
 0x276   : > { %v5562_v5 = vpop.permute.xlu2 %5561  ;;  %v1531_v22 = vsel %vm1529_vm10, %v1526_v46, %v1528_v63  ;;  %v1537_v26 = vadd.f32 %v1528_v63, %v1522_v19  ;;  %v1898_v19 = vld [vmem:[#allocation6 + $0x360] sm:$0xff] }
 0x277   : > { %v5564_v8 = vunpack.i.h.bf16 %v5562_v5  ;;  %v5563_v0 = vunpack.i.l.bf16 %v5562_v5  ;;  %v1536_v27 = vadd.f32 %v1531_v22, %v1521_v25  ;;  %v1895_v22 = vld [vmem:[#allocation6 + $0x348] sm:$0xff]  ;;  %v1886_v25 = vld [vmem:[#allocation6 + $0x300] sm:$0xff] }
 0x278   : > { %v1542_v13 = vpop.permute.xlu1 %1541 }
 0x279   : > { %v1548_v16 = vsel %vm1547_vm11, %v1542_v13, %v1544_v49  ;;  %v1638_v17 = vsel %vm1636_vm9, %v5558_v20, %v5563_v0  ;;  %v1639_v18 = vsel %vm1636_vm9, %v5563_v0, %v5564_v8  ;;  %v1913_v13 = vld [vmem:[#allocation6 + $0x3d8] sm:$0xff] }
 0x27a   : > { %v1553_v24 = vadd.f32 %v1548_v16, %v1535_v12  ;;  %1682 = vmatpush.msra.mxu1 %v1638_v17  ;;  %1702 = vmatpush.msrb.mxu2 %v1639_v18  ;;  %v1916_v12 = vld [vmem:[#allocation6 + $0x3f0] sm:$0xff]  ;;  %v1907_v16 = vld [vmem:[#allocation6 + $0x3a8] sm:$0xff]  ;;  %v1901_v18 = vld [vmem:[#allocation6 + $0x378] sm:$0xff] }
 0x27b   : > { %4977 = vmatmul.msk.f32.vlgmr.msra.gmra.mxu1 %vm1643_vm1, %v1627_v56  ;;  %4978 = vmatmul.msk.f32.vlgmr.msrb.gmra.mxu2 %vm1643_vm1, %v1627_v56  ;;  %v1904_v17 = vld [vmem:[#allocation6 + $0x390] sm:$0xff]  ;;  %v1815_v56 = vld [vmem:[#allocation6 + $0xc8] sm:$0xff] }
 0x27c   : > { %v1561_v28 = vmul.f32 %v1560_v23, %v1553_v24  ;;  %vm1557_vm12 = vcmp.ge.f32.partialorder %v1553_v24, 0.0  ;;  %1970 = vmatpush.msra.mxu0 %v1916_v12  ;;  %v1844_v12 = vld [vmem:[#allocation6 + $0x1b0] sm:$0xff] }
 0x27d   : > { %v1546_v29 = vpop.permute.xlu0 %1545 }
 0x27e   : > { %v1549_v31 = vsel %vm1547_vm11, %v1544_v49, %v1546_v29  ;;  %v1555_v32 = vadd.f32 %v1546_v29, %v1537_v26  ;;  %v6151_v39 = vsel %vm1557_vm12, %v1553_v24, %v1561_v28  ;;  %1971 = vmatpush.msra.mxu0 %v1913_v13  ;;  %v1889_v24 = vld [vmem:[#allocation6 + $0x318] sm:$0xff]  ;;  %v1884_v26 = vld [vmem:[#allocation6 + $0x2f0] sm:$0xff]  ;;  %vm2157_vm11 = vcmask 1043456  }
 0x27f   : > { %v1554_v33 = vadd.f32 %v1549_v31, %v1536_v27  ;;  %v1575_v43 = vmul.f32 %v1569_v36, %v6151_v39  ;;  %v1626_v31 = vld [vmem:[%s5828_s29] sm:$0xff]  ;;  %v1797_v13 = vld [vmem:[#allocation6 + $0x38] sm:$0xff]  ;;  %vm2309_vm12 = vcmask 900096  }
 0x280   : > { %v1563_v35 = vmul.f32 %v1560_v23, %v1555_v32  ;;  %vm1559_vm13 = vcmp.ge.f32.partialorder %v1555_v32, 0.0  ;;  %1972 = vmatpush.msra.mxu0 %v1910_v14  ;;  %v1878_v36 = vld [vmem:[#allocation6 + $0x2c0] sm:$0xff]  ;;  %v1793_v14 = vld [vmem:[#allocation6 + $0x18] sm:$0xff] }
 0x281   : > { %v1562_v38 = vmul.f32 %v1560_v23, %v1554_v33  ;;  %vm1558_vm14 = vcmp.ge.f32.partialorder %v1554_v33, 0.0  ;;  %v1892_v23 = vld [vmem:[#allocation6 + $0x330] sm:$0xff] }
 0x282   : > { %v6153_v40 = vsel %vm1559_vm13, %v1555_v32, %v1563_v35  ;;  %1973 = vmatpush.msra.mxu0 %v1907_v16  ;;  %v1881_v32 = vld [vmem:[#allocation6 + $0x2d8] sm:$0xff]  ;;  %v1836_v35 = vld [vmem:[#allocation6 + $0x170] sm:$0xff]  ;;  %vm2327_vm13 = vcmask 891904  }
 0x283   : > { %v6155_v41 = vsel %vm1558_vm14, %v1554_v33, %v1562_v38  ;;  %v1577_v42 = vmul.f32 %v1571_v34, %v6153_v40  ;;  %v1835_v33 = vld [vmem:[#allocation6 + $0x168] sm:$0xff]  ;;  %v1880_v38 = vld [vmem:[#allocation6 + $0x2d0] sm:$0xff]  ;;  %v1841_v16 = vld [vmem:[#allocation6 + $0x198] sm:$0xff]  ;;  %vm2345_vm14 = vcmask 883712  }
 0x284   : > { %v1576_v44 = vmul.f32 %v1570_v37, %v6155_v41  ;;  %1974 = vmatpush.msra.mxu0 %v1904_v17  ;;  %v1883_v34 = vld [vmem:[#allocation6 + $0x2e8] sm:$0xff]  ;;  %v1832_v37 = vld [vmem:[#allocation6 + $0x150] sm:$0xff]  ;;  %v1794_v17 = vld [vmem:[#allocation6 + $0x20] sm:$0xff] }
 0x285   : > { %v1580_v46 = vsel %vm1579_vm15, %v1577_v42, 0.0  ;;  %v1877_v42 = vld [vmem:[#allocation6 + $0x2b8] sm:$0xff] }
 0x286   : > { %v1578_v45 = vadd.f32 %v1576_v44, %v1575_v43  ;;  %1975 = vmatpush.msra.mxu0 %v1901_v18  ;;  %v1830_v43 = vld [vmem:[#allocation6 + $0x140] sm:$0xff]  ;;  %v1872_v44 = vld [vmem:[#allocation6 + $0x290] sm:$0xff] }
 0x287   : > { %v1790_v18 = vld [vmem:[#allocation6] sm:$0xff] }
 0x288   : > { %v1581_v47 = vadd.f32 %v1580_v46, %v1578_v45  ;;  %1976 = vmatpush.msra.mxu0 %v1898_v19  ;;  %v1826_v45 = vld [vmem:[#allocation6 + $0x120] sm:$0xff] }
 0x289   : > { %v1874_v46 = vld [vmem:[#allocation6 + $0x2a0] sm:$0xff] }
 0x28a   : > { %1582 = vadd.xlane.f32.xlu1 %v1581_v47  ;;  %1977 = vmatpush.msra.mxu0 %v1895_v22  ;;  %v1827_v47 = vld [vmem:[#allocation6 + $0x128] sm:$0xff]  ;;  %v1838_v19 = vld [vmem:[#allocation6 + $0x180] sm:$0xff] }
 0x28b   : > { %v1791_v22 = vld [vmem:[#allocation6 + $0x8] sm:$0xff] }
 0x28c   : > { %1978 = vmatpush.msra.mxu0 %v1892_v23  ;;  %v1920_v23 = vld [vmem:[#allocation6 + $0x410] sm:$0xff] }
 0x28e   : > { %1979 = vmatpush.msra.mxu0 %v1889_v24  ;;  %v1837_v24 = vld [vmem:[#allocation6 + $0x178] sm:$0xff] }
 0x290   : > { %1980 = vmatpush.msra.mxu0 %v1886_v25  ;;  %v1885_v25 = vld [vmem:[#allocation6 + $0x2f8] sm:$0xff] }
 0x292   : > { %2005 = vmatpush.msrb.mxu0 %v1884_v26  ;;  %v1917_v26 = vld [vmem:[#allocation6 + $0x3f8] sm:$0xff] }
 0x294   : > { %2006 = vmatpush.msrb.mxu0 %v1881_v32  ;;  %v1911_v32 = vld [vmem:[#allocation6 + $0x3c8] sm:$0xff] }
 0x296   : > { %2007 = vmatpush.msrb.mxu0 %v1878_v36  ;;  %v1825_v36 = vld [vmem:[#allocation6 + $0x118] sm:$0xff] }
 0x2fd   : > { %v1583_v49 = vpop.xlane.xlu1 %1582 }
 0x2fe   : > { %v1584_v50 = vmul.f32 0.00390625, %v1583_v49  ;;  %v1823_v49 = vld [vmem:[#allocation6 + $0x108] sm:$0xff] }
 0x300   : > { %v1586_v9 = vmul.f32 %v1585_v48, %v1584_v50  ;;  %v1869_v48 = vld [vmem:[#allocation6 + $0x278] sm:$0xff]  ;;  %v1871_v50 = vld [vmem:[#allocation6 + $0x288] sm:$0xff] }
 0x302   : > { %v1588_v10 = vsel %vm1587_vm0, %v1586_v9, 0.0  ;;  %v1866_v9 = vld [vmem:[#allocation6 + $0x260] sm:$0xff]  ;;  %vm2381_vm0 = vcmask 744448  }
 0x303   : > { %v1589_v15 = vrot.slane %v1588_v10, 4 }
 0x305   : > { %v1590_v20 = vadd.f32 %v1589_v15, %v1588_v10  ;;  %v1820_v10 = vld [vmem:[#allocation6 + $0xf0] sm:$0xff] }
 0x306   : > { %v1868_v15 = vld [vmem:[#allocation6 + $0x270] sm:$0xff] }
 0x307   : > { %v1591_v21 = vrot.slane %v1590_v20, 2 }
 0x309   : > { %v1592_v51 = vadd.f32 %v1591_v21, %v1590_v20  ;;  %v1821_v20 = vld [vmem:[#allocation6 + $0xf8] sm:$0xff]  ;;  %v1863_v21 = vld [vmem:[#allocation6 + $0x248] sm:$0xff] }
 0x30b   : > { %v1593_v52 = vrot.slane %v1592_v51, 1 }
 0x30d   : > { %v1594_v53 = vadd.f32 %v1593_v52, %v1592_v51  ;;  %v1817_v51 = vld [vmem:[#allocation6 + $0xd8] sm:$0xff] }
 0x30e   : > { %v1865_v52 = vld [vmem:[#allocation6 + $0x258] sm:$0xff] }
 0x30f   : > { %v1595_v55 = vmax.f32 %v1594_v53, 0.0  ;;  %v1818_v53 = vld [vmem:[#allocation6 + $0xe0] sm:$0xff] }
 0x311   : > { %v1597_v57 = vmul.f32 %v1596_v54, %v1595_v55  ;;  %v1814_v54 = vld [vmem:[#allocation6 + $0xc0] sm:$0xff] }
 0x312   : > { %v1862_v55 = vld [vmem:[#allocation6 + $0x240] sm:$0xff] }
 0x313   : > { %v4975_v58 = vmul.f32 -1.442695, %v1597_v57  ;;  %v1811_v57 = vld [vmem:[#allocation6 + $0xa8] sm:$0xff] }
 0x315   : > { %5570 = vpow2.f32 %v4975_v58  ;;  %v1859_v58 = vld [vmem:[#allocation6 + $0x228] sm:$0xff] }
 0x31b   : > { %v5571_v59 = vpop.eup %5570 }
 0x31c   : > { %v1602_v60 = vadd.f32 1.0, %v5571_v59  ;;  %v1812_v59 = vld [vmem:[#allocation6 + $0xb0] sm:$0xff] }
 0x31e   : > { %5572 = vrcp.f32 %v1602_v60  ;;  %v1614_v2 = vand.u32 2147483648, %v1602_v60  ;;  %v1612_v4 = vand.u32 2147483647, %v1602_v60  ;;  %vm1608_vm3 = vweird.f32 %v1602_v60 }
 0x320   : > { %v1615_v7 = vor.u32 1.1754944e-38, %v1614_v2  ;;  %vm1613_vm5 = vcmp.eq.f32.partialorder %v1612_v4, 8.507059e+37  ;;  %v1853_v2 = vld [vmem:[#allocation6 + $0x1f8] sm:$0xff]  ;;  %v1802_v4 = vld [vmem:[#allocation6 + $0x60] sm:$0xff] }
 0x324   : > { %v5573_v61 = vpop.eup %5572 }
 0x325   : > { %v1604_v62 = vmul.f32 %v5573_v61, %v1602_v60  ;;  %vm1609_vm2 = vweird.f32 %v5573_v61  ;;  %v1808_v60 = vld [vmem:[#allocation6 + $0x90] sm:$0xff] }
 0x326   : > { %vm1610_vm4 = vmor %vm1608_vm3, %vm1609_vm2 }
 0x327   : > { %v1605_v63 = vsub.f32 1.0, %v1604_v62  ;;  %v1809_v62 = vld [vmem:[#allocation6 + $0x98] sm:$0xff] }
 0x329   : > { %v1606_v3 = vmul.f32 %v5573_v61, %v1605_v63  ;;  %v1805_v63 = vld [vmem:[#allocation6 + $0x78] sm:$0xff] }
 0x32b   : > { %v1607_v5 = vadd.f32 %v5573_v61, %v1606_v3  ;;  %v1806_v3 = vld [vmem:[#allocation6 + $0x80] sm:$0xff] }
 0x32d   : > { %v1611_v8 = vsel %vm1610_vm4, %v5573_v61, %v1607_v5  ;;  %v1856_v61 = vld [vmem:[#allocation6 + $0x210] sm:$0xff]  ;;  %v1850_v5 = vld [vmem:[#allocation6 + $0x1e0] sm:$0xff] }
 0x32e   : > { %v1616_v0 = vsel %vm1613_vm5, %v1615_v7, %v1611_v8  ;;  %v1803_v7 = vld [vmem:[#allocation6 + $0x68] sm:$0xff] }
 0x32f   : > { %1620 = vperm.xlu0 %5559, %v1616_v0   ;;  %v1799_v8 = vld [vmem:[#allocation6 + $0x48] sm:$0xff] }
 0x330   : > { %v1847_v0 = vld [vmem:[#allocation6 + $0x1c8] sm:$0xff] }
 0x3a1   : > { %v1621_v27 = vpop.permute.xlu0 %1620 }
 0x3a2   : > { %v1623_v28 = vmul.f32 %v1621_v27, %v6151_v39  ;;  %v1624_v29 = vmul.f32 %v1621_v27, %v6155_v41  ;;  %v1625_v30 = vmul.f32 %v1621_v27, %v6153_v40  ;;  %v1833_v39 = vld [vmem:[#allocation6 + $0x158] sm:$0xff]  ;;  %v1875_v40 = vld [vmem:[#allocation6 + $0x2a8] sm:$0xff]  ;;  %v1834_v27 = vld [vmem:[#allocation6 + $0x160] sm:$0xff] }
 0x3a3   : > { %v1829_v41 = vld [vmem:[#allocation6 + $0x138] sm:$0xff]  ;;  %2008 = vmatpush.msrb.mxu0 %v1875_v40  ;;  %v1822_v40 = vld [vmem:[#allocation6 + $0x100] sm:$0xff] }
 0x3a4   : > { %1725 = vmatpush.msra.mxu3 %v1623_v28  ;;  %1745 = vmatpush.msra.mxu2 %v1624_v29  ;;  %v1882_v28 = vld [vmem:[#allocation6 + $0x2e0] sm:$0xff] }
 0x3a5   : > { %1765 = vmatpush.msrb.mxu1 %v1625_v30  ;;  %4979 = vmatmul.msk.f32.vlgmr.msra.gmra.mxu3 %vm1643_vm1, %v1626_v31  ;;  %v1914_v29 = vld [vmem:[#allocation6 + $0x3e0] sm:$0xff]  ;;  %v1831_v30 = vld [vmem:[#allocation6 + $0x148] sm:$0xff] }
 0x3a6   : > { %4980 = vmatmul.msk.f32.vlgmr.msra.gmra.mxu2 %vm1643_vm1, %v1626_v31  ;;  %4981 = vmatmul.msk.f32.vlgmr.msrb.gmra.mxu1 %vm1643_vm1, %v1626_v31  ;;  %v1879_v31 = vld [vmem:[#allocation6 + $0x2c8] sm:$0xff] }
 0x3a7   : > { %1925 = vmatpush.msrb.mxu2 %v1835_v33  ;;  %1945 = vmatpush.msrb.mxu3 %v1883_v34  ;;  %v1828_v33 = vld [vmem:[#allocation6 + $0x130] sm:$0xff] }
 0x3a8   : > { %1985 = vmatpush.msra.mxu1 %v1836_v35  ;;  %2009 = vmatpush.msrb.mxu0 %v1872_v44  ;;  %v1876_v34 = vld [vmem:[#allocation6 + $0x2b0] sm:$0xff]  ;;  %v1819_v44 = vld [vmem:[#allocation6 + $0xe8] sm:$0xff] }
 0x3a9   : > { %1926 = vmatpush.msrb.mxu2 %v1832_v37  ;;  %1946 = vmatpush.msrb.mxu3 %v1880_v38  ;;  %v1908_v35 = vld [vmem:[#allocation6 + $0x3b0] sm:$0xff]  ;;  %v1873_v37 = vld [vmem:[#allocation6 + $0x298] sm:$0xff] }
 0x3aa   : > { %1986 = vmatpush.msra.mxu1 %v1833_v39  ;;  %2010 = vmatpush.msrb.mxu0 %v1869_v48  ;;  %v1860_v38 = vld [vmem:[#allocation6 + $0x230] sm:$0xff]  ;;  %v1905_v39 = vld [vmem:[#allocation6 + $0x398] sm:$0xff] }
 0x3ab   : > { %1927 = vmatpush.msrb.mxu2 %v1829_v41  ;;  %1947 = vmatpush.msrb.mxu3 %v1877_v42  ;;  %v1870_v41 = vld [vmem:[#allocation6 + $0x280] sm:$0xff]  ;;  %v1857_v42 = vld [vmem:[#allocation6 + $0x218] sm:$0xff]  ;;  %v1816_v48 = vld [vmem:[#allocation6 + $0xd0] sm:$0xff] }
 0x3ac   : > { %1987 = vmatpush.msra.mxu1 %v1830_v43  ;;  %2011 = vmatpush.msrb.mxu0 %v1866_v9  ;;  %v1902_v43 = vld [vmem:[#allocation6 + $0x380] sm:$0xff]  ;;  %v1813_v9 = vld [vmem:[#allocation6 + $0xb8] sm:$0xff] }
 0x3ad   : > { %1928 = vmatpush.msrb.mxu2 %v1826_v45  ;;  %1948 = vmatpush.msrb.mxu3 %v1874_v46  ;;  %v1867_v45 = vld [vmem:[#allocation6 + $0x268] sm:$0xff]  ;;  %v1854_v46 = vld [vmem:[#allocation6 + $0x200] sm:$0xff] }
 0x3ae   : > { %1988 = vmatpush.msra.mxu1 %v1827_v47  ;;  %2012 = vmatpush.msrb.mxu0 %v1863_v21  ;;  %v1899_v47 = vld [vmem:[#allocation6 + $0x368] sm:$0xff]  ;;  %v1810_v21 = vld [vmem:[#allocation6 + $0xa0] sm:$0xff] }
 0x3af   : > { %1929 = vmatpush.msrb.mxu2 %v1823_v49  ;;  %1949 = vmatpush.msrb.mxu3 %v1871_v50  ;;  %v1864_v49 = vld [vmem:[#allocation6 + $0x250] sm:$0xff]  ;;  %v1851_v50 = vld [vmem:[#allocation6 + $0x1e8] sm:$0xff] }
 0x3b0   : > { %1989 = vmatpush.msra.mxu1 %v1824_v6  ;;  %2013 = vmatpush.msrb.mxu0 %v1860_v38  ;;  %v1896_v6 = vld [vmem:[#allocation6 + $0x350] sm:$0xff] }
 0x3b1   : > { %1930 = vmatpush.msrb.mxu2 %v1820_v10  ;;  %1950 = vmatpush.msrb.mxu3 %v1868_v15  ;;  %v1861_v10 = vld [vmem:[#allocation6 + $0x238] sm:$0xff]  ;;  %v1848_v15 = vld [vmem:[#allocation6 + $0x1d0] sm:$0xff] }
 0x3b2   : > { %1990 = vmatpush.msra.mxu1 %v1821_v20  ;;  %2014 = vmatpush.msrb.mxu0 %v1857_v42  ;;  %v1893_v20 = vld [vmem:[#allocation6 + $0x338] sm:$0xff]  ;;  %v1900_v38 = vld [vmem:[#allocation6 + $0x370] sm:$0xff] }
 0x3b3   : > { %1931 = vmatpush.msrb.mxu2 %v1817_v51  ;;  %1951 = vmatpush.msrb.mxu3 %v1865_v52  ;;  %v1858_v51 = vld [vmem:[#allocation6 + $0x220] sm:$0xff]  ;;  %v1845_v52 = vld [vmem:[#allocation6 + $0x1b8] sm:$0xff]  ;;  %v1888_v42 = vld [vmem:[#allocation6 + $0x310] sm:$0xff] }
 0x3b4   : > { %1991 = vmatpush.msra.mxu1 %v1818_v53  ;;  %2015 = vmatpush.msrb.mxu0 %v1854_v46  ;;  %v1890_v53 = vld [vmem:[#allocation6 + $0x320] sm:$0xff] }
 0x3b5   : > { %1932 = vmatpush.msrb.mxu2 %v1814_v54  ;;  %1952 = vmatpush.msrb.mxu3 %v1862_v55  ;;  %v1807_v54 = vld [vmem:[#allocation6 + $0x88] sm:$0xff] }
 0x3b6   : > { %1992 = vmatpush.msra.mxu1 %v1815_v56  ;;  %2016 = vmatpush.msrb.mxu0 %v1851_v50  ;;  %v1855_v55 = vld [vmem:[#allocation6 + $0x208] sm:$0xff]  ;;  %v1842_v56 = vld [vmem:[#allocation6 + $0x1a0] sm:$0xff] }
 0x3b7   : > { %1933 = vmatpush.msrb.mxu2 %v1811_v57  ;;  %1953 = vmatpush.msrb.mxu3 %v1859_v58  ;;  %v1887_v57 = vld [vmem:[#allocation6 + $0x308] sm:$0xff]  ;;  %v1804_v58 = vld [vmem:[#allocation6 + $0x70] sm:$0xff] }
 0x3b8   : > { %1993 = vmatpush.msra.mxu1 %v1812_v59  ;;  %2017 = vmatpush.msrb.mxu0 %v1848_v15  ;;  %v1852_v59 = vld [vmem:[#allocation6 + $0x1f0] sm:$0xff]  ;;  %v5375_v15 = vld [vmem:[%s5848_s19] sm:$0xff] }
 0x3b9   : > { %1934 = vmatpush.msrb.mxu2 %v1808_v60  ;;  %1954 = vmatpush.msrb.mxu3 %v1856_v61  ;;  %v1839_v60 = vld [vmem:[#allocation6 + $0x188] sm:$0xff]  ;;  %v1801_v61 = vld [vmem:[#allocation6 + $0x58] sm:$0xff] }
 0x3ba   : > { %1994 = vmatpush.msra.mxu1 %v1809_v62  ;;  %2018 = vmatpush.msrb.mxu0 %v1845_v52  ;;  %v1849_v62 = vld [vmem:[#allocation6 + $0x1d8] sm:$0xff] }
 0x3bb   : > { %1935 = vmatpush.msrb.mxu2 %v1805_v63  ;;  %1955 = vmatpush.msrb.mxu3 %v1853_v2  ;;  %v1798_v63 = vld [vmem:[#allocation6 + $0x40] sm:$0xff] }
 0x3bc   : > { %1995 = vmatpush.msra.mxu1 %v1806_v3  ;;  %2019 = vmatpush.msrb.mxu0 %v1842_v56  ;;  %v1846_v2 = vld [vmem:[#allocation6 + $0x1c0] sm:$0xff]  ;;  %v1664_v3 = vpop.f32.mrf.mxu2  ;;  %v5376_v56 = vld [vmem:[%s5848_s19 + $0x8] sm:$0xff] }
 0x3bd   : > { %1936 = vmatpush.msrb.mxu2 %v1802_v4  ;;  %1956 = vmatpush.msrb.mxu3 %v1850_v5  ;;  %v1795_v4 = vld [vmem:[#allocation6 + $0x28] sm:$0xff] }
 0x3be   : > { %1996 = vmatpush.msra.mxu1 %v1803_v7  ;;  %2020 = vmatpush.msrb.mxu0 %v1839_v60  ;;  %v1843_v5 = vld [vmem:[#allocation6 + $0x1a8] sm:$0xff]  ;;  %v1792_v7 = vld [vmem:[#allocation6 + $0x10] sm:$0xff] }
 0x3bf   : > { %1937 = vmatpush.msrb.mxu2 %v1799_v8  ;;  %1957 = vmatpush.msrb.mxu3 %v1847_v0  ;;  %v1840_v8 = vld [vmem:[#allocation6 + $0x190] sm:$0xff]  ;;  %v1684_v0 = vpop.f32.mrf.mxu1 }
 0x3c0   : > { %1997 = vmatpush.msra.mxu1 %v1800_v1  ;;  %v5377_v60 = vld [vmem:[%s5848_s19 + $0x10] sm:$0xff] }
 0x3c1   : > { %1938 = vmatpush.msrb.mxu2 %v1796_v11  ;;  %1958 = vmatpush.msrb.mxu3 %v1844_v12  ;;  %v1774_v12 = vpop.permute.xlu2 %1773 }
 0x3c2   : > { %1998 = vmatpush.msra.mxu1 %v1797_v13 }
 0x3c3   : > { %1939 = vmatpush.msrb.mxu2 %v1793_v14  ;;  %1959 = vmatpush.msrb.mxu3 %v1841_v16  ;;  %v1783_v14 = vstv %s4982_s20  ;;  %s4986_s20 = sld [smem:[#allocation2 + $0x2]] }
 0x3c4   : > { %1999 = vmatpush.msra.mxu1 %v1794_v17  ;;  %v1704_v1 = vpop.f32.mrf.mxu2 }
 0x3c5   : > { %1940 = vmatpush.msrb.mxu2 %v1790_v18  ;;  %1960 = vmatpush.msrb.mxu3 %v1838_v19 }
 0x3c6   : > { %2000 = vmatpush.msra.mxu1 %v1791_v22 }
 0x3c7   : > { %2029 = vmatpush.msra.mxu2 %v1920_v23  ;;  %2045 = vmatpush.msra.mxu3 %v1837_v24 }
 0x3c8   : > { %2065 = vmatpush.msrb.mxu1 %v1885_v25 }
 0x3c9   : > { %2030 = vmatpush.msra.mxu2 %v1917_v26  ;;  %2046 = vmatpush.msra.mxu3 %v1834_v27 }
 0x3ca   : > { %2066 = vmatpush.msrb.mxu1 %v1882_v28 }
 0x3cb   : > { %2031 = vmatpush.msra.mxu2 %v1914_v29  ;;  %2047 = vmatpush.msra.mxu3 %v1831_v30  ;;  %v1921_v29 = vld [vmem:[#allocation6 + $0x418] sm:$0xff] }
 0x3cc   : > { %2067 = vmatpush.msrb.mxu1 %v1879_v31 }
 0x3cd   : > { %2032 = vmatpush.msra.mxu2 %v1911_v32  ;;  %2048 = vmatpush.msra.mxu3 %v1828_v33  ;;  %v1918_v32 = vld [vmem:[#allocation6 + $0x400] sm:$0xff]  ;;  %v1915_v33 = vld [vmem:[#allocation6 + $0x3e8] sm:$0xff] }
 0x3ce   : > { %2068 = vmatpush.msrb.mxu1 %v1876_v34  ;;  %v1912_v34 = vld [vmem:[#allocation6 + $0x3d0] sm:$0xff] }
 0x3cf   : > { %2033 = vmatpush.msra.mxu2 %v1908_v35  ;;  %2049 = vmatpush.msra.mxu3 %v1825_v36  ;;  %v1909_v35 = vld [vmem:[#allocation6 + $0x3b8] sm:$0xff]  ;;  %v1906_v36 = vld [vmem:[#allocation6 + $0x3a0] sm:$0xff] }
 0x3d0   : > { %2069 = vmatpush.msrb.mxu1 %v1873_v37  ;;  %v1903_v37 = vld [vmem:[#allocation6 + $0x388] sm:$0xff] }
 0x3d1   : > { %2034 = vmatpush.msra.mxu2 %v1905_v39  ;;  %2050 = vmatpush.msra.mxu3 %v1822_v40  ;;  %v1897_v39 = vld [vmem:[#allocation6 + $0x358] sm:$0xff]  ;;  %v1894_v40 = vld [vmem:[#allocation6 + $0x340] sm:$0xff] }
 0x3d2   : > { %2070 = vmatpush.msrb.mxu1 %v1870_v41  ;;  %v1891_v41 = vld [vmem:[#allocation6 + $0x328] sm:$0xff] }
 0x3d3   : > { %2035 = vmatpush.msra.mxu2 %v1902_v43  ;;  %2051 = vmatpush.msra.mxu3 %v1819_v44 }
 0x3d4   : > { %2071 = vmatpush.msrb.mxu1 %v1867_v45 }
 0x3d5   : > { %2036 = vmatpush.msra.mxu2 %v1899_v47  ;;  %2052 = vmatpush.msra.mxu3 %v1816_v48 }
 0x3d6   : > { %2072 = vmatpush.msrb.mxu1 %v1864_v49 }
 0x3d7   : > { %2037 = vmatpush.msra.mxu2 %v1896_v6  ;;  %2053 = vmatpush.msra.mxu3 %v1813_v9 }
 0x3d8   : > { %2073 = vmatpush.msrb.mxu1 %v1861_v10 }
 0x3d9   : > { %2038 = vmatpush.msra.mxu2 %v1893_v20  ;;  %2054 = vmatpush.msra.mxu3 %v1810_v21 }
 0x3da   : > { %2074 = vmatpush.msrb.mxu1 %v1858_v51 }
 0x3db   : > { %2039 = vmatpush.msra.mxu2 %v1890_v53  ;;  %2055 = vmatpush.msra.mxu3 %v1807_v54 }
 0x3dc   : > { %2075 = vmatpush.msrb.mxu1 %v1855_v55 }
 0x3dd   : > { %2040 = vmatpush.msra.mxu2 %v1887_v57  ;;  %2056 = vmatpush.msra.mxu3 %v1804_v58 }
 0x3de   : > { %2076 = vmatpush.msrb.mxu1 %v1852_v59 }
 0x3df   : > { %2057 = vmatpush.msra.mxu3 %v1801_v61  ;;  %v5378_v61 = vld [vmem:[%s5848_s19 + $0x18] sm:$0xff] }
 0x3e0   : > { %2077 = vmatpush.msrb.mxu1 %v1849_v62  ;;  %v2115_v62 = vld [vmem:[%s5848_s19 + $0x20] sm:$0xf] }
 0x3e1   : > { %2058 = vmatpush.msra.mxu3 %v1798_v63  ;;  %v2136_v63 = vunpack.c.l.b16 %v2115_v62  ;;  %v2434_v62 = vld [vmem:[%s5853_s24 + $0xd0] sm:$0xff] }
 0x3e2   : > { %2078 = vmatpush.msrb.mxu1 %v1846_v2 }
 0x3e3   : > { %2059 = vmatpush.msra.mxu3 %v1795_v4  ;;  %v2141_v2 = vpack.c.b16 %v2136_v63, %v2136_v63 }
 0x3e4   : > { %2079 = vmatpush.msrb.mxu1 %v1843_v5 }
 0x3e5   : > { %2060 = vmatpush.msra.mxu3 %v1792_v7 }
 0x3e6   : > { %2080 = vmatpush.msrb.mxu1 %v1840_v8 }
 0x423   : > { %v1767_v11 = vpop.f32.mrf.mxu1 }
 0x424   : > { %v1768_v13 = vadd.f32 %v1767_v11, %v1704_v1 }
 0x426   : > { %v1778_v16 = vadd.f32 %v1774_v12, %v1768_v13 }
 0x428   : > { %v1786_v17 = vmul.f32 %v1783_v14, %v1778_v16  ;;  %v1727_v18 = vpop.f32.mrf.mxu3  ;;  %vm1782_vm8 = vcmp.ge.f32.partialorder %v1778_v16, 0.0 }
 0x429   : > { %v1728_v19 = vadd.f32 %v1727_v18, %v1664_v3  ;;  %v1747_v22 = vpop.f32.mrf.mxu2 }
 0x42a   : > { %v1748_v23 = vadd.f32 %v1747_v22, %v1684_v0  ;;  %v1789_v24 = vsel %vm1782_vm8, %v1778_v16, %v1786_v17  ;;  %vm2778_vm8 = vcmask 654336  }
 0x42b   : > { %v1776_v25 = vadd.f32 %v1774_v12, %v1728_v19  ;;  %4983 = vmatmul.msk.f32.vlgmr.msra.gmra.mxu0 %vm1579_vm15, %v1789_v24 }
 0x42c   : > { %v1777_v26 = vadd.f32 %v1774_v12, %v1748_v23 }
 0x42d   : > { %vm1780_vm9 = vcmp.ge.f32.partialorder %v1776_v25, 0.0  ;;  %v1784_v27 = vmul.f32 %v1783_v14, %v1776_v25 }
 0x42e   : > { %v1785_v28 = vmul.f32 %v1783_v14, %v1777_v26  ;;  %vm1781_vm10 = vcmp.ge.f32.partialorder %v1777_v26, 0.0 }
 0x42f   : > { %v1787_v30 = vsel %vm1780_vm9, %v1776_v25, %v1784_v27  ;;  %vm2808_vm9 = vcmask 343040  }
 0x430   : > { %1941 = vmatmul.f32.vlgmr.msrb.gmra.mxu2 %v1787_v30  ;;  %v1788_v31 = vsel %vm1781_vm10, %v1777_v26, %v1785_v28  ;;  %2001 = vmatmul.f32.vlgmr.msra.gmra.mxu1 %v1787_v30 }
 0x431   : > { %1961 = vmatmul.f32.vlgmr.msrb.gmra.mxu3 %v1788_v31  ;;  %2089 = vmatpush.msrb.mxu2 %v1921_v29 }
 0x433   : > { %2021 = vmatmul.f32.vlgmr.msrb.gmra.mxu0 %v1788_v31  ;;  %2090 = vmatpush.msrb.mxu2 %v1918_v32 }
 0x435   : > { %2091 = vmatpush.msrb.mxu2 %v1915_v33 }
 0x437   : > { %2092 = vmatpush.msrb.mxu2 %v1912_v34 }
 0x438   : > { %4984 = vmatmul.msk.f32.vlgmr.msra.gmra.mxu2 %vm1579_vm15, %v1789_v24  ;;  %2081 = vmatmul.f32.vlgmr.msrb.gmra.mxu1 %v1788_v31 }
 0x439   : > { %2061 = vmatmul.f32.vlgmr.msra.gmra.mxu3 %v1787_v30  ;;  %2093 = vmatpush.msrb.mxu2 %v1909_v35 }
 0x43b   : > { %2094 = vmatpush.msrb.mxu2 %v1906_v36 }
 0x43d   : > { %2095 = vmatpush.msrb.mxu2 %v1903_v37  ;;  %v2423_v37 = vld [vmem:[%s5853_s24 + $0x78] sm:$0xff] }
 0x43f   : > { %2096 = vmatpush.msrb.mxu2 %v1900_v38  ;;  %v2422_v38 = vld [vmem:[%s5853_s24 + $0x70] sm:$0xff] }
 0x441   : > { %2097 = vmatpush.msrb.mxu2 %v1897_v39  ;;  %v2443_v39 = vld [vmem:[%s5853_s24 + $0x118] sm:$0xff] }
 0x443   : > { %2098 = vmatpush.msrb.mxu2 %v1894_v40  ;;  %v2421_v40 = vld [vmem:[%s5853_s24 + $0x68] sm:$0xff] }
 0x445   : > { %2099 = vmatpush.msrb.mxu2 %v1891_v41  ;;  %v2420_v41 = vld [vmem:[%s5853_s24 + $0x60] sm:$0xff] }
 0x447   : > { %2100 = vmatpush.msrb.mxu2 %v1888_v42 }
 0x448   : > { %4985 = vmatmul.msk.f32.vlgmr.msrb.gmra.mxu2 %vm1579_vm15, %v1789_v24  ;;  %vm2363_vm15 = vcmask 752640  }
 0x449   : > { %2448 = vmatpush.msra.mxu2 %v2423_v37 }
 0x44b   : > { %2449 = vmatpush.msra.mxu2 %v2422_v38 }
 0x44d   : > { %2450 = vmatpush.msra.mxu2 %v2421_v40 }
 0x44f   : > { %2451 = vmatpush.msra.mxu2 %v2420_v41 }
 0x4a8   : > { %v1982_v43 = vpop.f32.mrf.mxu0 }
 0x4ad   : > { %v2002_v49 = vpop.f32.mrf.mxu1 }
 0x4b0   : > { %v2022_v47 = vpop.f32.mrf.mxu0 }
 0x4b1   : > { %v2023_v6 = vadd.f32 %v2022_v47, %v2002_v49  ;;  %v2415_v49 = vld [vmem:[%s5853_s24 + $0x38] sm:$0xff] }
 0x4b3   : > { %v1942_v44 = vpop.f32.mrf.mxu2 }
 0x4b4   : > { %v1962_v45 = vpop.f32.mrf.mxu3 }
 0x4b5   : > { %v1963_v46 = vadd.f32 %v1962_v45, %v1942_v44  ;;  %v2082_v53 = vpop.f32.mrf.mxu1  ;;  %v2418_v44 = vld [vmem:[%s5853_s24 + $0x50] sm:$0xff]  ;;  %v2417_v45 = vld [vmem:[%s5853_s24 + $0x48] sm:$0xff] }
 0x4b7   : > { %v1983_v48 = vadd.f32 %v1982_v43, %v1963_v46  ;;  %v2419_v43 = vld [vmem:[%s5853_s24 + $0x58] sm:$0xff]  ;;  %v2416_v46 = vld [vmem:[%s5853_s24 + $0x40] sm:$0xff] }
 0x4b8   : > { %2452 = vmatpush.msra.mxu2 %v2419_v43 }
 0x4b9   : > { %v2116_v50 = vpack.c.bf16 %v1983_v48, %v1983_v48 }
 0x4ba   : > { %2453 = vmatpush.msra.mxu2 %v2418_v44 }
 0x4bb   : > { %v2042_v9 = vpop.f32.mrf.mxu2  ;;  %v2159_v10 = vsel %vm2157_vm11, %v2116_v50, 0  ;;  %v2414_v50 = vld [vmem:[%s5853_s24 + $0x30] sm:$0xff] }
 0x4bc   : > { %v2043_v20 = vadd.f32 %v2042_v9, %v2023_v6  ;;  %2174 = vmatpush.bf16.msra.mxu0 %v2159_v10  ;;  %v2062_v52 = vpop.f32.mrf.mxu3  ;;  %2454 = vmatpush.msra.mxu2 %v2417_v45  ;;  %v2413_v6 = vld [vmem:[%s5853_s24 + $0x28] sm:$0xff]  ;;  %v2442_v9 = vld [vmem:[%s5853_s24 + $0x110] sm:$0xff]  ;;  %v2412_v10 = vld [vmem:[%s5853_s24 + $0x20] sm:$0xff] }
 0x4bd   : > { %v2083_v54 = vadd.f32 %v2082_v53, %v2062_v52  ;;  %v2409_v52 = vld [vmem:[%s5853_s24 + $0x8] sm:$0xff]  ;;  %v2408_v53 = vld [vmem:[%s5853_s24] sm:$0xff] }
 0x4be   : > { %v2117_v21 = vpack.c.bf16 %v2043_v20, %v2043_v20  ;;  %2455 = vmatpush.msra.mxu2 %v2416_v46 }
 0x4bf   : > { %5003 = vmatmul.msk.bf16.vlgmr.msra.gmra.mxu0 %vm1643_vm1, %v5375_v15 }
 0x4c0   : > { %v2162_v51 = vsel %vm2157_vm11, %v2117_v21, 0  ;;  %2500 = vmatpush.msrb.mxu0 %v2443_v39  ;;  %2456 = vmatpush.msra.mxu2 %v2415_v49 }
 0x4c1   : > { %2207 = vmatpush.bf16.msrb.mxu3 %v2162_v51  ;;  %v2410_v51 = vld [vmem:[%s5853_s24 + $0x10] sm:$0xff] }
 0x4c2   : > { %2457 = vmatpush.msra.mxu2 %v2414_v50  ;;  %2501 = vmatpush.msrb.mxu0 %v2442_v9 }
 0x4c4   : > { %5008 = vmatmul.msk.bf16.vlgmr.msrb.gmra.mxu3 %vm1643_vm1, %v5375_v15  ;;  %2458 = vmatpush.msra.mxu2 %v2413_v6 }
 0x4c6   : > { %2459 = vmatpush.msra.mxu2 %v2412_v10 }
 0x4cb   : > { %v2102_v55 = vpop.f32.mrf.mxu2 }
 0x4cc   : > { %v2103_v57 = vadd.f32 %v2102_v55, %v2083_v54  ;;  %v2439_v54 = vld [vmem:[%s5853_s24 + $0xf8] sm:$0xff] }
 0x4ce   : > { %v2118_v58 = vpack.c.bf16 %v2103_v57, %v2103_v57  ;;  %v2438_v57 = vld [vmem:[%s5853_s24 + $0xf0] sm:$0xff] }
 0x4cf   : > { %5004 = vmatmul.msk.bf16.gmra.mxu0 %vm1643_vm1, %v5376_v56 }
 0x4d0   : > { %v2165_v59 = vsel %vm2157_vm11, %v2118_v58, 0  ;;  %v2437_v58 = vld [vmem:[%s5853_s24 + $0xe8] sm:$0xff] }
 0x4d1   : > { %2240 = vmatpush.bf16.msra.mxu1 %v2165_v59  ;;  %v2436_v59 = vld [vmem:[%s5853_s24 + $0xe0] sm:$0xff] }
 0x4d4   : > { %5013 = vmatmul.msk.bf16.vlgmr.msra.gmra.mxu1 %vm1643_vm1, %v5375_v15  ;;  %5009 = vmatmul.msk.bf16.gmra.mxu3 %vm1643_vm1, %v5376_v56  ;;  %v2411_v15 = vld [vmem:[%s5853_s24 + $0x18] sm:$0xff] }
 0x4d5   : > { %2460 = vmatpush.msra.mxu2 %v2411_v15 }
 0x4d7   : > { %2461 = vmatpush.msra.mxu2 %v2410_v51 }
 0x4d9   : > { %2462 = vmatpush.msra.mxu2 %v2409_v52 }
 0x4db   : > { %2463 = vmatpush.msra.mxu2 %v2408_v53 }
 0x4dd   : > { %2468 = vmatpush.msrb.mxu2 %v2439_v54 }
 0x4df   : > { %5005 = vmatmul.msk.bf16.gmra.mxu0 %vm1643_vm1, %v5377_v60  ;;  %2469 = vmatpush.msrb.mxu2 %v2438_v57 }
 0x4e1   : > { %2470 = vmatpush.msrb.mxu2 %v2437_v58 }
 0x4e3   : > { %2471 = vmatpush.msrb.mxu2 %v2436_v59 }
 0x4e4   : > { %5014 = vmatmul.msk.bf16.gmra.mxu1 %vm1643_vm1, %v5376_v56  ;;  %5010 = vmatmul.msk.bf16.gmra.mxu3 %vm1643_vm1, %v5377_v60 }
 0x4ef   : > { %5006 = vmatmul.msk.bf16.gmra.mxu0 %vm1643_vm1, %v5378_v61 }
 0x4f4   : > { %5015 = vmatmul.msk.bf16.gmra.mxu1 %vm1643_vm1, %v5377_v60  ;;  %5011 = vmatmul.msk.bf16.gmra.mxu3 %vm1643_vm1, %v5378_v61  ;;  %v2435_v60 = vld [vmem:[%s5853_s24 + $0xd8] sm:$0xff] }
 0x4f5   : > { %2472 = vmatpush.msrb.mxu2 %v2435_v60 }
 0x4f7   : > { %2473 = vmatpush.msrb.mxu2 %v2434_v62 }
 0x4ff   : > { %5007 = vmatmul.msk.bf16.gmra.mxu0 %vm1643_vm1, %v2141_v2 }
 0x504   : > { %5016 = vmatmul.msk.bf16.gmra.mxu1 %vm1643_vm1, %v5378_v61  ;;  %5012 = vmatmul.msk.bf16.gmra.mxu3 %vm1643_vm1, %v2141_v2 }
 0x514   : > { %5017 = vmatmul.msk.bf16.gmra.mxu1 %vm1643_vm1, %v2141_v2  ;;  %v2433_v2 = vld [vmem:[%s5853_s24 + $0xc8] sm:$0xff] }
 0x515   : > { %2474 = vmatpush.msrb.mxu2 %v2433_v2 }
 0x53c   : > { %v6201_v3 = vpop.f32.mrf.mxu0 }
 0x544   : > { %v2178_v4 = vpop.f32.mrf.mxu0 }
 0x545   : > { %2269 = vrot.lane.b32.xlu0 %v2178_v4, %s5768_s23  ;;  %v2441_v4 = vld [vmem:[%s5853_s24 + $0x108] sm:$0xff] }
 0x546   : > { %2502 = vmatpush.msrb.mxu0 %v2441_v4 }
 0x547   : > { %v6204_v5 = vpop.f32.mrf.mxu3 }
 0x54c   : > { %v2181_v7 = vpop.f32.mrf.mxu0 }
 0x54d   : > { %2286 = vrot.lane.b32.xlu0 %v2181_v7, %s5769_s16  ;;  %v2432_v7 = vld [vmem:[%s5853_s24 + $0xc0] sm:$0xff] }
 0x54e   : > { %2475 = vmatpush.msrb.mxu2 %v2432_v7 }
 0x54f   : > { %v2211_v8 = vpop.f32.mrf.mxu3 }
 0x550   : > { %2271 = vrot.lane.b32.xlu2 %v2211_v8, %s5768_s23  ;;  %v2431_v8 = vld [vmem:[%s5853_s24 + $0xb8] sm:$0xff] }
 0x551   : > { %v6208_v0 = vpop.f32.mrf.mxu1  ;;  %2476 = vmatpush.msrb.mxu2 %v2431_v8 }
 0x554   : > { %v2183_v1 = vpop.f32.mrf.mxu0 }
 0x555   : > { %2303 = vrot.lane.b32.xlu0 %v2183_v1, %s5775_s2 }
 0x557   : > { %v2214_v11 = vpop.f32.mrf.mxu3 }
 0x558   : > { %2288 = vrot.lane.b32.xlu2 %v2214_v11, %s5769_s16  ;;  %v2430_v11 = vld [vmem:[%s5853_s24 + $0xb0] sm:$0xff] }
 0x559   : > { %v2244_v12 = vpop.f32.mrf.mxu1  ;;  %2477 = vmatpush.msrb.mxu2 %v2430_v11 }
 0x55c   : > { %v2186_v13 = vpop.f32.mrf.mxu0 }
 0x55d   : > { %2321 = vrot.lane.b32.xlu1 %v2186_v13, %s5776_s28  ;;  %v2428_v13 = vld [vmem:[%s5853_s24 + $0xa0] sm:$0xff] }
 0x55f   : > { %v2216_v14 = vpop.f32.mrf.mxu3 }
 0x560   : > { %2273 = vrot.lane.b32.xlu2 %v2244_v12, %s5768_s23  ;;  %v2429_v12 = vld [vmem:[%s5853_s24 + $0xa8] sm:$0xff] }
 0x561   : > { %v2247_v16 = vpop.f32.mrf.mxu1  ;;  %2478 = vmatpush.msrb.mxu2 %v2429_v12 }
 0x562   : > { %2290 = vrot.lane.b32.xlu0 %v2247_v16, %s5769_s16  ;;  %v2427_v16 = vld [vmem:[%s5853_s24 + $0x98] sm:$0xff] }
 0x563   : > { %2479 = vmatpush.msrb.mxu2 %v2428_v13 }
 0x564   : > { %v2188_v17 = vpop.f32.mrf.mxu0 }
 0x565   : > { %2480 = vmatpush.msrb.mxu2 %v2427_v16 }
 0x567   : > { %v2219_v18 = vpop.f32.mrf.mxu3 }
 0x568   : > { %2305 = vrot.lane.b32.xlu2 %v2216_v14, %s5775_s2 }
 0x569   : > { %v2249_v19 = vpop.f32.mrf.mxu1 }
 0x56a   : > { %2339 = vrot.lane.b32.xlu0 %v2188_v17, %s5777_s11 }
 0x56c   : > { %v2191_v22 = vpop.f32.mrf.mxu0 }
 0x56f   : > { %v2221_v23 = vpop.f32.mrf.mxu3 }
 0x570   : > { %2357 = vrot.lane.b32.xlu2 %v2191_v22, %s5778_s18  ;;  %v2425_v22 = vld [vmem:[%s5853_s24 + $0x88] sm:$0xff] }
 0x571   : > { %v2252_v24 = vpop.f32.mrf.mxu1 }
 0x572   : > { %2323 = vrot.lane.b32.xlu0 %v2219_v18, %s5776_s28 }
 0x574   : > { %v2193_v25 = vpop.f32.mrf.mxu0 }
 0x577   : > { %v2224_v26 = vpop.f32.mrf.mxu3 }
 0x578   : > { %2359 = vrot.lane.b32.xlu1 %v2224_v26, %s5778_s18  ;;  %2341 = vrot.lane.b32.xlu2 %v2221_v23, %s5777_s11  ;;  %v2440_v23 = vld [vmem:[%s5853_s24 + $0x100] sm:$0xff] }
 0x579   : > { %v2254_v27 = vpop.f32.mrf.mxu1  ;;  %2503 = vmatpush.msrb.mxu0 %v2440_v23 }
 0x57a   : > { %2307 = vrot.lane.b32.xlu0 %v2249_v19, %s5775_s2  ;;  %v2426_v19 = vld [vmem:[%s5853_s24 + $0x90] sm:$0xff]  ;;  %s6653_s2 = smov 118  }
 0x57b   : > { %2481 = vmatpush.msrb.mxu2 %v2426_v19 }
 0x57c   : > { %v2196_v28 = vpop.f32.mrf.mxu0 }
 0x57d   : > { %2482 = vmatpush.msrb.mxu2 %v2425_v22 }
 0x57f   : > { %v2226_v29 = vpop.f32.mrf.mxu3 }
 0x580   : > { %2377 = vrot.lane.b32.xlu1 %v2226_v29, %s5779_s26  ;;  %2375 = vrot.lane.b32.xlu2 %v2193_v25, %s5779_s26 }
 0x581   : > { %v2257_v30 = vpop.f32.mrf.mxu1 }
 0x582   : > { %2325 = vrot.lane.b32.xlu0 %v2252_v24, %s5776_s28  ;;  %v2424_v24 = vld [vmem:[%s5853_s24 + $0x80] sm:$0xff]  ;;  %s6651_s28 = smov 117  }
 0x583   : > { %2483 = vmatpush.msrb.mxu2 %v2424_v24 }
 0x584   : > { %v2198_v31 = vpop.f32.mrf.mxu0 }
 0x587   : > { %v2229_v32 = vpop.f32.mrf.mxu3 }
 0x588   : > { %2395 = vrot.lane.b32.xlu1 %v2229_v32, %s5780_s7  ;;  %2393 = vrot.lane.b32.xlu2 %v2196_v28, %s5780_s7 }
 0x589   : > { %v2259_v33 = vpop.f32.mrf.mxu1 }
 0x58a   : > { %2343 = vrot.lane.b32.xlu0 %v2254_v27, %s5777_s11 }
 0x58f   : > { %v2231_v34 = vpop.f32.mrf.mxu3 }
 0x590   : > { %2379 = vrot.lane.b32.xlu1 %v2259_v33, %s5779_s26  ;;  %2361 = vrot.lane.b32.xlu2 %v2257_v30, %s5778_s18  ;;  %s5783_s18 = smov 116   ;;  %s6680_s26 = sld [smem:[#allocation12_spill]] }
 0x591   : > { %v2262_v35 = vpop.f32.mrf.mxu1 }
 0x592   : > { %2397 = vrot.lane.b32.xlu0 %v2262_v35, %s5780_s7  ;;  %s5784_s7 = smov 107  }
 0x599   : > { %v2264_v36 = vpop.f32.mrf.mxu1 }
 0x5aa   : > { %v6221_v42 = vpop.permute.xlu2 %2271 }
 0x5b2   : > { %v6227_v47 = vpop.permute.xlu2 %2288 }
 0x5b7   : > { %v6229_v48 = vpop.permute.xlu0 %2269 }
 0x5b8   : > { %v2275_v25 = vsel %vm1458_vm6, %v6229_v48, %v6221_v42 }
 0x5b9   : > { %v2280_v29 = vadd.f32 %v2275_v25, %v6201_v3 }
 0x5ba   : > { %v6237_v20 = vpop.permute.xlu2 %2273 }
 0x5bb   : > { %v2276_v37 = vsel %vm1458_vm6, %v6221_v42, %v6237_v20  ;;  %v2282_v39 = vadd.f32 %v6237_v20, %v6208_v0  ;;  %vm2399_vm6 = vcmask 736256  }
 0x5bc   : > { %v2281_v44 = vadd.f32 %v2276_v37, %v6204_v5 }
 0x5bf   : > { %v2287_v21 = vpop.permute.xlu0 %2286 }
 0x5c0   : > { %v2292_v28 = vsel %vm1479_vm7, %v2287_v21, %v6227_v47 }
 0x5c1   : > { %v2297_v32 = vadd.f32 %v2292_v28, %v2280_v29 }
 0x5c2   : > { %v6243_v55 = vpop.permute.xlu2 %2305 }
 0x5c7   : > { %v2304_v56 = vpop.permute.xlu0 %2303 }
 0x5c8   : > { %v2310_v31 = vsel %vm2309_vm12, %v2304_v56, %v6243_v55 }
 0x5c9   : > { %v2315_v34 = vadd.f32 %v2310_v31, %v2297_v32 }
 0x5ca   : > { %v2358_v63 = vpop.permute.xlu2 %2357 }
 0x5cf   : > { %v2322_v17 = vpop.permute.xlu1 %2321 }
 0x5d2   : > { %v2342_v14 = vpop.permute.xlu2 %2341 }
 0x5d4   : > { %v2291_v61 = vpop.permute.xlu0 %2290 }
 0x5d5   : > { %v2293_v40 = vsel %vm1479_vm7, %v6227_v47, %v2291_v61  ;;  %v2299_v46 = vadd.f32 %v2291_v61, %v2282_v39  ;;  %vm2444_vm7 = vcmask 261120  }
 0x5d6   : > { %v2298_v49 = vadd.f32 %v2293_v40, %v2281_v44  ;;  %v5379_v40 = vld [vmem:[%s5863_s6] sm:$0xff]  ;;  %v5382_v44 = vld [vmem:[%s5863_s6 + $0x18] sm:$0xff] }
 0x5da   : > { %v2376_v26 = vpop.permute.xlu2 %2375 }
 0x5dc   : > { %v2340_v1 = vpop.permute.xlu0 %2339 }
 0x5dd   : > { %v2346_v41 = vsel %vm2345_vm14, %v2340_v1, %v2342_v14 }
 0x5e2   : > { %v2394_v38 = vpop.permute.xlu2 %2393 }
 0x5e4   : > { %v2324_v18 = vpop.permute.xlu0 %2323 }
 0x5e5   : > { %v2328_v33 = vsel %vm2327_vm13, %v2322_v17, %v2324_v18 }
 0x5e6   : > { %v2333_v35 = vadd.f32 %v2328_v33, %v2315_v34 }
 0x5e8   : > { %v2351_v45 = vadd.f32 %v2346_v41, %v2333_v35  ;;  %v2535_v35 = vstv %s4986_s20  ;;  %v5380_v41 = vld [vmem:[%s5863_s6 + $0x8] sm:$0xff]  ;;  %s5019_s20 = sld [smem:[#allocation2 + $0x3]] }
 0x5ea   : > { %v2360_v27 = vpop.permute.xlu1 %2359  ;;  %v2362_v54 = vpop.permute.xlu2 %2361 }
 0x5eb   : > { %v2364_v43 = vsel %vm2363_vm15, %v2358_v63, %v2360_v27  ;;  %v2365_v56 = vsel %vm2363_vm15, %v2360_v27, %v2362_v54 }
 0x5ec   : > { %v2308_v30 = vpop.permute.xlu0 %2307  ;;  %v2369_v50 = vadd.f32 %v2364_v43, %v2351_v45  ;;  %v5381_v43 = vld [vmem:[%s5863_s6 + $0x10] sm:$0xff]  ;;  %v5383_v45 = vld [vmem:[%s5863_s6 + $0x20] sm:$0xff] }
 0x5ed   : > { %v2311_v42 = vsel %vm2309_vm12, %v6243_v55, %v2308_v30  ;;  %v2317_v0 = vadd.f32 %v2308_v30, %v2299_v46  ;;  %v5384_v46 = vld [vmem:[%s5863_s6 + $0x28] sm:$0xff] }
 0x5ee   : > { %v2316_v47 = vadd.f32 %v2311_v42, %v2298_v49  ;;  %v5385_v42 = vld [vmem:[%s5863_s6 + $0x30] sm:$0xff]  ;;  %v5387_v49 = vld [vmem:[%s5863_s6 + $0x40] sm:$0xff] }
 0x5f2   : > { %v2378_v36 = vpop.permute.xlu1 %2377 }
 0x5f3   : > { %v2382_v48 = vsel %vm2381_vm0, %v2376_v26, %v2378_v36 }
 0x5f4   : > { %v2326_v3 = vpop.permute.xlu0 %2325  ;;  %v2387_v9 = vadd.f32 %v2382_v48, %v2369_v50  ;;  %v5386_v48 = vld [vmem:[%s5863_s6 + $0x38] sm:$0xff] }
 0x5f5   : > { %v2329_v6 = vsel %vm2327_vm13, %v2324_v18, %v2326_v3  ;;  %v2335_v15 = vadd.f32 %v2326_v3, %v2317_v0  ;;  %v5567_v18 = vld [vmem:[%s5858_s30] ss:$0 sm:$0xff] }
 0x5f6   : > { %v2334_v5 = vadd.f32 %v2329_v6, %v2316_v47 }
 0x5fa   : > { %v2396_v10 = vpop.permute.xlu1 %2395 }
 0x5fb   : > { %v2400_v20 = vsel %vm2399_vm6, %v2394_v38, %v2396_v10 }
 0x5fc   : > { %v2405_v21 = vadd.f32 %v2400_v20, %v2387_v9  ;;  %v2344_v51 = vpop.permute.xlu0 %2343 }
 0x5fd   : > { %v2347_v52 = vsel %vm2345_vm14, %v2342_v14, %v2344_v51  ;;  %v2353_v53 = vadd.f32 %v2344_v51, %v2335_v15 }
 0x5fe   : > { %v2352_v55 = vadd.f32 %v2347_v52, %v2334_v5  ;;  %2464 = vmatmul.f32.vlgmr.msra.gmra.mxu2 %v2405_v21 }
 0x5ff   : > { %v2371_v57 = vadd.f32 %v2362_v54, %v2353_v53 }
 0x600   : > { %v2370_v59 = vadd.f32 %v2365_v56, %v2352_v55 }
 0x602   : > { %v2380_v58 = vpop.permute.xlu1 %2379 }
 0x603   : > { %v2383_v60 = vsel %vm2381_vm0, %v2378_v36, %v2380_v58  ;;  %v2389_v61 = vadd.f32 %v2380_v58, %v2371_v57 }
 0x604   : > { %v2388_v62 = vadd.f32 %v2383_v60, %v2370_v59  ;;  %v2398_v63 = vpop.permute.xlu0 %2397  ;;  %v2777_v59 = vld [vmem:[%s6680_s26 + $0x48] sm:$0xff]  ;;  %v2776_v60 = vld [vmem:[%s6680_s26 + $0x40] sm:$0xff] }
 0x605   : > { %v2401_v2 = vsel %vm2399_vm6, %v2396_v10, %v2398_v63  ;;  %v2407_v4 = vadd.f32 %v2398_v63, %v2389_v61  ;;  %2791 = vmatpush.msra.mxu3 %v2777_v59  ;;  %v2775_v61 = vld [vmem:[%s6680_s26 + $0x38] sm:$0xff] }
 0x606   : > { %v2406_v7 = vadd.f32 %v2401_v2, %v2388_v62  ;;  %v2774_v62 = vld [vmem:[%s6680_s26 + $0x30] sm:$0xff] }
 0x607   : > { %5018 = vmatmul.msk.f32.vlgmr.msrb.gmra.mxu0 %vm2444_vm7, %v2407_v4  ;;  %2792 = vmatpush.msra.mxu3 %v2776_v60  ;;  %v2773_v4 = vld [vmem:[%s6680_s26 + $0x28] sm:$0xff] }
 0x608   : > { %2484 = vmatmul.f32.vlgmr.msrb.gmra.mxu2 %v2406_v7  ;;  %v2772_v7 = vld [vmem:[%s6680_s26 + $0x20] sm:$0xff] }
 0x609   : > { %2793 = vmatpush.msra.mxu3 %v2775_v61 }
 0x60b   : > { %2794 = vmatpush.msra.mxu3 %v2774_v62 }
 0x60d   : > { %2795 = vmatpush.msra.mxu3 %v2773_v4 }
 0x60f   : > { %2796 = vmatpush.msra.mxu3 %v2772_v7 }
 0x681   : > { %v2465_v8 = vpop.f32.mrf.mxu2 }
 0x684   : > { %v2505_v12 = vpop.f32.mrf.mxu0 }
 0x68b   : > { %v2485_v1 = vpop.f32.mrf.mxu2 }
 0x68c   : > { %v2486_v11 = vadd.f32 %v2485_v1, %v2465_v8  ;;  %v2771_v1 = vld [vmem:[%s6680_s26 + $0x18] sm:$0xff] }
 0x68d   : > { %2797 = vmatpush.msra.mxu3 %v2771_v1 }
 0x68e   : > { %v2506_v13 = vadd.f32 %v2505_v12, %v2486_v11  ;;  %v2770_v12 = vld [vmem:[%s6680_s26 + $0x10] sm:$0xff] }
 0x68f   : > { %2798 = vmatpush.msra.mxu3 %v2770_v12 }
 0x690   : > { %v2508_v14 = vsel %vm2309_vm12, %v2506_v13, 0.0 }
 0x691   : > { %2509 = vadd.xlane.f32.xlu2 %v2508_v14 }
 0x704   : > { %v2510_v16 = vpop.xlane.xlu2 %2509 }
 0x705   : > { %v2511_v17 = vmul.f32 0.015625, %v2510_v16  ;;  %v2768_v16 = vld [vmem:[%s6680_s26] sm:$0xff] }
 0x707   : > { %v2512_v19 = vsub.f32 %v2506_v13, %v2511_v17  ;;  %v2769_v13 = vld [vmem:[%s6680_s26 + $0x8] sm:$0xff] }
 0x708   : > { %2799 = vmatpush.msra.mxu3 %v2769_v13 }
 0x709   : > { %v2516_v22 = vmul.f32 %v5567_v18, %v2512_v19 }
 0x70a   : > { %2800 = vmatpush.msra.mxu3 %v2768_v16 }
 0x70b   : > { %v2517_v23 = vmul.f32 %v2516_v22, %v2516_v22 }
 0x70d   : > { %v2518_v24 = vsel %vm2309_vm12, %v2517_v23, 0.0 }
 0x70e   : > { %2519 = vadd.xlane.f32.xlu1 %v2518_v24 }
 0x781   : > { %v2520_v25 = vpop.xlane.xlu1 %2519 }
 0x782   : > { %v2521_v26 = vmul.f32 0.015625, %v2520_v25 }
 0x784   : > { %v2522_v27 = vadd.f32 1e-05, %v2521_v26 }
 0x786   : > { %5574 = vrsqrt.f32 %v2522_v27  ;;  %vm2529_vm3 = vweird.f32 %v2522_v27 }
 0x78c   : > { %v5575_v28 = vpop.eup %5574 }
 0x78d   : > { %v2524_v29 = vmul.f32 %v5575_v28, %v2522_v27  ;;  %vm2530_vm2 = vweird.f32 %v5575_v28 }
 0x78e   : > { %vm2531_vm4 = vmor %vm2529_vm3, %vm2530_vm2  ;;  %vm2931_vm3 = vcmask 130048  }
 0x78f   : > { %v2525_v30 = vmul.f32 %v5575_v28, %v2524_v29 }
 0x791   : > { %v2526_v31 = vmul.f32 0.5, %v2525_v30 }
 0x793   : > { %v2527_v32 = vsub.f32 1.5, %v2526_v31 }
 0x795   : > { %v2528_v33 = vmul.f32 %v5575_v28, %v2527_v32 }
 0x797   : > { %v2532_v34 = vsel %vm2531_vm4, %v5575_v28, %v2528_v33  ;;  %vm3096_vm4 = vcmask 195584  }
 0x798   : > { %v2533_v36 = vmul.f32 %v2532_v34, %v2516_v22 }
 0x79a   : > { %vm2534_vm5 = vcmp.ge.f32.partialorder %v2533_v36, 0.0  ;;  %v2536_v37 = vmul.f32 %v2535_v35, %v2533_v36 }
 0x79c   : > { %v2537_v38 = vsel %vm2534_vm5, %v2533_v36, %v2536_v37  ;;  %vm3126_vm5 = vcmask 162816  }
 0x79d   : > { %v2558_v3 = vpack.c.bf16 %v2537_v38, %v2537_v38 }
 0x79f   : > { %v6294_v39 = vsel %vm2157_vm11, %v2558_v3, 0 }
 0x7a0   : > { %2641 = vmatpush.bf16.msra.mxu2 %v6294_v39 }
 0x7a3   : > { %5056 = vmatmul.msk.bf16.vlgmr.msra.gmra.mxu2 %vm1643_vm1, %v5379_v40 }
 0x7b3   : > { %5057 = vmatmul.msk.bf16.gmra.mxu2 %vm1643_vm1, %v5380_v41 }
 0x7c3   : > { %5058 = vmatmul.msk.bf16.gmra.mxu2 %vm1643_vm1, %v5381_v43 }
 0x7d3   : > { %5059 = vmatmul.msk.bf16.gmra.mxu2 %vm1643_vm1, %v5382_v44 }
 0x7e3   : > { %5060 = vmatmul.msk.bf16.gmra.mxu2 %vm1643_vm1, %v5383_v45 }
 0x7f3   : > { %5061 = vmatmul.msk.bf16.gmra.mxu2 %vm1643_vm1, %v5384_v46 }
 0x803   : > { %5062 = vmatmul.msk.bf16.gmra.mxu2 %vm1643_vm1, %v5385_v42 }
 0x813   : > { %5063 = vmatmul.msk.bf16.gmra.mxu2 %vm1643_vm1, %v5386_v48 }
 0x823   : > { %5064 = vmatmul.msk.bf16.gmra.mxu2 %vm1643_vm1, %v5387_v49 }
 0x826   : > { %v6315_v50 = vpop.f32.mrf.mxu2 }
 0x82e   : > { %v6317_v0 = vpop.f32.mrf.mxu2 }
 0x836   : > { %v2648_v6 = vpop.f32.mrf.mxu2 }
 0x837   : > { %2690 = vrot.lane.b32.xlu0 %v2648_v6, %s5768_s23 }
 0x83e   : > { %v2650_v47 = vpop.f32.mrf.mxu2 }
 0x83f   : > { %2692 = vrot.lane.b32.xlu0 %v2650_v47, %s5768_s23 }
 0x846   : > { %v2653_v9 = vpop.f32.mrf.mxu2 }
 0x847   : > { %2700 = vrot.lane.b32.xlu0 %v2653_v9, %s5769_s16 }
 0x84e   : > { %v2655_v10 = vpop.f32.mrf.mxu2 }
 0x84f   : > { %2702 = vrot.lane.b32.xlu1 %v2655_v10, %s5769_s16 }
 0x856   : > { %v2658_v15 = vpop.f32.mrf.mxu2 }
 0x857   : > { %2710 = vrot.lane.b32.xlu0 %v2658_v15, %s6653_s2 }
 0x85e   : > { %v2660_v20 = vpop.f32.mrf.mxu2 }
 0x85f   : > { %2712 = vrot.lane.b32.xlu0 %v2660_v20, %s6653_s2  ;;  %s5787_s2 = smov 115  }
 0x866   : > { %v2663_v5 = vpop.f32.mrf.mxu2 }
 0x867   : > { %2720 = vrot.lane.b32.xlu0 %v2663_v5, %s6651_s28 }
 0x86e   : > { %v2665_v21 = vpop.f32.mrf.mxu2 }
 0x876   : > { %v2668_v51 = vpop.f32.mrf.mxu2 }
 0x877   : > { %2730 = vrot.lane.b32.xlu2 %v2668_v51, %s5783_s18 }
 0x87e   : > { %v2670_v52 = vpop.f32.mrf.mxu2 }
 0x87f   : > { %2722 = vrot.lane.b32.xlu2 %v2665_v21, %s6651_s28  ;;  %s6684_s28 = sld [smem:[#allocation15_spill]] }
 0x886   : > { %v2673_v53 = vpop.f32.mrf.mxu2 }
 0x887   : > { %2740 = vrot.lane.b32.xlu0 %v2673_v53, %s5777_s11 }
 0x88e   : > { %v2675_v54 = vpop.f32.mrf.mxu2 }
 0x88f   : > { %2742 = vrot.lane.b32.xlu2 %v2675_v54, %s5777_s11 }
 0x896   : > { %v2678_v55 = vpop.f32.mrf.mxu2 }
 0x897   : > { %2750 = vrot.lane.b32.xlu0 %v2678_v55, %s5784_s7 }
 0x89e   : > { %v2680_v56 = vpop.f32.mrf.mxu2 }
 0x89f   : > { %2732 = vrot.lane.b32.xlu0 %v2670_v52, %s5783_s18 }
 0x8a6   : > { %v2683_v57 = vpop.f32.mrf.mxu2 }
 0x8a7   : > { %2760 = vrot.lane.b32.xlu1 %v2683_v57, %s5763_s22 }
 0x8a9   : > { %v2691_v63 = vpop.permute.xlu0 %2690 }
 0x8aa   : > { %v2696_v19 = vadd.f32 %v2691_v63, %v6315_v50 }
 0x8ae   : > { %v2685_v58 = vpop.f32.mrf.mxu2 }
 0x8af   : > { %2752 = vrot.lane.b32.xlu1 %v2680_v56, %s5784_s7  ;;  %2762 = vrot.lane.b32.xlu0 %v2685_v58, %s5763_s22  ;;  %s6681_s22 = sld [smem:[#allocation13_spill]] }
 0x8b0   : > { %s6683_s7 = sld [smem:[#allocation14_spill]] }
 0x8b1   : > { %v2693_v2 = vpop.permute.xlu0 %2692 }
 0x8b2   : > { %v2697_v28 = vadd.f32 %v2693_v2, %v6317_v0 }
 0x8b5   : > { %s6682_s11 = smov %s6681_s22  ;;  %v5568_v47 = vld [vmem:[%s6681_s22] ss:$0 sm:$0xff]  ;;  %s6655_s22 = smov 121  }
 0x8b9   : > { %v2701_v8 = vpop.permute.xlu0 %2700 }
 0x8ba   : > { %v2706_v22 = vadd.f32 %v2701_v8, %v2696_v19 }
 0x8c1   : > { %v2703_v27 = vpop.permute.xlu1 %2702 }
 0x8c2   : > { %v2707_v30 = vadd.f32 %v2703_v27, %v2697_v28  ;;  %v5388_v28 = vld [vmem:[%s6683_s7] sm:$0xff] }
 0x8c9   : > { %v2711_v11 = vpop.permute.xlu0 %2710 }
 0x8ca   : > { %v2716_v24 = vadd.f32 %v2711_v11, %v2706_v22 }
 0x8d1   : > { %v2713_v14 = vpop.permute.xlu0 %2712  ;;  %v2731_v23 = vpop.permute.xlu2 %2730 }
 0x8d2   : > { %v2717_v33 = vadd.f32 %v2713_v14, %v2707_v30  ;;  %v5390_v30 = vld [vmem:[%s6683_s7 + $0x10] sm:$0xff] }
 0x8d9   : > { %v2721_v17 = vpop.permute.xlu0 %2720  ;;  %v2723_v32 = vpop.permute.xlu2 %2722 }
 0x8da   : > { %v2726_v26 = vadd.f32 %v2721_v17, %v2716_v24  ;;  %v2727_v37 = vadd.f32 %v2723_v32, %v2717_v33  ;;  %v5392_v32 = vld [vmem:[%s6683_s7 + $0x20] sm:$0xff]  ;;  %v5393_v33 = vld [vmem:[%s6683_s7 + $0x28] sm:$0xff] }
 0x8dc   : > { %v2736_v29 = vadd.f32 %v2731_v23, %v2726_v26 }
 0x8e9   : > { %v2743_v40 = vpop.permute.xlu2 %2742 }
 0x8f9   : > { %v2741_v18 = vpop.permute.xlu0 %2740 }
 0x8fa   : > { %v2746_v31 = vadd.f32 %v2741_v18, %v2736_v29  ;;  %v2860_v18 = vstv %s5019_s20  ;;  %v5389_v29 = vld [vmem:[%s6683_s7 + $0x8] sm:$0xff]  ;;  %s5786_s20 = smov 120  }
 0x909   : > { %v2751_v25 = vpop.permute.xlu0 %2750 }
 0x90a   : > { %v2756_v34 = vadd.f32 %v2751_v25, %v2746_v31  ;;  %v5391_v31 = vld [vmem:[%s6683_s7 + $0x18] sm:$0xff] }
 0x911   : > { %v2733_v35 = vpop.permute.xlu0 %2732 }
 0x912   : > { %v2737_v3 = vadd.f32 %v2733_v35, %v2727_v37  ;;  %v5395_v35 = vld [vmem:[%s6683_s7 + $0x38] sm:$0xff] }
 0x914   : > { %v2747_v41 = vadd.f32 %v2743_v40, %v2737_v3 }
 0x919   : > { %v2761_v36 = vpop.permute.xlu1 %2760 }
 0x91a   : > { %v2766_v38 = vadd.f32 %v2761_v36, %v2756_v34  ;;  %v5394_v34 = vld [vmem:[%s6683_s7 + $0x30] sm:$0xff]  ;;  %v5396_v36 = vld [vmem:[%s6683_s7 + $0x40] sm:$0xff] }
 0x91c   : > { %5065 = vmatmul.msk.f32.vlgmr.msra.gmra.mxu3 %vm2778_vm8, %v2766_v38 }
 0x921   : > { %v2753_v43 = vpop.permute.xlu1 %2752  ;;  %v2763_v45 = vpop.permute.xlu0 %2762 }
 0x922   : > { %v2757_v44 = vadd.f32 %v2753_v43, %v2747_v41 }
 0x924   : > { %v2767_v46 = vadd.f32 %v2763_v45, %v2757_v44 }
 0x926   : > { %5066 = vmatmul.msk.f32.gmra.mxu3 %vm2778_vm8, %v2767_v46 }
 0x99f   : > { %v2802_v42 = vpop.f32.mrf.mxu3 }
 0x9a0   : > { %v2809_v48 = vsel %vm2808_vm9, %v2802_v42, 0.0 }
 0x9a1   : > { %2810 = vadd.xlane.f32.xlu2 %v2809_v48 }
 0x9a9   : > { %v2805_v49 = vpop.f32.mrf.mxu3 }
 0x9aa   : > { %v2812_v50 = vsel %vm2808_vm9, %v2805_v49, 0.0 }
 0x9ab   : > { %2813 = vadd.xlane.f32.xlu1 %v2812_v50 }
 0xa14   : > { %v2811_v0 = vpop.xlane.xlu2 %2810 }
 0xa15   : > { %v2815_v6 = vmul.f32 0.0625, %v2811_v0 }
 0xa17   : > { %v2817_v9 = vsub.f32 %v2802_v42, %v2815_v6 }
 0xa19   : > { %v2822_v10 = vmul.f32 %v5568_v47, %v2817_v9 }
 0xa1b   : > { %v2824_v15 = vmul.f32 %v2822_v10, %v2822_v10 }
 0xa1d   : > { %v2826_v20 = vsel %vm2808_vm9, %v2824_v15, 0.0  ;;  %v3095_v15 = vld [vmem:[%s6684_s28 + $0x10] sm:$0xff] }
 0xa1e   : > { %2827 = vadd.xlane.f32.xlu0 %v2826_v20  ;;  %v2814_v5 = vpop.xlane.xlu1 %2813  ;;  %3116 = vmatpush.msrb.mxu1 %v3095_v15  ;;  %v3094_v20 = vld [vmem:[%s6684_s28 + $0x8] sm:$0xff] }
 0xa1f   : > { %v2816_v21 = vmul.f32 0.0625, %v2814_v5 }
 0xa20   : > { %3117 = vmatpush.msrb.mxu1 %v3094_v20 }
 0xa21   : > { %v2818_v51 = vsub.f32 %v2805_v49, %v2816_v21  ;;  %v3093_v21 = vld [vmem:[%s6684_s28] sm:$0xff] }
 0xa22   : > { %3118 = vmatpush.msrb.mxu1 %v3093_v21 }
 0xa23   : > { %v2823_v52 = vmul.f32 %v5568_v47, %v2818_v51 }
 0xa25   : > { %v2825_v53 = vmul.f32 %v2823_v52, %v2823_v52 }
 0xa27   : > { %v2829_v54 = vsel %vm2808_vm9, %v2825_v53, 0.0 }
 0xa28   : > { %2830 = vadd.xlane.f32.xlu2 %v2829_v54 }
 0xa91   : > { %v2828_v55 = vpop.xlane.xlu0 %2827 }
 0xa92   : > { %v2832_v56 = vmul.f32 0.0625, %v2828_v55 }
 0xa94   : > { %v2834_v57 = vadd.f32 1e-05, %v2832_v56 }
 0xa96   : > { %5576 = vrsqrt.f32 %v2834_v57  ;;  %vm2842_vm13 = vweird.f32 %v2834_v57 }
 0xa9b   : > { %v2831_v58 = vpop.xlane.xlu2 %2830 }
 0xa9c   : > { %v5577_v59 = vpop.eup %5576  ;;  %v2833_v60 = vmul.f32 0.0625, %v2831_v58 }
 0xa9d   : > { %v2837_v61 = vmul.f32 %v5577_v59, %v2834_v57  ;;  %vm2843_vm10 = vweird.f32 %v5577_v59 }
 0xa9e   : > { %v2835_v62 = vadd.f32 1e-05, %v2833_v60  ;;  %vm2844_vm14 = vmor %vm2842_vm13, %vm2843_vm10 }
 0xa9f   : > { %v2838_v63 = vmul.f32 %v5577_v59, %v2837_v61 }
 0xaa0   : > { %5578 = vrsqrt.f32 %v2835_v62  ;;  %vm2852_vm0 = vweird.f32 %v2835_v62 }
 0xaa1   : > { %v2839_v2 = vmul.f32 0.5, %v2838_v63 }
 0xaa3   : > { %v2840_v4 = vsub.f32 1.5, %v2839_v2 }
 0xaa5   : > { %v2841_v8 = vmul.f32 %v5577_v59, %v2840_v4 }
 0xaa6   : > { %v5579_v7 = vpop.eup %5578 }
 0xaa7   : > { %v2847_v1 = vmul.f32 %v5579_v7, %v2835_v62  ;;  %v2845_v12 = vsel %vm2844_vm14, %v5577_v59, %v2841_v8  ;;  %vm2853_vm15 = vweird.f32 %v5579_v7 }
 0xaa8   : > { %v2856_v16 = vmul.f32 %v2845_v12, %v2822_v10  ;;  %vm2854_vm6 = vmor %vm2852_vm0, %vm2853_vm15 }
 0xaa9   : > { %v2848_v11 = vmul.f32 %v5579_v7, %v2847_v1 }
 0xaaa   : > { %v2861_v23 = vmul.f32 %v2860_v18, %v2856_v16  ;;  %vm2858_vm7 = vcmp.ge.f32.partialorder %v2856_v16, 0.0 }
 0xaab   : > { %v2849_v13 = vmul.f32 0.5, %v2848_v11 }
 0xaac   : > { %v2863_v25 = vsel %vm2858_vm7, %v2856_v16, %v2861_v23 }
 0xaad   : > { %v2850_v14 = vsub.f32 1.5, %v2849_v13 }
 0xaaf   : > { %v2851_v17 = vmul.f32 %v5579_v7, %v2850_v14 }
 0xab1   : > { %v2855_v19 = vsel %vm2854_vm6, %v5579_v7, %v2851_v17 }
 0xab2   : > { %v2857_v22 = vmul.f32 %v2855_v19, %v2823_v52 }
 0xab4   : > { %vm2859_vm2 = vcmp.ge.f32.partialorder %v2857_v22, 0.0  ;;  %v2862_v24 = vmul.f32 %v2860_v18, %v2857_v22 }
 0xab6   : > { %v2864_v26 = vsel %vm2859_vm2, %v2857_v22, %v2862_v24 }
 0xab7   : > { %v6352_v27 = vpack.c.bf16 %v2864_v26, %v2863_v25 }
 0xab9   : > { %2966 = vmatpush.bf16.msra.mxu0 %v6352_v27 }
 0xabc   : > { %5104 = vmatmul.msk.bf16.vlgmr.msra.gmra.mxu0 %vm2931_vm3, %v5388_v28 }
 0xacc   : > { %5105 = vmatmul.msk.bf16.gmra.mxu0 %vm2931_vm3, %v5389_v29 }
 0xadc   : > { %5106 = vmatmul.msk.bf16.gmra.mxu0 %vm2931_vm3, %v5390_v30 }
 0xaec   : > { %5107 = vmatmul.msk.bf16.gmra.mxu0 %vm2931_vm3, %v5391_v31 }
 0xafc   : > { %5108 = vmatmul.msk.bf16.gmra.mxu0 %vm2931_vm3, %v5392_v32 }
 0xb0c   : > { %5109 = vmatmul.msk.bf16.gmra.mxu0 %vm2931_vm3, %v5393_v33 }
 0xb1c   : > { %5110 = vmatmul.msk.bf16.gmra.mxu0 %vm2931_vm3, %v5394_v34 }
 0xb2c   : > { %5111 = vmatmul.msk.bf16.gmra.mxu0 %vm2931_vm3, %v5395_v35 }
 0xb39   : > { %v2968_v37 = vpop.f32.mrf.mxu0 }
 0xb3c   : > { %5112 = vmatmul.msk.bf16.gmra.mxu0 %vm2931_vm3, %v5396_v36 }
 0xb41   : > { %v6373_v38 = vpop.f32.mrf.mxu0 }
 0xb49   : > { %v2973_v3 = vpop.f32.mrf.mxu0 }
 0xb4a   : > { %3015 = vrot.lane.b32.xlu1 %v2973_v3, %s5768_s23 }
 0xb51   : > { %v2975_v40 = vpop.f32.mrf.mxu0 }
 0xb52   : > { %3017 = vrot.lane.b32.xlu1 %v2975_v40, %s5768_s23 }
 0xb59   : > { %v2978_v41 = vpop.f32.mrf.mxu0 }
 0xb5a   : > { %3025 = vrot.lane.b32.xlu0 %v2978_v41, %s5769_s16 }
 0xb61   : > { %v2980_v43 = vpop.f32.mrf.mxu0 }
 0xb62   : > { %3027 = vrot.lane.b32.xlu0 %v2980_v43, %s5769_s16 }
 0xb69   : > { %v2983_v44 = vpop.f32.mrf.mxu0 }
 0xb6a   : > { %3035 = vrot.lane.b32.xlu2 %v2983_v44, %s6657_s1 }
 0xb71   : > { %v2985_v45 = vpop.f32.mrf.mxu0 }
 0xb72   : > { %3037 = vrot.lane.b32.xlu2 %v2985_v45, %s6657_s1 }
 0xb79   : > { %v2988_v46 = vpop.f32.mrf.mxu0 }
 0xb7a   : > { %3045 = vrot.lane.b32.xlu0 %v2988_v46, %s6655_s22 }
 0xb81   : > { %v2990_v42 = vpop.f32.mrf.mxu0 }
 0xb82   : > { %3047 = vrot.lane.b32.xlu1 %v2990_v42, %s6655_s22  ;;  %s5788_s22 = smov 114  }
 0xb89   : > { %v2993_v48 = vpop.f32.mrf.mxu0 }
 0xb8a   : > { %3055 = vrot.lane.b32.xlu2 %v2993_v48, %s5786_s20 }
 0xb91   : > { %v2995_v49 = vpop.f32.mrf.mxu0 }
 0xb99   : > { %v2998_v50 = vpop.f32.mrf.mxu0 }
 0xb9a   : > { %3065 = vrot.lane.b32.xlu1 %v2998_v50, %s5783_s18 }
 0xba1   : > { %v3000_v0 = vpop.f32.mrf.mxu0 }
 0xba2   : > { %3067 = vrot.lane.b32.xlu1 %v3000_v0, %s5783_s18  ;;  %s5067_s18 = sld [smem:[#allocation2 + $0x4]] }
 0xba9   : > { %v3003_v6 = vpop.f32.mrf.mxu0 }
 0xbaa   : > { %3075 = vrot.lane.b32.xlu0 %v3003_v6, %s5787_s2 }
 0xbb1   : > { %v3005_v47 = vpop.f32.mrf.mxu0 }
 0xbb2   : > { %3057 = vrot.lane.b32.xlu0 %v2995_v49, %s5786_s20 }
 0xbb9   : > { %v3008_v9 = vpop.f32.mrf.mxu0 }
 0xbba   : > { %3085 = vrot.lane.b32.xlu2 %v3008_v9, %s5788_s22 }
 0xbbc   : > { %v3016_v5 = vpop.permute.xlu1 %3015 }
 0xbbd   : > { %v3021_v55 = vadd.f32 %v3016_v5, %v2968_v37 }
 0xbc1   : > { %v3010_v10 = vpop.f32.mrf.mxu0 }
 0xbc2   : > { %3077 = vrot.lane.b32.xlu2 %v3005_v47, %s5787_s2  ;;  %3087 = vrot.lane.b32.xlu0 %v3010_v10, %s5788_s22  ;;  %s6685_s2 = sld [smem:[#allocation16_spill]] }
 0xbc3   : > { %s6686_s22 = sld [smem:[#allocation17_spill]] }
 0xbc4   : > { %v3036_v52 = vpop.permute.xlu2 %3035  ;;  %v3018_v53 = vpop.permute.xlu1 %3017 }
 0xbc5   : > { %v3022_v12 = vadd.f32 %v3018_v53, %v6373_v38 }
 0xbc8   : > { %v6396_v34 = vld [vmem:[%s6685_s2] ss:$0 sm:$0xff] }
 0xbc9   : > { %s6687_s2 = smov %s6686_s22 }
 0xbcc   : > { %v3026_v51 = vpop.permute.xlu0 %3025  ;;  %v3038_v56 = vpop.permute.xlu2 %3037 }
 0xbcd   : > { %v3031_v57 = vadd.f32 %v3026_v51, %v3021_v55 }
 0xbcf   : > { %v3041_v60 = vadd.f32 %v3036_v52, %v3031_v57  ;;  %v3178_v57 = vstv %s5067_s18  ;;  %s6688_s18 = sld [smem:[#allocation18_spill]] }
 0xbd4   : > { %v3028_v54 = vpop.permute.xlu0 %3027 }
 0xbd5   : > { %v3032_v13 = vadd.f32 %v3028_v54, %v3022_v12  ;;  %v5402_v12 = vld [vmem:[%s6687_s2 + $0x28] sm:$0xff] }
 0xbd7   : > { %v3042_v14 = vadd.f32 %v3038_v56, %v3032_v13  ;;  %v5403_v13 = vld [vmem:[%s6687_s2 + $0x30] sm:$0xff] }
 0xbe4   : > { %v3056_v62 = vpop.permute.xlu2 %3055 }
 0xbec   : > { %v3046_v59 = vpop.permute.xlu0 %3045 }
 0xbed   : > { %v3051_v61 = vadd.f32 %v3046_v59, %v3041_v60 }
 0xbef   : > { %v3061_v2 = vadd.f32 %v3056_v62, %v3051_v61 }
 0xbf4   : > { %v3048_v58 = vpop.permute.xlu1 %3047 }
 0xbf5   : > { %v3052_v17 = vadd.f32 %v3048_v58, %v3042_v14  ;;  %v5404_v14 = vld [vmem:[%s6687_s2 + $0x38] sm:$0xff] }
 0xc0c   : > { %v3066_v63 = vpop.permute.xlu1 %3065 }
 0xc0d   : > { %v3071_v4 = vadd.f32 %v3066_v63, %v3061_v2 }
 0xc14   : > { %v3086_v1 = vpop.permute.xlu2 %3085  ;;  %v3068_v19 = vpop.permute.xlu1 %3067 }
 0xc1c   : > { %v3076_v7 = vpop.permute.xlu0 %3075  ;;  %v3078_v23 = vpop.permute.xlu2 %3077 }
 0xc1d   : > { %v3081_v8 = vadd.f32 %v3076_v7, %v3071_v4  ;;  %v5397_v4 = vld [vmem:[%s6686_s22] sm:$0xff]  ;;  %v5398_v7 = vld [vmem:[%s6687_s2 + $0x8] sm:$0xff]  ;;  %s6689_s22 = smov 118  }
 0xc1f   : > { %v3091_v11 = vadd.f32 %v3086_v1, %v3081_v8  ;;  %v5399_v8 = vld [vmem:[%s6687_s2 + $0x10] sm:$0xff]  ;;  %v5400_v1 = vld [vmem:[%s6687_s2 + $0x18] sm:$0xff] }
 0xc21   : > { %5113 = vmatmul.msk.f32.vlgmr.msrb.gmra.mxu1 %vm3096_vm4, %v3091_v11  ;;  %v5401_v11 = vld [vmem:[%s6687_s2 + $0x20] sm:$0xff] }
 0xc24   : > { %v3058_v16 = vpop.permute.xlu0 %3057 }
 0xc25   : > { %v3062_v18 = vadd.f32 %v3058_v16, %v3052_v17  ;;  %v5405_v16 = vld [vmem:[%s6687_s2 + $0x40] sm:$0xff]  ;;  %s6697_s2 = smov 121  }
 0xc27   : > { %v3072_v22 = vadd.f32 %v3068_v19, %v3062_v18 }
 0xc29   : > { %v3082_v24 = vadd.f32 %v3078_v23, %v3072_v22 }
 0xc34   : > { %v3088_v25 = vpop.permute.xlu0 %3087 }
 0xc35   : > { %v3092_v26 = vadd.f32 %v3088_v25, %v3082_v24 }
 0xc37   : > { %5114 = vmatmul.msk.f32.gmra.mxu1 %vm3096_vm4, %v3092_v26 }
 0xc9e   : > { %v3120_v28 = vpop.f32.mrf.mxu1 }
 0xc9f   : > { %v3127_v29 = vsel %vm3126_vm5, %v3120_v28, 0.0 }
 0xca0   : > { %3128 = vadd.xlane.f32.xlu1 %v3127_v29 }
 0xcb4   : > { %v3123_v30 = vpop.f32.mrf.mxu1 }
 0xcb5   : > { %v3130_v31 = vsel %vm3126_vm5, %v3123_v30, 0.0 }
 0xcb6   : > { %3131 = vadd.xlane.f32.xlu2 %v3130_v31 }
 0xd13   : > { %v3129_v32 = vpop.xlane.xlu1 %3128 }
 0xd14   : > { %v3133_v33 = vmul.f32 0.25, %v3129_v32 }
 0xd16   : > { %v3135_v35 = vsub.f32 %v3120_v28, %v3133_v33 }
 0xd18   : > { %v3140_v36 = vmul.f32 %v6396_v34, %v3135_v35 }
 0xd1a   : > { %v3142_v37 = vmul.f32 %v3140_v36, %v3140_v36 }
 0xd1c   : > { %v3144_v38 = vsel %vm3126_vm5, %v3142_v37, 0.0 }
 0xd1d   : > { %3145 = vadd.xlane.f32.xlu0 %v3144_v38 }
 0xd29   : > { %v3132_v3 = vpop.xlane.xlu2 %3131 }
 0xd2a   : > { %v3134_v40 = vmul.f32 0.25, %v3132_v3 }
 0xd2c   : > { %v3136_v41 = vsub.f32 %v3123_v30, %v3134_v40  ;;  %v3409_v40 = vld [vmem:[%s6688_s18] sm:$0xff]  ;;  %s5115_s18 = sld [smem:[#allocation2 + $0x5]] }
 0xd2d   : > { %3431 = vmatpush.msra.mxu1 %v3409_v40 }
 0xd2e   : > { %v3141_v43 = vmul.f32 %v6396_v34, %v3136_v41 }
 0xd30   : > { %v3143_v44 = vmul.f32 %v3141_v43, %v3141_v43 }
 0xd32   : > { %v3147_v45 = vsel %vm3126_vm5, %v3143_v44, 0.0 }
 0xd33   : > { %3148 = vadd.xlane.f32.xlu1 %v3147_v45 }
 0xd90   : > { %v3146_v46 = vpop.xlane.xlu0 %3145 }
 0xd91   : > { %v3150_v42 = vmul.f32 0.25, %v3146_v46 }
 0xd93   : > { %v3152_v48 = vadd.f32 1e-05, %v3150_v42 }
 0xd95   : > { %5580 = vrsqrt.f32 %v3152_v48  ;;  %vm3160_vm13 = vweird.f32 %v3152_v48 }
 0xd9b   : > { %v5581_v49 = vpop.eup %5580 }
 0xd9c   : > { %v3155_v50 = vmul.f32 %v5581_v49, %v3152_v48  ;;  %vm3161_vm10 = vweird.f32 %v5581_v49 }
 0xd9d   : > { %vm3162_vm14 = vmor %vm3160_vm13, %vm3161_vm10 }
 0xd9e   : > { %v3156_v0 = vmul.f32 %v5581_v49, %v3155_v50 }
 0xda0   : > { %v3157_v10 = vmul.f32 0.5, %v3156_v0 }
 0xda2   : > { %v3158_v15 = vsub.f32 1.5, %v3157_v10 }
 0xda4   : > { %v3159_v5 = vmul.f32 %v5581_v49, %v3158_v15 }
 0xda6   : > { %v3149_v6 = vpop.xlane.xlu1 %3148  ;;  %v3163_v52 = vsel %vm3162_vm14, %v5581_v49, %v3159_v5 }
 0xda7   : > { %v3151_v47 = vmul.f32 0.25, %v3149_v6  ;;  %v3174_v55 = vmul.f32 %v3163_v52, %v3140_v36 }
 0xda9   : > { %v3153_v9 = vadd.f32 1e-05, %v3151_v47  ;;  %v3179_v60 = vmul.f32 %v3178_v57, %v3174_v55  ;;  %vm3176_vm7 = vcmp.ge.f32.partialorder %v3174_v55, 0.0 }
 0xdab   : > { %5582 = vrsqrt.f32 %v3153_v9  ;;  %vm3170_vm0 = vweird.f32 %v3153_v9  ;;  %v3181_v62 = vsel %vm3176_vm7, %v3174_v55, %v3179_v60 }
 0xdb1   : > { %v5583_v20 = vpop.eup %5582 }
 0xdb2   : > { %v3165_v21 = vmul.f32 %v5583_v20, %v3153_v9  ;;  %vm3171_vm15 = vweird.f32 %v5583_v20 }
 0xdb3   : > { %vm3172_vm6 = vmor %vm3170_vm0, %vm3171_vm15 }
 0xdb4   : > { %v3166_v51 = vmul.f32 %v5583_v20, %v3165_v21 }
 0xdb6   : > { %v3167_v53 = vmul.f32 0.5, %v3166_v51 }
 0xdb8   : > { %v3168_v54 = vsub.f32 1.5, %v3167_v53 }
 0xdba   : > { %v3169_v56 = vmul.f32 %v5583_v20, %v3168_v54 }
 0xdbc   : > { %v3173_v58 = vsel %vm3172_vm6, %v5583_v20, %v3169_v56 }
 0xdbd   : > { %v3175_v59 = vmul.f32 %v3173_v58, %v3141_v43 }
 0xdbf   : > { %vm3177_vm2 = vcmp.ge.f32.partialorder %v3175_v59, 0.0  ;;  %v3180_v61 = vmul.f32 %v3178_v57, %v3175_v59 }
 0xdc1   : > { %v3182_v63 = vsel %vm3177_vm2, %v3175_v59, %v3180_v61 }
 0xdc2   : > { %v3202_v2 = vpack.c.bf16 %v3182_v63, %v3181_v62 }
 0xdc4   : > { %3282 = vmatpush.bf16.msrb.mxu3 %v3202_v2  ;;  %3735 = vmatpush.bf16.msrb.mxu2 %v3202_v2 }
 0xdc7   : > { %5152 = vmatmul.msk.bf16.vlgmr.msrb.gmra.mxu3 %vm2931_vm3, %v5397_v4 }
 0xdd7   : > { %5153 = vmatmul.msk.bf16.gmra.mxu3 %vm2931_vm3, %v5398_v7 }
 0xde7   : > { %5154 = vmatmul.msk.bf16.gmra.mxu3 %vm2931_vm3, %v5399_v8 }
 0xdf7   : > { %5155 = vmatmul.msk.bf16.gmra.mxu3 %vm2931_vm3, %v5400_v1 }
 0xe07   : > { %5156 = vmatmul.msk.bf16.gmra.mxu3 %vm2931_vm3, %v5401_v11 }
 0xe17   : > { %5157 = vmatmul.msk.bf16.gmra.mxu3 %vm2931_vm3, %v5402_v12 }
 0xe27   : > { %5158 = vmatmul.msk.bf16.gmra.mxu3 %vm2931_vm3, %v5403_v13 }
 0xe37   : > { %5159 = vmatmul.msk.bf16.gmra.mxu3 %vm2931_vm3, %v5404_v14 }
 0xe47   : > { %5160 = vmatmul.msk.bf16.gmra.mxu3 %vm2931_vm3, %v5405_v16 }
 0xe4a   : > { %v3284_v17 = vpop.f32.mrf.mxu3 }
 0xe52   : > { %v3286_v18 = vpop.f32.mrf.mxu3 }
 0xe5a   : > { %v3289_v19 = vpop.f32.mrf.mxu3 }
 0xe5b   : > { %3331 = vrot.lane.b32.xlu2 %v3289_v19, %s5768_s23 }
 0xe62   : > { %v3291_v22 = vpop.f32.mrf.mxu3 }
 0xe63   : > { %3333 = vrot.lane.b32.xlu0 %v3291_v22, %s5768_s23 }
 0xe6a   : > { %v3294_v23 = vpop.f32.mrf.mxu3 }
 0xe6b   : > { %3341 = vrot.lane.b32.xlu0 %v3294_v23, %s5769_s16 }
 0xe72   : > { %v3296_v24 = vpop.f32.mrf.mxu3 }
 0xe73   : > { %3343 = vrot.lane.b32.xlu0 %v3296_v24, %s5769_s16  ;;  %s5789_s16 = smov 119  }
 0xe7a   : > { %v3299_v25 = vpop.f32.mrf.mxu3 }
 0xe7b   : > { %3351 = vrot.lane.b32.xlu1 %v3299_v25, %s5767_s15 }
 0xe82   : > { %v3301_v26 = vpop.f32.mrf.mxu3 }
 0xe83   : > { %3353 = vrot.lane.b32.xlu2 %v3301_v26, %s5767_s15 }
 0xe8a   : > { %v3304_v28 = vpop.f32.mrf.mxu3 }
 0xe8b   : > { %3361 = vrot.lane.b32.xlu2 %v3304_v28, %s5771_s10 }
 0xe92   : > { %v3306_v29 = vpop.f32.mrf.mxu3 }
 0xe93   : > { %3363 = vrot.lane.b32.xlu1 %v3306_v29, %s5771_s10 }
 0xe9a   : > { %v3309_v30 = vpop.f32.mrf.mxu3 }
 0xe9b   : > { %3371 = vrot.lane.b32.xlu2 %v3309_v30, %s6657_s1 }
 0xea2   : > { %v3311_v31 = vpop.f32.mrf.mxu3 }
 0xeaa   : > { %v3314_v32 = vpop.f32.mrf.mxu3 }
 0xeab   : > { %3381 = vrot.lane.b32.xlu1 %v3314_v32, %s5786_s20 }
 0xeb2   : > { %v3316_v33 = vpop.f32.mrf.mxu3 }
 0xeb3   : > { %3383 = vrot.lane.b32.xlu1 %v3316_v33, %s5786_s20  ;;  %s6690_s20 = sld [smem:[#allocation19_spill]] }
 0xeb5   : > { %v3332_v3 = vpop.permute.xlu2 %3331 }
 0xeb6   : > { %v3337_v42 = vadd.f32 %v3332_v3, %v3284_v17 }
 0xeb9   : > { %v5406_v29 = vld [vmem:[%s6690_s20] sm:$0xff] }
 0xeba   : > { %v3319_v35 = vpop.f32.mrf.mxu3  ;;  %5245 = vmatmul.msk.bf16.vlgmr.msrb.gmra.mxu2 %vm2931_vm3, %v5406_v29 }
 0xebb   : > { %3391 = vrot.lane.b32.xlu0 %v3319_v35, %s5789_s16 }
 0xec2   : > { %v3321_v36 = vpop.f32.mrf.mxu3 }
 0xec3   : > { %3373 = vrot.lane.b32.xlu0 %v3311_v31, %s6657_s1  ;;  %s6694_s1 = sld [smem:[#allocation23_spill]] }
 0xeca   : > { %v3324_v37 = vpop.f32.mrf.mxu3 }
 0xecb   : > { %3401 = vrot.lane.b32.xlu2 %v3324_v37, %s6689_s22 }
 0xed2   : > { %v3326_v38 = vpop.f32.mrf.mxu3 }
 0xed3   : > { %3393 = vrot.lane.b32.xlu2 %v3321_v36, %s5789_s16  ;;  %3403 = vrot.lane.b32.xlu0 %v3326_v38, %s6689_s22  ;;  %v5407_v36 = vld [vmem:[%s6690_s20 + $0x8] sm:$0xff]  ;;  %s6691_s16 = sld [smem:[#allocation20_spill]] }
 0xed4   : > { %5246 = vmatmul.msk.bf16.gmra.mxu2 %vm2931_vm3, %v5407_v36 }
 0xed5   : > { %v3334_v41 = vpop.permute.xlu0 %3333 }
 0xed6   : > { %v3338_v52 = vadd.f32 %v3334_v41, %v3286_v18 }
 0xedd   : > { %v3354_v43 = vpop.permute.xlu2 %3353  ;;  %v3342_v45 = vpop.permute.xlu0 %3341 }
 0xede   : > { %v3347_v49 = vadd.f32 %v3342_v45, %v3337_v42 }
 0xee5   : > { %v3362_v46 = vpop.permute.xlu2 %3361  ;;  %v3344_v0 = vpop.permute.xlu0 %3343 }
 0xee6   : > { %v3348_v53 = vadd.f32 %v3344_v0, %v3338_v52  ;;  %v5410_v52 = vld [vmem:[%s6690_s20 + $0x20] sm:$0xff] }
 0xee8   : > { %v3358_v54 = vadd.f32 %v3354_v43, %v3348_v53  ;;  %v5417_v53 = vld [vmem:[%s6691_s16 + $0x10] sm:$0xff] }
 0xeed   : > { %v3352_v44 = vpop.permute.xlu1 %3351 }
 0xeee   : > { %v3357_v50 = vadd.f32 %v3352_v44, %v3347_v49 }
 0xef0   : > { %v3367_v47 = vadd.f32 %v3362_v46, %v3357_v50  ;;  %v5408_v46 = vld [vmem:[%s6690_s20 + $0x10] sm:$0xff]  ;;  %v3487_v50 = vstv %s5115_s18  ;;  %s6692_s18 = sld [smem:[#allocation21_spill]] }
 0xef1   : > { %5247 = vmatmul.msk.bf16.gmra.mxu2 %vm2931_vm3, %v5408_v46 }
 0xef5   : > { %v3372_v6 = vpop.permute.xlu2 %3371 }
 0xef6   : > { %v3377_v10 = vadd.f32 %v3372_v6, %v3367_v47 }
 0xf05   : > { %v3364_v48 = vpop.permute.xlu1 %3363 }
 0xf06   : > { %v3368_v56 = vadd.f32 %v3364_v48, %v3358_v54  ;;  %v5418_v54 = vld [vmem:[%s6691_s16 + $0x18] sm:$0xff] }
 0xf1d   : > { %v3382_v9 = vpop.permute.xlu1 %3381 }
 0xf1e   : > { %v3387_v15 = vadd.f32 %v3382_v9, %v3377_v10 }
 0xf25   : > { %v3402_v21 = vpop.permute.xlu2 %3401  ;;  %v3384_v58 = vpop.permute.xlu1 %3383 }
 0xf2d   : > { %v3392_v20 = vpop.permute.xlu0 %3391  ;;  %v3394_v60 = vpop.permute.xlu2 %3393 }
 0xf2e   : > { %v3397_v5 = vadd.f32 %v3392_v20, %v3387_v15 }
 0xf30   : > { %v3407_v51 = vadd.f32 %v3402_v21, %v3397_v5  ;;  %v5415_v5 = vld [vmem:[%s6691_s16] sm:$0xff]  ;;  %v5409_v21 = vld [vmem:[%s6690_s20 + $0x18] sm:$0xff] }
 0xf31   : > { %5248 = vmatmul.msk.bf16.gmra.mxu2 %vm2931_vm3, %v5409_v21 }
 0xf32   : > { %5161 = vmatmul.msk.f32.vlgmr.msra.gmra.mxu1 %vm1643_vm1, %v3407_v51  ;;  %v5416_v51 = vld [vmem:[%s6691_s16 + $0x8] sm:$0xff] }
 0xf35   : > { %v3374_v55 = vpop.permute.xlu0 %3373 }
 0xf36   : > { %v3378_v57 = vadd.f32 %v3374_v55, %v3368_v56  ;;  %v5412_v55 = vld [vmem:[%s6690_s20 + $0x30] sm:$0xff]  ;;  %v5419_v56 = vld [vmem:[%s6691_s16 + $0x20] sm:$0xff] }
 0xf38   : > { %v3388_v59 = vadd.f32 %v3384_v58, %v3378_v57  ;;  %v5413_v57 = vld [vmem:[%s6690_s20 + $0x38] sm:$0xff]  ;;  %v5420_v58 = vld [vmem:[%s6691_s16 + $0x28] sm:$0xff] }
 0xf3a   : > { %v3398_v61 = vadd.f32 %v3394_v60, %v3388_v59  ;;  %v5414_v59 = vld [vmem:[%s6690_s20 + $0x40] sm:$0xff]  ;;  %v5421_v60 = vld [vmem:[%s6691_s16 + $0x30] sm:$0xff] }
 0xf41   : > { %5249 = vmatmul.msk.bf16.gmra.mxu2 %vm2931_vm3, %v5410_v52  ;;  %v5254_v52 = vld [vmem:[%s6692_s18 + $0x8] sm:$0xff] }
 0xf42   : > { %3820 = vmatpush.msrb.mxu0 %v5254_v52 }
 0xf45   : > { %v3404_v62 = vpop.permute.xlu0 %3403 }
 0xf46   : > { %v3408_v63 = vadd.f32 %v3404_v62, %v3398_v61  ;;  %v3737_v61 = vpop.f32.mrf.mxu2 }
 0xf48   : > { %5162 = vmatmul.msk.f32.gmra.mxu1 %vm1643_vm1, %v3408_v63  ;;  %v5422_v63 = vld [vmem:[%s6691_s16 + $0x38] sm:$0xff] }
 0xf4e   : > { %v6476_v62 = vpop.f32.mrf.mxu2 }
 0xfaf   : > { %v3433_v2 = vpop.f32.mrf.mxu1 }
 0xfb0   : > { %v3439_v4 = vsel %vm3126_vm5, %v3433_v2, 0.0 }
 0xfb1   : > { %3440 = vadd.xlane.f32.xlu1 %v3439_v4 }
 0xfc5   : > { %v3436_v7 = vpop.f32.mrf.mxu1 }
 0xfc6   : > { %v3442_v8 = vsel %vm3126_vm5, %v3436_v7, 0.0 }
 0xfc7   : > { %3443 = vadd.xlane.f32.xlu2 %v3442_v8 }
0x1024   : > { %v3441_v1 = vpop.xlane.xlu1 %3440 }
0x1025   : > { %v3445_v11 = vmul.f32 0.25, %v3441_v1 }
0x1027   : > { %v3447_v12 = vsub.f32 %v3433_v2, %v3445_v11  ;;  %v3742_v2 = vpop.f32.mrf.mxu2 }
0x1029   : > { %v3449_v13 = vmul.f32 %v6396_v34, %v3447_v12 }
0x102b   : > { %v3451_v14 = vmul.f32 %v3449_v13, %v3449_v13 }
0x102d   : > { %v3453_v16 = vsel %vm3126_vm5, %v3451_v14, 0.0 }
0x102e   : > { %3454 = vadd.xlane.f32.xlu0 %v3453_v16 }
0x102f   : > { %v6480_v4 = vpop.f32.mrf.mxu2 }
0x1037   : > { %v3747_v12 = vpop.f32.mrf.mxu2 }
0x103a   : > { %v3444_v17 = vpop.xlane.xlu2 %3443 }
0x103b   : > { %v3446_v18 = vmul.f32 0.25, %v3444_v17 }
0x103d   : > { %v3448_v19 = vsub.f32 %v3436_v7, %v3446_v18  ;;  %v5423_v7 = vld [vmem:[%s6691_s16 + $0x40] sm:$0xff] }
0x103f   : > { %v3450_v22 = vmul.f32 %v6396_v34, %v3448_v19  ;;  %v3749_v16 = vpop.f32.mrf.mxu2 }
0x1041   : > { %v3452_v23 = vmul.f32 %v3450_v22, %v3450_v22 }
0x1043   : > { %v3456_v24 = vsel %vm3126_vm5, %v3452_v23, 0.0 }
0x1044   : > { %3457 = vadd.xlane.f32.xlu1 %v3456_v24 }
0x1047   : > { %v3752_v18 = vpop.f32.mrf.mxu2 }
0x104f   : > { %v3754_v23 = vpop.f32.mrf.mxu2 }
0x10a1   : > { %v3455_v25 = vpop.xlane.xlu0 %3454 }
0x10a2   : > { %v3459_v26 = vmul.f32 0.25, %v3455_v25 }
0x10a4   : > { %v3461_v28 = vadd.f32 1e-05, %v3459_v26  ;;  %v3757_v26 = vpop.f32.mrf.mxu2 }
0x10a6   : > { %5584 = vrsqrt.f32 %v3461_v28  ;;  %vm3469_vm10 = vweird.f32 %v3461_v28 }
0x10ac   : > { %v5585_v30 = vpop.eup %5584  ;;  %v3759_v29 = vpop.f32.mrf.mxu2 }
0x10ad   : > { %v3464_v31 = vmul.f32 %v5585_v30, %v3461_v28  ;;  %vm3470_vm5 = vweird.f32 %v5585_v30 }
0x10ae   : > { %vm3471_vm13 = vmor %vm3469_vm10, %vm3470_vm5 }
0x10af   : > { %v3465_v32 = vmul.f32 %v5585_v30, %v3464_v31 }
0x10b1   : > { %v3466_v34 = vmul.f32 0.5, %v3465_v32 }
0x10b3   : > { %v3467_v38 = vsub.f32 1.5, %v3466_v34 }
0x10b5   : > { %v3468_v40 = vmul.f32 %v5585_v30, %v3467_v38 }
0x10b7   : > { %v3458_v33 = vpop.xlane.xlu1 %3457  ;;  %v3472_v44 = vsel %vm3471_vm13, %v5585_v30, %v3468_v40 }
0x10b8   : > { %v3460_v35 = vmul.f32 0.25, %v3458_v33  ;;  %v3483_v48 = vmul.f32 %v3472_v44, %v3449_v13 }
0x10ba   : > { %v3462_v37 = vadd.f32 1e-05, %v3460_v35  ;;  %v3488_v47 = vmul.f32 %v3487_v50, %v3483_v48  ;;  %vm3485_vm6 = vcmp.ge.f32.partialorder %v3483_v48, 0.0 }
0x10bc   : > { %5586 = vrsqrt.f32 %v3462_v37  ;;  %vm3479_vm15 = vweird.f32 %v3462_v37  ;;  %v3490_v10 = vsel %vm3485_vm6, %v3483_v48, %v3488_v47 }
0x10c2   : > { %v5587_v3 = vpop.eup %5586 }
0x10c3   : > { %v3474_v41 = vmul.f32 %v5587_v3, %v3462_v37  ;;  %vm3480_vm14 = vweird.f32 %v5587_v3 }
0x10c4   : > { %vm3481_vm0 = vmor %vm3479_vm15, %vm3480_vm14 }
0x10c5   : > { %v3475_v43 = vmul.f32 %v5587_v3, %v3474_v41 }
0x10c7   : > { %v3476_v45 = vmul.f32 0.5, %v3475_v43 }
0x10c9   : > { %v3477_v42 = vsub.f32 1.5, %v3476_v45 }
0x10cb   : > { %v3478_v49 = vmul.f32 %v5587_v3, %v3477_v42 }
0x10cd   : > { %v3482_v0 = vsel %vm3481_vm0, %v5587_v3, %v3478_v49 }
0x10ce   : > { %v3484_v6 = vmul.f32 %v3482_v0, %v3450_v22 }
0x10d0   : > { %vm3486_vm7 = vcmp.ge.f32.partialorder %v3484_v6, 0.0  ;;  %v3489_v9 = vmul.f32 %v3487_v50, %v3484_v6 }
0x10d2   : > { %v3491_v15 = vsel %vm3486_vm7, %v3484_v6, %v3489_v9 }
0x10d3   : > { %v3529_v20 = vpack.c.bf16 %v3491_v15, %v3490_v10 }
0x10d5   : > { %3609 = vmatpush.bf16.msrb.mxu1 %v3529_v20 }
0x10d8   : > { %5200 = vmatmul.msk.bf16.vlgmr.msrb.gmra.mxu1 %vm2931_vm3, %v5415_v5 }
0x10d9   : > { %4164 = vmatpush.bf16.msra.mxu1 %v6352_v27  ;;  %v5411_v27 = vld [vmem:[%s6690_s20 + $0x28] sm:$0xff] }
0x10da   : > { %5250 = vmatmul.msk.bf16.gmra.mxu2 %vm2931_vm3, %v5411_v27 }
0x10e8   : > { %5201 = vmatmul.msk.bf16.gmra.mxu1 %vm2931_vm3, %v5416_v51  ;;  %v3782_v51 = vld [vmem:[%s6692_s18] sm:$0xff] }
0x10e9   : > { %3853 = vmatpush.msra.mxu3 %v3782_v51 }
0x10ea   : > { %5251 = vmatmul.msk.bf16.gmra.mxu2 %vm2931_vm3, %v5412_v55 }
0x10f8   : > { %5202 = vmatmul.msk.bf16.gmra.mxu1 %vm2931_vm3, %v5417_v53 }
0x10fa   : > { %5252 = vmatmul.msk.bf16.gmra.mxu2 %vm2931_vm3, %v5413_v57 }
0x1108   : > { %5203 = vmatmul.msk.bf16.gmra.mxu1 %vm2931_vm3, %v5418_v54 }
0x110a   : > { %5253 = vmatmul.msk.bf16.gmra.mxu2 %vm2931_vm3, %v5414_v59 }
0x1118   : > { %5204 = vmatmul.msk.bf16.gmra.mxu1 %vm2931_vm3, %v5419_v56 }
0x1128   : > { %5205 = vmatmul.msk.bf16.gmra.mxu1 %vm2931_vm3, %v5420_v58 }
0x1138   : > { %5206 = vmatmul.msk.bf16.gmra.mxu1 %vm2931_vm3, %v5421_v60 }
0x1148   : > { %5207 = vmatmul.msk.bf16.gmra.mxu1 %vm2931_vm3, %v5422_v63 }
0x1155   : > { %v3611_v8 = vpop.f32.mrf.mxu1 }
0x1156   : > { %v6483_v1 = vadd.f32 %v3737_v61, %v3611_v8 }
0x1158   : > { %5208 = vmatmul.msk.bf16.gmra.mxu1 %vm2931_vm3, %v5423_v7 }
0x115d   : > { %v6486_v11 = vpop.f32.mrf.mxu1  ;;  %v3762_v32 = vpop.f32.mrf.mxu2 }
0x1165   : > { %v3616_v13 = vpop.f32.mrf.mxu1  ;;  %v3764_v35 = vpop.f32.mrf.mxu2 }
0x1166   : > { %v6488_v14 = vadd.f32 %v3742_v2, %v3616_v13 }
0x116d   : > { %v6490_v17 = vpop.f32.mrf.mxu1  ;;  %v3767_v38 = vpop.f32.mrf.mxu2 }
0x1175   : > { %v3621_v19 = vpop.f32.mrf.mxu1  ;;  %v3769_v43 = vpop.f32.mrf.mxu2 }
0x1176   : > { %v3748_v22 = vadd.f32 %v3747_v12, %v3621_v19 }
0x1178   : > { %3910 = vrot.lane.b32.xlu1 %v3748_v22, %s5768_s23 }
0x117d   : > { %v3623_v24 = vpop.f32.mrf.mxu1  ;;  %v3772_v46 = vpop.f32.mrf.mxu2 }
0x117e   : > { %v3750_v45 = vadd.f32 %v3749_v16, %v3623_v24  ;;  %v3745_v16 = vadd.f32 %v6480_v4, %v6490_v17  ;;  %v5262_v4 = vld [vmem:[%s6692_s18 + $0x18] sm:$0xff] }
0x117f   : > { %3965 = vmatpush.msrb.mxu3 %v5262_v4 }
0x1185   : > { %v3626_v25 = vpop.f32.mrf.mxu1  ;;  %v3774_v49 = vpop.f32.mrf.mxu2 }
0x1186   : > { %v3753_v53 = vadd.f32 %v3752_v18, %v3626_v25 }
0x118d   : > { %v3628_v28 = vpop.f32.mrf.mxu1  ;;  %v3777_v6 = vpop.f32.mrf.mxu2 }
0x118e   : > { %v3755_v55 = vadd.f32 %v3754_v23, %v3628_v28 }
0x1195   : > { %v3631_v30 = vpop.f32.mrf.mxu1  ;;  %v3779_v15 = vpop.f32.mrf.mxu2 }
0x1196   : > { %v3758_v31 = vadd.f32 %v3757_v26, %v3631_v30 }
0x119d   : > { %v3633_v33 = vpop.f32.mrf.mxu1 }
0x119e   : > { %v3760_v9 = vadd.f32 %v3759_v29, %v3633_v33  ;;  %v5259_v29 = vld [vmem:[%s6692_s18 + $0x10] sm:$0xff] }
0x119f   : > { %3898 = vmatpush.msra.mxu0 %v5259_v29 }
0x11a5   : > { %v3636_v36 = vpop.f32.mrf.mxu1 }
0x11a6   : > { %v3763_v37 = vadd.f32 %v3762_v32, %v3636_v36 }
0x11a8   : > { %3785 = vrot.lane.b32.xlu2 %v3763_v37, %s5768_s23 }
0x11ad   : > { %v3638_v34 = vpop.f32.mrf.mxu1 }
0x11ae   : > { %v3765_v3 = vadd.f32 %v3764_v35, %v3638_v34 }
0x11b0   : > { %3787 = vrot.lane.b32.xlu0 %v3765_v3, %s5768_s23 }
0x11b5   : > { %v3641_v40 = vpop.f32.mrf.mxu1 }
0x11b6   : > { %v3768_v41 = vadd.f32 %v3767_v38, %v3641_v40 }
0x11b8   : > { %3920 = vrot.lane.b32.xlu0 %v3768_v41, %s5767_s15 }
0x11bd   : > { %v3643_v44 = vpop.f32.mrf.mxu1 }
0x11be   : > { %v3770_v5 = vadd.f32 %v3769_v43, %v3643_v44 }
0x11c0   : > { %3912 = vrot.lane.b32.xlu0 %v3750_v45, %s5768_s23 }
0x11c5   : > { %v3646_v42 = vpop.f32.mrf.mxu1 }
0x11c6   : > { %v3773_v48 = vadd.f32 %v3772_v46, %v3646_v42 }
0x11c8   : > { %3863 = vrot.lane.b32.xlu1 %v3773_v48, %s5767_s15 }
0x11cd   : > { %v3648_v50 = vpop.f32.mrf.mxu1 }
0x11ce   : > { %v3775_v0 = vadd.f32 %v3774_v49, %v3648_v50 }
0x11d0   : > { %3865 = vrot.lane.b32.xlu0 %v3775_v0, %s5767_s15 }
0x11d5   : > { %v3651_v47 = vpop.f32.mrf.mxu1 }
0x11d6   : > { %v3778_v10 = vadd.f32 %v3777_v6, %v3651_v47  ;;  %v5594_v6 = vld [vmem:[%s6682_s11] ss:$0 sm:$0xff] }
0x11d8   : > { %3832 = vrot.lane.b32.xlu0 %v3760_v9, %s5771_s10  ;;  %3930 = vrot.lane.b32.xlu2 %v3778_v10, %s5771_s10 }
0x11dd   : > { %v3653_v20 = vpop.f32.mrf.mxu1 }
0x11de   : > { %v3780_v21 = vadd.f32 %v3779_v15, %v3653_v20 }
0x11e0   : > { %3922 = vrot.lane.b32.xlu2 %v3770_v5, %s5767_s15  ;;  %3932 = vrot.lane.b32.xlu1 %v3780_v21, %s5771_s10  ;;  %s6693_s15 = sld [smem:[#allocation22_spill]] }
0x11e8   : > { %3830 = vrot.lane.b32.xlu2 %v3758_v31, %s5771_s10 }
0x11ea   : > { %v3911_v58 = vpop.permute.xlu1 %3910 }
0x11eb   : > { %v3916_v60 = vadd.f32 %v3911_v58, %v6483_v1 }
0x1202   : > { %v3786_v27 = vpop.permute.xlu2 %3785 }
0x1203   : > { %v3791_v54 = vadd.f32 %v3786_v27, %v3753_v53 }
0x1205   : > { %3797 = vrot.lane.b32.xlu1 %v3791_v54, %s5771_s10  ;;  %v5424_v54 = vld [vmem:[%s6693_s15] sm:$0xff] }
0x1206   : > { %5303 = vmatmul.msk.bf16.vlgmr.msra.gmra.mxu1 %vm2931_vm3, %v5424_v54 }
0x1222   : > { %v3788_v56 = vpop.permute.xlu0 %3787 }
0x1223   : > { %v3792_v57 = vadd.f32 %v3788_v56, %v3755_v55 }
0x1225   : > { %3799 = vrot.lane.b32.xlu2 %v3792_v57, %s5771_s10 }
0x122a   : > { %v3921_v59 = vpop.permute.xlu0 %3920 }
0x122b   : > { %v3926_v61 = vadd.f32 %v3921_v59, %v3916_v60 }
0x1232   : > { %v3931_v63 = vpop.permute.xlu2 %3930  ;;  %v3913_v7 = vpop.permute.xlu0 %3912 }
0x1233   : > { %v3936_v2 = vadd.f32 %v3931_v63, %v3926_v61 }
0x1235   : > { %3942 = vrot.lane.b32.xlu1 %v3936_v2, %s5771_s10  ;;  %v5425_v2 = vld [vmem:[%s6693_s15 + $0x8] sm:$0xff] }
0x1236   : > { %5304 = vmatmul.msk.bf16.gmra.mxu1 %vm2931_vm3, %v5425_v2 }
0x123a   : > { %v3864_v8 = vpop.permute.xlu1 %3863  ;;  %v3923_v12 = vpop.permute.xlu2 %3922 }
0x123b   : > { %v3869_v13 = vadd.f32 %v3864_v8, %v6488_v14  ;;  %v3740_v14 = vadd.f32 %v6476_v62, %v6486_v11 }
0x123d   : > { %3875 = vrot.lane.b32.xlu0 %v3869_v13, %s5771_s10  ;;  %v3917_v23 = vadd.f32 %v3913_v7, %v3740_v14 }
0x123f   : > { %v3927_v24 = vadd.f32 %v3923_v12, %v3917_v23 }
0x1242   : > { %v3866_v18 = vpop.permute.xlu0 %3865  ;;  %v3831_v19 = vpop.permute.xlu2 %3830 }
0x1243   : > { %v3870_v22 = vadd.f32 %v3866_v18, %v3745_v16  ;;  %5257 = vmatmul.msk.f32.vlgmr.msra.gmra.mxu3 %vm1643_vm1, %v3831_v19 }
0x1245   : > { %3877 = vrot.lane.b32.xlu1 %v3870_v22, %s5771_s10 }
0x124a   : > { %v3833_v1 = vpop.permute.xlu0 %3832 }
0x124b   : > { %5258 = vmatmul.msk.f32.gmra.mxu3 %vm1643_vm1, %v3833_v1 }
0x1252   : > { %v3933_v25 = vpop.permute.xlu1 %3932 }
0x1253   : > { %v3937_v26 = vadd.f32 %v3933_v25, %v3927_v24 }
0x1255   : > { %3944 = vrot.lane.b32.xlu2 %v3937_v26, %s5771_s10  ;;  %s5163_s10 = sld [smem:[#allocation2 + $0x6]] }
0x125b   : > { %v4023_v23 = vstv %s5163_s10  ;;  %s6695_s10 = sld [smem:[#allocation24_spill]] }
0x1261   : > { %v5308_v2 = vld [vmem:[%s6695_s10 + $0x18] sm:$0xff] }
0x1277   : > { %v3798_v17 = vpop.permute.xlu1 %3797 }
0x1278   : > { %5255 = vmatmul.msk.f32.vlgmr.msrb.gmra.mxu0 %vm1643_vm1, %v3798_v17  ;;  %v5426_v17 = vld [vmem:[%s6693_s15 + $0x10] sm:$0xff] }
0x1279   : > { %5305 = vmatmul.msk.bf16.gmra.mxu1 %vm2931_vm3, %v5426_v17 }
0x127f   : > { %v3800_v28 = vpop.permute.xlu2 %3799 }
0x1280   : > { %5256 = vmatmul.msk.f32.gmra.mxu0 %vm1643_vm1, %v3800_v28 }
0x12a7   : > { %v3943_v30 = vpop.permute.xlu1 %3942 }
0x12a8   : > { %5263 = vmatmul.msk.f32.vlgmr.msrb.gmra.mxu3 %vm1643_vm1, %v3943_v30 }
0x12af   : > { %v3876_v62 = vpop.permute.xlu0 %3875  ;;  %v3945_v11 = vpop.permute.xlu2 %3944 }
0x12b0   : > { %5260 = vmatmul.msk.f32.vlgmr.msra.gmra.mxu0 %vm1643_vm1, %v3876_v62  ;;  %5264 = vmatmul.msk.f32.gmra.mxu3 %vm1643_vm1, %v3945_v11  ;;  %v5428_v62 = vld [vmem:[%s6694_s1] sm:$0xff]  ;;  %v5427_v11 = vld [vmem:[%s6693_s15 + $0x18] sm:$0xff] }
0x12b1   : > { %5306 = vmatmul.msk.bf16.gmra.mxu1 %vm2931_vm3, %v5427_v11 }
0x12b7   : > { %v3878_v31 = vpop.permute.xlu1 %3877 }
0x12b8   : > { %5261 = vmatmul.msk.f32.gmra.mxu0 %vm1643_vm1, %v3878_v31  ;;  %v5429_v31 = vld [vmem:[%s6694_s1 + $0x8] sm:$0xff] }
0x12c6   : > { %v3855_v32 = vpop.f32.mrf.mxu3 }
0x12ce   : > { %v3858_v35 = vpop.f32.mrf.mxu3 }
0x12f5   : > { %v3822_v33 = vpop.f32.mrf.mxu0 }
0x12f6   : > { %v3856_v37 = vadd.f32 %v3855_v32, %v3822_v33  ;;  %v4037_v32 = vld [vmem:[%s6693_s15 + $0x20] sm:$0xf] }
0x12f7   : > { %v4136_v33 = vunpack.c.l.b16 %v4037_v32 }
0x12fd   : > { %v3825_v36 = vpop.f32.mrf.mxu0 }
0x12fe   : > { %v3859_v43 = vadd.f32 %v3858_v35, %v3825_v36  ;;  %v4141_v35 = vpack.c.b16 %v4136_v33, %v4136_v33  ;;  %v5430_v36 = vld [vmem:[%s6694_s1 + $0x10] sm:$0xff] }
0x1300   : > { %5307 = vmatmul.msk.bf16.gmra.mxu1 %vm2931_vm3, %v4141_v35 }
0x132b   : > { %v3967_v34 = vpop.f32.mrf.mxu3 }
0x132d   : > { %v3900_v38 = vpop.f32.mrf.mxu0 }
0x132e   : > { %v3906_v3 = vadd.f32 %v3900_v38, %v3856_v37  ;;  %v5431_v37 = vld [vmem:[%s6694_s1 + $0x18] sm:$0xff] }
0x1330   : > { %v3973_v40 = vadd.f32 %v3967_v34, %v3906_v3  ;;  %v4166_v3 = vpop.f32.mrf.mxu1 }
0x1332   : > { %v3975_v41 = vsel %vm2808_vm9, %v3973_v40, 0.0 }
0x1333   : > { %3976 = vadd.xlane.f32.xlu0 %v3975_v41  ;;  %v3970_v46 = vpop.f32.mrf.mxu3 }
0x1335   : > { %v3903_v44 = vpop.f32.mrf.mxu0 }
0x1336   : > { %v3907_v45 = vadd.f32 %v3903_v44, %v3859_v43 }
0x1338   : > { %v3974_v42 = vadd.f32 %v3970_v46, %v3907_v45 }
0x133a   : > { %v3978_v48 = vsel %vm2808_vm9, %v3974_v42, 0.0 }
0x133b   : > { %3979 = vadd.xlane.f32.xlu2 %v3978_v48 }
0x13a6   : > { %v3977_v49 = vpop.xlane.xlu0 %3976 }
0x13a7   : > { %v3981_v50 = vmul.f32 0.0625, %v3977_v49 }
0x13a9   : > { %v3983_v0 = vsub.f32 %v3973_v40, %v3981_v50  ;;  %v4168_v40 = vpop.f32.mrf.mxu1 }
0x13ab   : > { %v3985_v47 = vmul.f32 %v5594_v6, %v3983_v0 }
0x13ad   : > { %v3987_v9 = vmul.f32 %v3985_v47, %v3985_v47 }
0x13ae   : > { %v3980_v10 = vpop.xlane.xlu2 %3979 }
0x13af   : > { %v3982_v15 = vmul.f32 0.0625, %v3980_v10  ;;  %v3989_v20 = vsel %vm2808_vm9, %v3987_v9, 0.0 }
0x13b0   : > { %3990 = vadd.xlane.f32.xlu1 %v3989_v20 }
0x13b1   : > { %v3984_v5 = vsub.f32 %v3974_v42, %v3982_v15  ;;  %v4171_v41 = vpop.f32.mrf.mxu1 }
0x13b3   : > { %v3986_v21 = vmul.f32 %v5594_v6, %v3984_v5 }
0x13b5   : > { %v3988_v51 = vmul.f32 %v3986_v21, %v3986_v21 }
0x13b7   : > { %v3992_v52 = vsel %vm2808_vm9, %v3988_v51, 0.0 }
0x13b8   : > { %3993 = vadd.xlane.f32.xlu0 %v3992_v52 }
0x13b9   : > { %v4173_v43 = vpop.f32.mrf.mxu1 }
0x13c1   : > { %v4176_v44 = vpop.f32.mrf.mxu1 }
0x13c9   : > { %v4178_v42 = vpop.f32.mrf.mxu1 }
0x13d1   : > { %v4181_v50 = vpop.f32.mrf.mxu1 }
0x1423   : > { %v3991_v53 = vpop.xlane.xlu1 %3990 }
0x1424   : > { %v3995_v27 = vmul.f32 0.0625, %v3991_v53 }
0x1426   : > { %v3997_v55 = vadd.f32 1e-05, %v3995_v27 }
0x1428   : > { %5588 = vrsqrt.f32 %v3997_v55  ;;  %vm4005_vm2 = vweird.f32 %v3997_v55 }
0x142b   : > { %v3994_v56 = vpop.xlane.xlu0 %3993 }
0x142c   : > { %v3996_v57 = vmul.f32 0.0625, %v3994_v56 }
0x142e   : > { %v5589_v58 = vpop.eup %5588  ;;  %v3998_v59 = vadd.f32 1e-05, %v3996_v57 }
0x142f   : > { %v4000_v60 = vmul.f32 %v5589_v58, %v3997_v55  ;;  %vm4006_vm9 = vweird.f32 %v5589_v58 }
0x1430   : > { %5590 = vrsqrt.f32 %v3998_v59  ;;  %vm4007_vm5 = vmor %vm4005_vm2, %vm4006_vm9  ;;  %vm4015_vm13 = vweird.f32 %v3998_v59 }
0x1431   : > { %v4001_v61 = vmul.f32 %v5589_v58, %v4000_v60 }
0x1433   : > { %v4002_v63 = vmul.f32 0.5, %v4001_v61  ;;  %v5310_v61 = vld [vmem:[%s6695_s10 + $0x28] sm:$0xff] }
0x1434   : > { %4220 = vmatpush.msra.mxu3 %v5310_v61 }
0x1435   : > { %v4003_v7 = vsub.f32 1.5, %v4002_v63  ;;  %v5309_v63 = vld [vmem:[%s6695_s10 + $0x20] sm:$0xff] }
0x1436   : > { %v5591_v8 = vpop.eup %5590  ;;  %4221 = vmatpush.msra.mxu3 %v5309_v63  ;;  %v5439_v63 = vld [vmem:[%s5938_s27 + $0x18] sm:$0xff] }
0x1437   : > { %v4004_v12 = vmul.f32 %v5589_v58, %v4003_v7  ;;  %v4010_v13 = vmul.f32 %v5591_v8, %v3998_v59  ;;  %vm4016_vm10 = vweird.f32 %v5591_v8 }
0x1438   : > { %vm4017_vm14 = vmor %vm4015_vm13, %vm4016_vm10  ;;  %4222 = vmatpush.msra.mxu3 %v5308_v2  ;;  %v4377_v2 = vld [vmem:[%s5938_s27 + $0x20] sm:$0xf] }
0x1439   : > { %v4011_v16 = vmul.f32 %v5591_v8, %v4010_v13  ;;  %v4008_v18 = vsel %vm4007_vm5, %v5589_v58, %v4004_v12 }
0x143a   : > { %v4019_v1 = vmul.f32 %v4008_v18, %v3985_v47  ;;  %v4183_v47 = vpop.f32.mrf.mxu1 }
0x143b   : > { %v4012_v19 = vmul.f32 0.5, %v4011_v16 }
0x143c   : > { %v4024_v26 = vmul.f32 %v4023_v23, %v4019_v1  ;;  %vm4021_vm15 = vcmp.ge.f32.partialorder %v4019_v1, 0.0 }
0x143d   : > { %v4013_v22 = vsub.f32 1.5, %v4012_v19 }
0x143e   : > { %v4026_v28 = vsel %vm4021_vm15, %v4019_v1, %v4024_v26  ;;  %v4192_v1 = vld [vmem:[%s6695_s10 + $0x10] sm:$0xff]  ;;  %v5314_v26 = vld [vmem:[%s6695_s10 + $0x38] sm:$0xff] }
0x143f   : > { %v4014_v14 = vmul.f32 %v5591_v8, %v4013_v22  ;;  %4245 = vmatpush.msrb.mxu3 %v4192_v1 }
0x1441   : > { %v4018_v24 = vsel %vm4017_vm14, %v5591_v8, %v4014_v14  ;;  %v4191_v14 = vld [vmem:[%s6695_s10 + $0x8] sm:$0xff] }
0x1442   : > { %v4020_v25 = vmul.f32 %v4018_v24, %v3986_v21  ;;  %v4186_v15 = vpop.f32.mrf.mxu1  ;;  %4246 = vmatpush.msrb.mxu3 %v4191_v14  ;;  %v5315_v24 = vld [vmem:[%s6695_s10 + $0x40] sm:$0xff] }
0x1444   : > { %vm4022_vm0 = vcmp.ge.f32.partialorder %v4020_v25, 0.0  ;;  %v4025_v4 = vmul.f32 %v4023_v23, %v4020_v25  ;;  %v4190_v23 = vld [vmem:[%s6695_s10] sm:$0xff] }
0x1445   : > { %4247 = vmatpush.msrb.mxu3 %v4190_v23 }
0x1446   : > { %v4027_v29 = vsel %vm4022_vm0, %v4020_v25, %v4025_v4  ;;  %v5313_v4 = vld [vmem:[%s6695_s10 + $0x30] sm:$0xff] }
0x1447   : > { %v4047_v30 = vpack.c.bf16 %v4027_v29, %v4026_v28  ;;  %v5319_v28 = vld [vmem:[%s6695_s10 + $0x58] sm:$0xff]  ;;  %v5318_v29 = vld [vmem:[%s6695_s10 + $0x50] sm:$0xff] }
0x1449   : > { %4093 = vmatpush.bf16.msrb.mxu0 %v4047_v30  ;;  %v5317_v30 = vld [vmem:[%s6695_s10 + $0x48] sm:$0xff] }
0x144a   : > { %v4188_v5 = vpop.f32.mrf.mxu1 }
0x144c   : > { %5282 = vmatmul.msk.bf16.vlgmr.msrb.gmra.mxu0 %vm2931_vm3, %v5428_v62 }
0x144d   : > { %4498 = vmatpush.bf16.msra.mxu0 %v6294_v39  ;;  %v4046_v39 = vld [vmem:[%s6694_s1 + $0x20] sm:$0xf]  ;;  %s6696_s1 = smov 122  }
0x144e   : > { %v4065_v34 = vunpack.c.l.b16 %v4046_v39 }
0x1450   : > { %v4070_v38 = vpack.c.b16 %v4065_v34, %v4065_v34 }
0x145c   : > { %5283 = vmatmul.msk.bf16.gmra.mxu0 %vm2931_vm3, %v5429_v31 }
0x146c   : > { %5284 = vmatmul.msk.bf16.gmra.mxu0 %vm2931_vm3, %v5430_v36 }
0x147c   : > { %5285 = vmatmul.msk.bf16.gmra.mxu0 %vm2931_vm3, %v5431_v37 }
0x148c   : > { %5286 = vmatmul.msk.bf16.gmra.mxu0 %vm2931_vm3, %v4070_v38 }
0x14c9   : > { %v4095_v45 = vpop.f32.mrf.mxu0 }
0x14ca   : > { %v4167_v46 = vadd.f32 %v4166_v3, %v4095_v45 }
0x14d1   : > { %v4097_v48 = vpop.f32.mrf.mxu0 }
0x14d2   : > { %v4169_v49 = vadd.f32 %v4168_v40, %v4097_v48 }
0x14d9   : > { %v4100_v0 = vpop.f32.mrf.mxu0 }
0x14da   : > { %v4172_v6 = vadd.f32 %v4171_v41, %v4100_v0  ;;  %v5595_v41 = vld [vmem:[%s5858_s30] ss:$0 sm:$0xff] }
0x14dc   : > { %4288 = vrot.lane.b32.xlu0 %v4172_v6, %s5768_s23 }
0x14e1   : > { %v4102_v9 = vpop.f32.mrf.mxu0 }
0x14e2   : > { %v4174_v10 = vadd.f32 %v4173_v43, %v4102_v9 }
0x14e9   : > { %v4105_v20 = vpop.f32.mrf.mxu0 }
0x14ea   : > { %v4177_v54 = vadd.f32 %v4176_v44, %v4105_v20 }
0x14f1   : > { %v4107_v21 = vpop.f32.mrf.mxu0 }
0x14f2   : > { %v4179_v51 = vadd.f32 %v4178_v42, %v4107_v21 }
0x14f4   : > { %4194 = vrot.lane.b32.xlu2 %v4179_v51, %s5768_s23 }
0x14f9   : > { %v4110_v52 = vpop.f32.mrf.mxu0 }
0x14fa   : > { %v4182_v53 = vadd.f32 %v4181_v50, %v4110_v52 }
0x14fc   : > { %4293 = vrot.lane.b32.xlu2 %v4182_v53, %s6696_s1 }
0x1501   : > { %v4112_v27 = vpop.f32.mrf.mxu0 }
0x1502   : > { %v4184_v55 = vadd.f32 %v4183_v47, %v4112_v27 }
0x1504   : > { %4228 = vrot.lane.b32.xlu2 %v4177_v54, %s6697_s2  ;;  %4253 = vrot.lane.b32.xlu1 %v4184_v55, %s6696_s1  ;;  %s6698_s1 = sld [smem:[#allocation25_spill]]  ;;  %v5436_v54 = vld [vmem:[%s5938_s27] sm:$0xff] }
0x1509   : > { %v4115_v56 = vpop.f32.mrf.mxu0 }
0x150a   : > { %v4187_v57 = vadd.f32 %v4186_v15, %v4115_v56  ;;  %v5432_v42 = vld [vmem:[%s6698_s1] sm:$0xff]  ;;  %v5433_v9 = vld [vmem:[%s6698_s1 + $0x8] sm:$0xff]  ;;  %v5434_v55 = vld [vmem:[%s6698_s1 + $0x10] sm:$0xff] }
0x150b   : > { %5358 = vmatmul.msk.bf16.vlgmr.msra.gmra.mxu0 %vm1643_vm1, %v5432_v42  ;;  %v5437_v56 = vld [vmem:[%s5938_s27 + $0x8] sm:$0xff]  ;;  %v4530_v42 = vld [vmem:[#allocation8 + $0x30] sm:$0xff] }
0x150c   : > { %4298 = vrot.lane.b32.xlu0 %v4187_v57, %s6697_s2  ;;  %v5435_v57 = vld [vmem:[%s6698_s1 + $0x18] sm:$0xff] }
0x1511   : > { %v4117_v58 = vpop.f32.mrf.mxu0 }
0x1512   : > { %v4368_v58 = vld [vmem:[%s6698_s1 + $0x20] sm:$0xf] }
0x151b   : > { %5359 = vmatmul.msk.bf16.gmra.mxu0 %vm1643_vm1, %v5433_v9  ;;  %v4566_v9 = vld [vmem:[#allocation8 + $0x120] sm:$0xff] }
0x152b   : > { %5360 = vmatmul.msk.bf16.gmra.mxu0 %vm1643_vm1, %v5434_v55  ;;  %v4556_v55 = vld [vmem:[#allocation8 + $0xd0] sm:$0xff] }
0x153b   : > { %5361 = vmatmul.msk.bf16.gmra.mxu0 %vm1643_vm1, %v5435_v57 }
0x154e   : > { %v4195_v59 = vpop.permute.xlu2 %4194  ;;  %v4289_v7 = vpop.permute.xlu0 %4288 }
0x154f   : > { %v4197_v60 = vadd.f32 %v4195_v59, %v4174_v10  ;;  %v4291_v16 = vadd.f32 %v4289_v7, %v4167_v46  ;;  %v5438_v59 = vld [vmem:[%s5938_s27 + $0x10] sm:$0xff]  ;;  %v4396_v7 = vunpack.c.l.b16 %v4377_v2  ;;  %v4565_v2 = vld [vmem:[#allocation8 + $0x118] sm:$0xff] }
0x1551   : > { %4203 = vrot.lane.b32.xlu1 %v4197_v60, %s6697_s2  ;;  %v4470_v60 = vunpack.c.l.b16 %v4368_v58  ;;  %v4552_v58 = vld [vmem:[#allocation8 + $0xb0] sm:$0xff] }
0x1553   : > { %v4475_v61 = vpack.c.b16 %v4470_v60, %v4470_v60  ;;  %v4569_v60 = vld [vmem:[#allocation8 + $0x138] sm:$0xff] }
0x1555   : > { %5362 = vmatmul.msk.bf16.gmra.mxu0 %vm1643_vm1, %v4475_v61  ;;  %v4567_v61 = vld [vmem:[#allocation8 + $0x128] sm:$0xff] }
0x1556   : > { %v4294_v13 = vpop.permute.xlu2 %4293 }
0x1557   : > { %v4296_v18 = vadd.f32 %v4294_v13, %v4291_v16 }
0x155e   : > { %v4229_v17 = vpop.permute.xlu2 %4228 }
0x1576   : > { %v4254_v8 = vpop.permute.xlu1 %4253 }
0x1577   : > { %v4256_v12 = vadd.f32 %v4254_v8, %v4169_v49  ;;  %v4401_v8 = vpack.c.b16 %v4396_v7, %v4396_v7 }
0x1579   : > { %4262 = vrot.lane.b32.xlu0 %v4256_v12, %s6697_s2 }
0x157e   : > { %v4299_v19 = vpop.permute.xlu0 %4298 }
0x157f   : > { %v4301_v22 = vadd.f32 %v4299_v19, %v4296_v18 }
0x1581   : > { %4307 = vrot.lane.b32.xlu1 %v4301_v22, %s6697_s2  ;;  %s5265_s2 = sld [smem:[#allocation2 + $0x7]] }
0x1587   : > { %v4356_v5 = vstv %s5265_s2  ;;  %s6699_s2 = smov 117  }
0x1588   : > { %v4500_v12 = vpop.f32.mrf.mxu0 }
0x1590   : > { %v4502_v13 = vpop.f32.mrf.mxu0 }
0x1598   : > { %v4505_v16 = vpop.f32.mrf.mxu0 }
0x15a0   : > { %v4507_v18 = vpop.f32.mrf.mxu0 }
0x15a8   : > { %v4510_v19 = vpop.f32.mrf.mxu0 }
0x15b0   : > { %v4512_v14 = vpop.f32.mrf.mxu0 }
0x15c3   : > { %v4204_v25 = vpop.permute.xlu1 %4203 }
0x15c4   : > { %5311 = vmatmul.msk.f32.vlgmr.msra.gmra.mxu3 %vm3096_vm4, %v4204_v25  ;;  %v4515_v25 = vpop.f32.mrf.mxu0 }
0x15c5   : > { %4279 = vmatpush.msra.mxu3 %v5315_v24 }
0x15c7   : > { %4280 = vmatpush.msra.mxu3 %v5314_v26 }
0x15c9   : > { %4281 = vmatpush.msra.mxu3 %v5313_v4 }
0x15cc   : > { %5312 = vmatmul.msk.f32.vlgmr.msrb.gmra.mxu3 %vm3096_vm4, %v4229_v17  ;;  %v4517_v17 = vpop.f32.mrf.mxu0 }
0x15cd   : > { %4324 = vmatpush.msrb.mxu3 %v5319_v28 }
0x15cf   : > { %4325 = vmatpush.msrb.mxu3 %v5318_v29 }
0x15d1   : > { %4326 = vmatpush.msrb.mxu3 %v5317_v30 }
0x15d4   : > { %v4520_v30 = vpop.f32.mrf.mxu0 }
0x15eb   : > { %v4263_v62 = vpop.permute.xlu0 %4262 }
0x15ec   : > { %5316 = vmatmul.msk.f32.vlgmr.msra.gmra.mxu3 %vm3096_vm4, %v4263_v62 }
0x15f3   : > { %v4308_v11 = vpop.permute.xlu1 %4307 }
0x15f4   : > { %5320 = vmatmul.msk.f32.vlgmr.msrb.gmra.mxu3 %vm3096_vm4, %v4308_v11 }
0x1647   : > { %v4224_v31 = vpop.f32.mrf.mxu3 }
0x164f   : > { %v4249_v32 = vpop.f32.mrf.mxu3 }
0x1650   : > { %v4250_v35 = vadd.f32 %v4249_v32, %v4224_v31  ;;  %v4522_v31 = vpop.f32.mrf.mxu0 }
0x1651   : > { %v4666_v31 = vld [vmem:[#allocation8 + $0x140] sm:$0xff] }
0x166f   : > { %v4283_v33 = vpop.f32.mrf.mxu3 }
0x1670   : > { %v4286_v36 = vadd.f32 %v4283_v33, %v4250_v35 }
0x1677   : > { %v4328_v37 = vpop.f32.mrf.mxu3 }
0x1678   : > { %v4331_v39 = vadd.f32 %v4328_v37, %v4286_v36 }
0x167a   : > { %v4332_v34 = vsel %vm2309_vm12, %v4331_v39, 0.0 }
0x167b   : > { %4333 = vadd.xlane.f32.xlu2 %v4332_v34 }
0x16ee   : > { %v4334_v38 = vpop.xlane.xlu2 %4333 }
0x16ef   : > { %v4335_v3 = vmul.f32 0.015625, %v4334_v38 }
0x16f1   : > { %v4336_v40 = vsub.f32 %v4331_v39, %v4335_v3 }
0x16f3   : > { %v4337_v43 = vmul.f32 %v5595_v41, %v4336_v40  ;;  %v4542_v40 = vld [vmem:[#allocation8 + $0x90] sm:$0xff]  ;;  %v4540_v41 = vld [vmem:[#allocation8 + $0x80] sm:$0xff] }
0x16f4   : > { %4626 = vmatpush.msra.mxu2 %v4542_v40  ;;  %v4541_v40 = vld [vmem:[#allocation8 + $0x88] sm:$0xff] }
0x16f5   : > { %v4338_v44 = vmul.f32 %v4337_v43, %v4337_v43 }
0x16f6   : > { %4627 = vmatpush.msra.mxu2 %v4540_v41  ;;  %v4671_v41 = vld [vmem:[#allocation8 + $0x168] sm:$0xff] }
0x16f7   : > { %v4339_v45 = vsel %vm2309_vm12, %v4338_v44, 0.0  ;;  %v4536_v44 = vld [vmem:[#allocation8 + $0x60] sm:$0xff] }
0x16f8   : > { %4340 = vadd.xlane.f32.xlu0 %v4339_v45  ;;  %v4534_v45 = vld [vmem:[#allocation8 + $0x50] sm:$0xff] }
0x176b   : > { %v4341_v46 = vpop.xlane.xlu0 %4340 }
0x176c   : > { %v4342_v48 = vmul.f32 0.015625, %v4341_v46  ;;  %v4532_v46 = vld [vmem:[#allocation8 + $0x40] sm:$0xff] }
0x176e   : > { %v4343_v49 = vadd.f32 1e-05, %v4342_v48  ;;  %v4528_v48 = vld [vmem:[#allocation8 + $0x20] sm:$0xff] }
0x1770   : > { %5592 = vrsqrt.f32 %v4343_v49  ;;  %vm4350_vm12 = vweird.f32 %v4343_v49 }
0x1776   : > { %v5593_v50 = vpop.eup %5592 }
0x1777   : > { %v4345_v0 = vmul.f32 %v5593_v50, %v4343_v49  ;;  %vm4351_vm3 = vweird.f32 %v5593_v50  ;;  %v4526_v49 = vld [vmem:[#allocation8 + $0x10] sm:$0xff] }
0x1778   : > { %vm4352_vm4 = vmor %vm4350_vm12, %vm4351_vm3 }
0x1779   : > { %v4346_v6 = vmul.f32 %v5593_v50, %v4345_v0 }
0x177b   : > { %v4347_v47 = vmul.f32 0.5, %v4346_v6 }
0x177d   : > { %v4348_v10 = vsub.f32 1.5, %v4347_v47  ;;  %v4568_v47 = vld [vmem:[#allocation8 + $0x130] sm:$0xff] }
0x177e   : > { %4581 = vmatpush.msrb.mxu1 %v4568_v47  ;;  %v4754_v47 = vld [vmem:[#allocation8 + $0x208] sm:$0xff] }
0x177f   : > { %v4349_v15 = vmul.f32 %v5593_v50, %v4348_v10  ;;  %v4564_v10 = vld [vmem:[#allocation8 + $0x110] sm:$0xff] }
0x1780   : > { %4582 = vmatpush.msrb.mxu1 %v4566_v9  ;;  %v4531_v9 = vld [vmem:[#allocation8 + $0x38] sm:$0xff] }
0x1781   : > { %v4353_v20 = vsel %vm4352_vm4, %v5593_v50, %v4349_v15  ;;  %v4524_v50 = vld [vmem:[#allocation8] sm:$0xff]  ;;  %v4684_v15 = vld [vmem:[#allocation8 + $0x1d0] sm:$0xff] }
0x1782   : > { %v4354_v21 = vmul.f32 %v4353_v20, %v4337_v43  ;;  %v4538_v43 = vld [vmem:[#allocation8 + $0x70] sm:$0xff]  ;;  %v4562_v20 = vld [vmem:[#allocation8 + $0x100] sm:$0xff]  ;;  %4583 = vmatpush.msrb.mxu1 %v4564_v10  ;;  %v4752_v10 = vld [vmem:[#allocation8 + $0x1f8] sm:$0xff] }
0x1783   : > { %4628 = vmatpush.msra.mxu2 %v4538_v43  ;;  %v4760_v43 = vld [vmem:[#allocation8 + $0x238] sm:$0xff] }
0x1784   : > { %vm4355_vm6 = vcmp.ge.f32.partialorder %v4354_v21, 0.0  ;;  %v4357_v51 = vmul.f32 %v4356_v5, %v4354_v21  ;;  %v4682_v5 = vld [vmem:[#allocation8 + $0x1c0] sm:$0xff]  ;;  %4584 = vmatpush.msrb.mxu1 %v4562_v20  ;;  %v4750_v20 = vld [vmem:[#allocation8 + $0x1e8] sm:$0xff] }
0x1785   : > { %4629 = vmatpush.msra.mxu2 %v4536_v44  ;;  %v4539_v44 = vld [vmem:[#allocation8 + $0x78] sm:$0xff] }
0x1786   : > { %v4358_v52 = vsel %vm4355_vm6, %v4354_v21, %v4357_v51  ;;  %v4680_v51 = vld [vmem:[#allocation8 + $0x1b0] sm:$0xff] }
0x1787   : > { %v4378_v53 = vpack.c.bf16 %v4358_v52, %v4358_v52  ;;  %4630 = vmatpush.msra.mxu2 %v4534_v45  ;;  %v4669_v45 = vld [vmem:[#allocation8 + $0x158] sm:$0xff] }
0x1789   : > { %v4418_v27 = vsel %vm2157_vm11, %v4378_v53, 0  ;;  %4631 = vmatpush.msra.mxu2 %v4532_v46  ;;  %v4560_v53 = vld [vmem:[#allocation8 + $0xf0] sm:$0xff]  ;;  %v4758_v46 = vld [vmem:[#allocation8 + $0x228] sm:$0xff] }
0x178a   : > { %4427 = vmatpush.bf16.msra.mxu3 %v4418_v27  ;;  %v4678_v27 = vld [vmem:[#allocation8 + $0x1a0] sm:$0xff]  ;;  %4585 = vmatpush.msrb.mxu1 %v4560_v53 }
0x178b   : > { %4632 = vmatpush.msra.mxu2 %v4530_v42  ;;  %v4537_v42 = vld [vmem:[#allocation8 + $0x68] sm:$0xff]  ;;  %v4765_v53 = vld [vmem:[#allocation8 + $0x260] sm:$0xff] }
0x178d   : > { %5337 = vmatmul.msk.bf16.vlgmr.msra.gmra.mxu3 %vm1643_vm1, %v5436_v54  ;;  %4633 = vmatpush.msra.mxu2 %v4528_v48  ;;  %v4558_v54 = vld [vmem:[#allocation8 + $0xe0] sm:$0xff]  ;;  %v4667_v48 = vld [vmem:[#allocation8 + $0x148] sm:$0xff] }
0x178e   : > { %4697 = vmatpush.msrb.mxu3 %v4684_v15  ;;  %4586 = vmatpush.msrb.mxu1 %v4558_v54  ;;  %v4529_v15 = vld [vmem:[#allocation8 + $0x28] sm:$0xff]  ;;  %v4761_v54 = vld [vmem:[#allocation8 + $0x240] sm:$0xff] }
0x178f   : > { %4634 = vmatpush.msra.mxu2 %v4526_v49  ;;  %v4535_v49 = vld [vmem:[#allocation8 + $0x58] sm:$0xff] }
0x1790   : > { %4698 = vmatpush.msrb.mxu3 %v4682_v5  ;;  %4587 = vmatpush.msrb.mxu1 %v4556_v55  ;;  %v4527_v5 = vld [vmem:[#allocation8 + $0x18] sm:$0xff]  ;;  %v4759_v55 = vld [vmem:[#allocation8 + $0x230] sm:$0xff] }
0x1791   : > { %4635 = vmatpush.msra.mxu2 %v4524_v50  ;;  %v4533_v50 = vld [vmem:[#allocation8 + $0x48] sm:$0xff] }
0x1792   : > { %4699 = vmatpush.msrb.mxu3 %v4680_v51  ;;  %v4359_v51 = vld [vmem:[%s5948_s12] sm:$0xf] }
0x1794   : > { %4700 = vmatpush.msrb.mxu3 %v4678_v27  ;;  %v4763_v27 = vld [vmem:[#allocation8 + $0x250] sm:$0xff] }
0x179d   : > { %5338 = vmatmul.msk.bf16.gmra.mxu3 %vm1643_vm1, %v5437_v56  ;;  %v4554_v56 = vld [vmem:[#allocation8 + $0xc0] sm:$0xff] }
0x179e   : > { %4588 = vmatpush.msrb.mxu1 %v4554_v56  ;;  %v4757_v56 = vld [vmem:[#allocation8 + $0x220] sm:$0xff] }
0x17a0   : > { %4589 = vmatpush.msrb.mxu1 %v4552_v58  ;;  %v4753_v58 = vld [vmem:[#allocation8 + $0x200] sm:$0xff] }
0x17ad   : > { %5339 = vmatmul.msk.bf16.gmra.mxu3 %vm1643_vm1, %v5438_v59  ;;  %v4550_v59 = vld [vmem:[#allocation8 + $0xa0] sm:$0xff] }
0x17ae   : > { %4590 = vmatpush.msrb.mxu1 %v4550_v59  ;;  %v4751_v59 = vld [vmem:[#allocation8 + $0x1f0] sm:$0xff] }
0x17b0   : > { %4601 = vmatpush.msra.mxu1 %v4569_v60  ;;  %v4749_v60 = vld [vmem:[#allocation8 + $0x1e0] sm:$0xff] }
0x17b2   : > { %4602 = vmatpush.msra.mxu1 %v4567_v61 }
0x17b4   : > { %4603 = vmatpush.msra.mxu1 %v4565_v2 }
0x17bd   : > { %5340 = vmatmul.msk.bf16.gmra.mxu3 %vm1643_vm1, %v5439_v63 }
0x17cd   : > { %5341 = vmatmul.msk.bf16.gmra.mxu3 %vm1643_vm1, %v4401_v8  ;;  %v4563_v8 = vld [vmem:[#allocation8 + $0x108] sm:$0xff] }
0x17ce   : > { %4604 = vmatpush.msra.mxu1 %v4563_v8 }
0x1810   : > { %v4429_v22 = vpop.f32.mrf.mxu3 }
0x1811   : > { %v6603_v1 = vadd.f32 %v4500_v12, %v4429_v22  ;;  %v4561_v12 = vld [vmem:[#allocation8 + $0xf8] sm:$0xff] }
0x1812   : > { %4605 = vmatpush.msra.mxu1 %v4561_v12  ;;  %v4557_v22 = vld [vmem:[#allocation8 + $0xd8] sm:$0xff] }
0x1818   : > { %v4431_v23 = vpop.f32.mrf.mxu3 }
0x1819   : > { %v6605_v24 = vadd.f32 %v4502_v13, %v4431_v23  ;;  %v4555_v23 = vld [vmem:[#allocation8 + $0xc8] sm:$0xff] }
0x1820   : > { %v4434_v26 = vpop.f32.mrf.mxu3 }
0x1821   : > { %v4506_v4 = vadd.f32 %v4505_v16, %v4434_v26  ;;  %v4559_v16 = vld [vmem:[#allocation8 + $0xe8] sm:$0xff]  ;;  %v4676_v26 = vld [vmem:[#allocation8 + $0x190] sm:$0xff] }
0x1822   : > { %4606 = vmatpush.msra.mxu1 %v4559_v16  ;;  %4701 = vmatpush.msrb.mxu3 %v4676_v26 }
0x1823   : > { %4734 = vrot.lane.b32.xlu1 %v4506_v4, %s5768_s23  ;;  %v4672_v4 = vld [vmem:[#allocation8 + $0x170] sm:$0xff] }
0x1824   : > { %4607 = vmatpush.msra.mxu1 %v4557_v22 }
0x1826   : > { %4608 = vmatpush.msra.mxu1 %v4555_v23 }
0x1828   : > { %v4436_v28 = vpop.f32.mrf.mxu3 }
0x1829   : > { %v4508_v29 = vadd.f32 %v4507_v18, %v4436_v28  ;;  %v4683_v28 = vld [vmem:[#allocation8 + $0x1c8] sm:$0xff] }
0x1830   : > { %v4439_v62 = vpop.f32.mrf.mxu3 }
0x1831   : > { %v4511_v11 = vadd.f32 %v4510_v19, %v4439_v62  ;;  %v4668_v62 = vld [vmem:[#allocation8 + $0x150] sm:$0xff] }
0x1833   : > { %4616 = vrot.lane.b32.xlu0 %v4511_v11, %s6699_s2  ;;  %v4679_v11 = vld [vmem:[#allocation8 + $0x1a8] sm:$0xff] }
0x1838   : > { %v4441_v32 = vpop.f32.mrf.mxu3 }
0x1839   : > { %v4513_v33 = vadd.f32 %v4512_v14, %v4441_v32  ;;  %v4768_v32 = vld [vmem:[#allocation8 + $0x278] sm:$0xff] }
0x183b   : > { %4545 = vrot.lane.b32.xlu1 %v4513_v33, %s5768_s23  ;;  %v4677_v33 = vld [vmem:[#allocation8 + $0x198] sm:$0xff]  ;;  %s6700_s23 = sld [smem:[#allocation26_spill]] }
0x1840   : > { %v4444_v35 = vpop.f32.mrf.mxu3 }
0x1841   : > { %v4516_v36 = vadd.f32 %v4515_v25, %v4444_v35  ;;  %v4551_v25 = vld [vmem:[#allocation8 + $0xa8] sm:$0xff] }
0x1842   : > { %v4766_v35 = vld [vmem:[#allocation8 + $0x268] sm:$0xff] }
0x1843   : > { %4739 = vrot.lane.b32.xlu1 %v4516_v36, %s6689_s22  ;;  %v4675_v36 = vld [vmem:[#allocation8 + $0x188] sm:$0xff] }
0x1848   : > { %v4446_v37 = vpop.f32.mrf.mxu3 }
0x1849   : > { %v4518_v39 = vadd.f32 %v4517_v17, %v4446_v37  ;;  %v4685_v17 = vld [vmem:[#allocation8 + $0x1d8] sm:$0xff] }
0x184a   : > { %4717 = vmatpush.msrb.mxu2 %v4685_v17  ;;  %v4764_v37 = vld [vmem:[#allocation8 + $0x258] sm:$0xff] }
0x184b   : > { %4661 = vrot.lane.b32.xlu1 %v4518_v39, %s6689_s22  ;;  %v4543_v39 = vld [vmem:[#allocation8 + $0x98] sm:$0xff]  ;;  %s5374_s22 = sshll.u32 %s6703_s0, 3 }
0x184c   : > { %4718 = vmatpush.msrb.mxu2 %v4683_v28 }
0x1850   : > { %v4449_v34 = vpop.f32.mrf.mxu3 }
0x1851   : > { %v4521_v38 = vadd.f32 %v4520_v30, %v4449_v34  ;;  %v4681_v30 = vld [vmem:[#allocation8 + $0x1b8] sm:$0xff] }
0x1852   : > { %4719 = vmatpush.msrb.mxu2 %v4681_v30  ;;  %v4673_v34 = vld [vmem:[#allocation8 + $0x178] sm:$0xff] }
0x1853   : > { %4744 = vrot.lane.b32.xlu1 %v4521_v38, %s6699_s2 }
0x1854   : > { %4720 = vmatpush.msrb.mxu2 %v4679_v11 }
0x1856   : > { %4721 = vmatpush.msrb.mxu2 %v4677_v33 }
0x1858   : > { %v4451_v3 = vpop.f32.mrf.mxu3  ;;  %4722 = vmatpush.msrb.mxu2 %v4675_v36 }
0x1859   : > { %v4762_v3 = vld [vmem:[#allocation8 + $0x248] sm:$0xff] }
0x185a   : > { %4723 = vmatpush.msrb.mxu2 %v4673_v34 }
0x185c   : > { %4724 = vmatpush.msrb.mxu2 %v4671_v41 }
0x185e   : > { %4725 = vmatpush.msrb.mxu2 %v4669_v45 }
0x1860   : > { %4726 = vmatpush.msrb.mxu2 %v4667_v48 }
0x1895   : > { %v4735_v0 = vpop.permute.xlu1 %4734 }
0x1896   : > { %v4737_v13 = vadd.f32 %v4735_v0, %v6603_v1  ;;  %v4674_v1 = vld [vmem:[#allocation8 + $0x180] sm:$0xff]  ;;  %v4756_v0 = vld [vmem:[#allocation8 + $0x218] sm:$0xff] }
0x1897   : > { %4702 = vmatpush.msrb.mxu3 %v4674_v1 }
0x1899   : > { %4703 = vmatpush.msrb.mxu3 %v4672_v4 }
0x18a5   : > { %v6613_v6 = vpop.permute.xlu0 %4616 }
0x18a6   : > { %5365 = vmatmul.msk.f32.vlgmr.msra.gmra.mxu2 %vm2778_vm8, %v6613_v6 }
0x18ad   : > { %v4546_v21 = vpop.permute.xlu1 %4545 }
0x18ae   : > { %v4548_v52 = vadd.f32 %v4546_v21, %v4508_v29  ;;  %v4670_v29 = vld [vmem:[#allocation8 + $0x160] sm:$0xff]  ;;  %v4525_v21 = vld [vmem:[#allocation8 + $0x8] sm:$0xff] }
0x18af   : > { %4704 = vmatpush.msrb.mxu3 %v4670_v29 }
0x18b0   : > { %4571 = vrot.lane.b32.xlu2 %v4548_v52, %s6699_s2  ;;  %v4767_v52 = vld [vmem:[#allocation8 + $0x270] sm:$0xff] }
0x18b1   : > { %4705 = vmatpush.msrb.mxu3 %v4668_v62 }
0x18b3   : > { %4706 = vmatpush.msrb.mxu3 %v4666_v31 }
0x18b5   : > { %v4740_v57 = vpop.permute.xlu1 %4739  ;;  %4800 = vmatpush.msra.mxu3 %v4768_v32 }
0x18b6   : > { %v4742_v18 = vadd.f32 %v4740_v57, %v4737_v13  ;;  %v4755_v57 = vld [vmem:[#allocation8 + $0x210] sm:$0xff] }
0x18b7   : > { %4801 = vmatpush.msra.mxu3 %v4766_v35 }
0x18b9   : > { %4802 = vmatpush.msra.mxu3 %v4764_v37 }
0x18bb   : > { %4803 = vmatpush.msra.mxu3 %v4762_v3 }
0x18bd   : > { %v4662_v63 = vpop.permute.xlu1 %4661  ;;  %4804 = vmatpush.msra.mxu3 %v4760_v43 }
0x18be   : > { %v4664_v7 = vadd.f32 %v4662_v63, %v6605_v24  ;;  %v4553_v24 = vld [vmem:[#allocation8 + $0xb8] sm:$0xff] }
0x18bf   : > { %4609 = vmatpush.msra.mxu1 %v4553_v24  ;;  %4805 = vmatpush.msra.mxu3 %v4758_v46 }
0x18c0   : > { %4687 = vrot.lane.b32.xlu1 %v4664_v7, %s6699_s2 }
0x18c1   : > { %4610 = vmatpush.msra.mxu1 %v4551_v25  ;;  %4806 = vmatpush.msra.mxu3 %v4756_v0 }
0x18c3   : > { %4807 = vmatpush.msra.mxu3 %v4754_v47 }
0x18c5   : > { %v4745_v19 = vpop.permute.xlu1 %4744  ;;  %4808 = vmatpush.msra.mxu3 %v4752_v10 }
0x18c6   : > { %v4747_v14 = vadd.f32 %v4745_v19, %v4742_v18 }
0x18c7   : > { %4809 = vmatpush.msra.mxu3 %v4750_v20 }
0x18c8   : > { %4770 = vrot.lane.b32.xlu1 %v4747_v14, %s6699_s2  ;;  %s1022_s2 = scalar_lea.vmem %s6700_s23, %s5374_s22 }
0x18d0   : > { %4818 = vperm.xlu1 %5566, %v4359_v51  }
0x190a   : > { %v4572_v38 = vpop.permute.xlu2 %4571 }
0x190b   : > { %5363 = vmatmul.msk.f32.vlgmr.msrb.gmra.mxu1 %vm2778_vm8, %v4572_v38 }
0x190c   : > { %4646 = vmatpush.msrb.mxu1 %v4543_v39 }
0x190e   : > { %4647 = vmatpush.msrb.mxu1 %v4541_v40 }
0x1910   : > { %4648 = vmatpush.msrb.mxu1 %v4539_v44 }
0x1912   : > { %4649 = vmatpush.msrb.mxu1 %v4537_v42 }
0x1913   : > { %5364 = vmatmul.msk.f32.vlgmr.msra.gmra.mxu1 %vm2778_vm8, %v4572_v38 }
0x1914   : > { %4650 = vmatpush.msrb.mxu1 %v4535_v49 }
0x1916   : > { %4651 = vmatpush.msrb.mxu1 %v4533_v50 }
0x1918   : > { %4652 = vmatpush.msrb.mxu1 %v4531_v9 }
0x191a   : > { %4653 = vmatpush.msrb.mxu1 %v4529_v15 }
0x191c   : > { %4654 = vmatpush.msrb.mxu1 %v4527_v5 }
0x191e   : > { %4655 = vmatpush.msrb.mxu1 %v4525_v21 }
0x191f   : > { %5366 = vmatmul.msk.f32.vlgmr.msrb.gmra.mxu1 %vm2778_vm8, %v6613_v6 }
0x1920   : > { %4780 = vmatpush.msra.mxu1 %v4767_v52 }
0x1922   : > { %4781 = vmatpush.msra.mxu1 %v4765_v53 }
0x1924   : > { %4782 = vmatpush.msra.mxu1 %v4763_v27 }
0x1926   : > { %4783 = vmatpush.msra.mxu1 %v4761_v54 }
0x1928   : > { %4784 = vmatpush.msra.mxu1 %v4759_v55 }
0x1929   : > { %v4637_v7 = vpop.f32.mrf.mxu2 }
0x192a   : > { %4785 = vmatpush.msra.mxu1 %v4757_v56 }
0x192c   : > { %4786 = vmatpush.msra.mxu1 %v4755_v57 }
0x192e   : > { %4787 = vmatpush.msra.mxu1 %v4753_v58 }
0x1930   : > { %4788 = vmatpush.msra.mxu1 %v4751_v59 }
0x1932   : > { %v4688_v61 = vpop.permute.xlu1 %4687  ;;  %4789 = vmatpush.msra.mxu1 %v4749_v60 }
0x1933   : > { %5367 = vmatmul.msk.f32.vlgmr.msrb.gmra.mxu3 %vm2778_vm8, %v4688_v61  ;;  %5368 = vmatmul.msk.f32.vlgmr.msrb.gmra.mxu2 %vm2778_vm8, %v4688_v61 }
0x193a   : > { %v4771_v6 = vpop.permute.xlu1 %4770 }
0x193b   : > { %5369 = vmatmul.msk.f32.vlgmr.msra.gmra.mxu1 %vm2778_vm8, %v4771_v6  ;;  %5370 = vmatmul.msk.f32.vlgmr.msra.gmra.mxu3 %vm2778_vm8, %v4771_v6 }
0x1942   : > { %v4819_v26 = vpop.permute.xlu1 %4818 }
0x1988   : > { %v4592_v63 = vpop.f32.mrf.mxu1 }
0x1989   : > { %v4638_v13 = vadd.f32 %v4637_v7, %v4592_v63 }
0x1990   : > { %v4612_v2 = vpop.f32.mrf.mxu1 }
0x199c   : > { %v4657_v8 = vpop.f32.mrf.mxu1 }
0x199d   : > { %v4658_v18 = vadd.f32 %v4657_v8, %v4612_v2 }
0x19b6   : > { %v4708_v12 = vpop.f32.mrf.mxu3  ;;  %v4728_v16 = vpop.f32.mrf.mxu2 }
0x19b7   : > { %v4731_v19 = vadd.f32 %v4708_v12, %v4638_v13  ;;  %v4732_v14 = vadd.f32 %v4728_v16, %v4658_v18 }
0x19b8   : > { %v4791_v22 = vpop.f32.mrf.mxu1 }
0x19b9   : > { %v4814_v24 = vadd.f32 %v4791_v22, %v4731_v19 }
0x19bb   : > { %v4821_v4 = vadd.f32 %v4819_v26, %v4814_v24 }
0x19be   : > { %v4811_v23 = vpop.f32.mrf.mxu3 }
0x19bf   : > { %v4815_v25 = vadd.f32 %v4811_v23, %v4732_v14 }
0x19c1   : > { %v4822_v1 = vadd.f32 %v4819_v26, %v4815_v25 }
0x19c3   : > { %v4825_v17 = vrot.slane %v4822_v1, 4 }
0x19c5   : > { %v4826_v28 = vsel %vm2157_vm11, %v4821_v4, %v4825_v17 }
0x19c6   : > { %4828 = vst [vmem:[%s1022_s2] sm:$0xff] %v4826_v28 }
0x19c7 PF: > { %s6701_s1 = sld [smem:[#allocation27_spill]] }
0x19cd   : > { %s76_s22 = sadd.s32 1, %s6701_s1  }
0x19ce   : > { %p73_p3 = scmp.ge.s32.totalorder %s76_s22, 4  }
0x19d0   :  { %75 = sbr.rel (!%p73_p3) target bundleno = 64 (0x40), region = 232 }
0x19d5   :  { %4850 = vsyncpa [#allocation3], 1 }
0x19d6   :  { %4852 = vsyncpa [#allocation3 + $0x1], 1 }
0x19d7   :  { %4853 = vsyncpa [#allocation7], 1 }
0x19d8   :  { %4854 = vsyncpa [#allocation4], 1 }
0x19d9   :  { %4856 = vsyncpa [#allocation4 + $0x1], 1 }

</bundles_post_ra>
